<compile_context>
chip_gen: v6e
topology: v6e:2x2x1
jax: 0.10.0
libtpu: 0.0.40
codegen_flags: <defaults>
</compile_context>

<pallas_src>
import jax
import jax.numpy as jnp
from jax.experimental import pallas as pl
from jax.experimental.pallas import tpu as pltpu


# ----------------------------------------------------------------------------
# Pallas kernel: fused matmul (bf16 MXU, f32 accumulate) + bias + optional ReLU
# ----------------------------------------------------------------------------
def _make_kernel(relu: bool):
    def kernel(x_ref, w_ref, b_ref, o_ref):
        acc = jnp.dot(x_ref[...], w_ref[...], preferred_element_type=jnp.float32)
        y = acc + b_ref[...]                       # f32 epilogue
        if relu:
            y = jnp.maximum(y, 0.0)
        o_ref[...] = y.astype(o_ref.dtype)
    return kernel


def _pick_tm(M: int, max_tm: int = 512) -> int:
    """Pick an M tile: multiple of 8 dividing M (no padding), grid >= 2 when possible."""
    if M <= max_tm:
        for parts in (4, 2):                       # split for megacore if cleanly possible
            if M % (8 * parts) == 0:
                return M // parts
        return M                                   # single full-M block (e.g. M=2 for fc1)
    for tm in range(max_tm, 7, -8):                # largest multiple of 8 dividing M
        if M % tm == 0:
            return tm
    return max_tm                                  # fallback: will pad


def fused_matmul(x, w, bias, relu=True, out_dtype=jnp.bfloat16):
    """maybe_relu(x @ w + bias) as a Pallas TPU kernel.

    x: [M, K], w: [K, N], bias: [N].  Operands are cast to bf16 for the MXU;
    accumulation, bias add and ReLU happen in f32; output stored as `out_dtype`.
    M is tiled over a 'parallel' grid; K and N stay whole (resident in VMEM).
    """
    M, K = x.shape
    Kw, N = w.shape
    assert K == Kw

    tm = _pick_tm(M)
    Mp = ((M + tm - 1) // tm) * tm

    x_bf = x.astype(jnp.bfloat16)
    if Mp != M:                                    # not hit at these shapes
        x_bf = jnp.pad(x_bf, ((0, Mp - M), (0, 0)))
    w_bf = w.astype(jnp.bfloat16)
    bias2 = bias.reshape(1, N).astype(jnp.float32)

    out_itemsize = jnp.dtype(out_dtype).itemsize
    cost = pl.CostEstimate(
        flops=2 * Mp * K * N,
        transcendentals=0,
        bytes_accessed=Mp * K * 2 + K * N * 2 + N * 4 + Mp * N * out_itemsize,
    )

    out = pl.pallas_call(
        _make_kernel(relu),
        out_shape=jax.ShapeDtypeStruct((Mp, N), out_dtype),
        grid=(Mp // tm,),
        in_specs=[
            pl.BlockSpec((tm, K), lambda i: (i, 0)),
            pl.BlockSpec((K, N), lambda i: (0, 0)),
            pl.BlockSpec((1, N), lambda i: (0, 0)),
        ],
        out_specs=pl.BlockSpec((tm, N), lambda i: (i, 0)),
        compiler_params=pltpu.CompilerParams(
            dimension_semantics=("parallel",),
            vmem_limit_bytes=32 * 1024 * 1024,
        ),
        cost_estimate=cost,
    )(x_bf, w_bf, bias2)
    return out[:M] if Mp != M else out


# ----------------------------------------------------------------------------
# Conv lowering (im2col is thin XLA glue in bf16; the matmul runs on the MXU)
# ----------------------------------------------------------------------------
def conv_relu(x_nhwc, p):
    """3x3 valid conv (stride 1) + bias + ReLU via im2col + fused Pallas matmul."""
    k = p["k"]
    n, h, w, c = x_nhwc.shape
    oh, ow = h - k + 1, w - k + 1
    cols = []
    for i in range(k):
        for j in range(k):
            cols.append(x_nhwc[:, i:i + oh, j:j + ow, :])
    col = jnp.concatenate(cols, axis=-1).reshape(n * oh * ow, k * k * c)
    y = fused_matmul(col, p["w"], p["b"], relu=True, out_dtype=jnp.bfloat16)
    return y.reshape(n, oh, ow, -1)


# ----------------------------------------------------------------------------
# Parameter construction (deterministic, synthetic; weight layout is (kh,kw,cin,cout)
# flattened to match the im2col column order — real PyTorch (cout,cin,kh,kw) weights
# would need a permute before use)
# ----------------------------------------------------------------------------
def init_net_params(key):
    ks = jax.random.split(key, 8)

    def conv_p(kw, kb, cin, cout, k=3):
        fan = k * k * cin
        w = jax.random.normal(kw, (k, k, cin, cout), jnp.float32) / jnp.sqrt(float(fan))
        b = 0.1 * jax.random.normal(kb, (cout,), jnp.float32)
        return {"w": w.reshape(k * k * cin, cout), "b": b, "k": k}

    return {
        "conv1": conv_p(ks[0], ks[1], 7, 64),
        "conv2": conv_p(ks[2], ks[3], 64, 64),
        "fc1_w": jax.random.normal(ks[4], (12544, 128), jnp.float32) / jnp.sqrt(12544.0),
        "fc1_b": 0.1 * jax.random.normal(ks[5], (128,), jnp.float32),
        "fc2_w": jax.random.normal(ks[6], (128, 9), jnp.float32) / jnp.sqrt(128.0),
        "fc2_b": 0.1 * jax.random.normal(ks[7], (9,), jnp.float32),
    }


# ----------------------------------------------------------------------------
# Full forward pass (matches the PyTorch Net.forward, inference semantics)
# ----------------------------------------------------------------------------
def net_forward(x_nchw, params):
    x = jnp.transpose(x_nchw, (0, 2, 3, 1)).astype(jnp.float32)   # NCHW -> NHWC

    # conv1 + ReLU : [N,32,32,7] -> [N,30,30,64]
    x = conv_relu(x, params["conv1"])
    # conv2 + ReLU : -> [N,28,28,64]
    x = conv_relu(x, params["conv2"])

    # max_pool2d(2) : -> [N,14,14,64]  (tiny tail reduction; plain-JAX glue)
    n, h, w, c = x.shape
    x = x.reshape(n, h // 2, 2, w // 2, 2, c).max(axis=(2, 4))

    # dropout1: identity in inference

    # flatten in PyTorch's NCHW order -> [N, 12544]
    x = jnp.transpose(x, (0, 3, 1, 2)).reshape(n, -1)

    # fc1 + ReLU via the fused Pallas matmul (K=12544, N=128; M=2 exact, no padding)
    x = fused_matmul(x, params["fc1_w"], params["fc1_b"], relu=True,
                     out_dtype=jnp.float32)

    # dropout2: identity in inference

    # fc2 (M=2, K=128, N=9): too tiny for a Pallas launch -> plain XLA dot
    y = jnp.dot(x, params["fc2_w"], preferred_element_type=jnp.float32) + params["fc2_b"]
    return y


if __name__ == "__main__":
    key = jax.random.PRNGKey(0)
    k_x, k_p = jax.random.split(key)

    batch, in_channels, spatial, classes = 2, 7, 32, 9
    # 32x32 input -> conv 30 -> conv 28 -> pool 14; 64*14*14 = 12544 = fc1 in_features.
    x = jax.random.normal(k_x, (batch, in_channels, spatial, spatial), jnp.float32)
    params = init_net_params(k_p)

    fwd = jax.jit(lambda inp: net_forward(inp, params))
    out = jax.block_until_ready(fwd(x))

    assert out.shape == (batch, classes), out.shape
    assert bool(jnp.all(jnp.isfinite(out)))
    print("KERNEL_OK")
</pallas_src>

<mosaic_0001>
module attributes {stable_mosaic.version = 11 : i64} {
  func.func @kernel(%arg0: i32, %arg1: memref<360x63xbf16, #tpu.memory_space<vmem>>, %arg2: memref<63x64xbf16, #tpu.memory_space<vmem>>, %arg3: memref<1x64xf32, #tpu.memory_space<vmem>>, %arg4: memref<360x64xbf16, #tpu.memory_space<vmem>>) attributes {dimension_semantics = [#tpu.dimension_semantics<parallel>], iteration_bounds = array<i64: 5>, scalar_prefetch = 0 : i64, scratch_operands = 0 : i64, tpu.core_type = #tpu.core_type<tc>, window_params = [{transform_indices = @transform_0, window_bounds = array<i64: 360, 63>}, {pipeline_mode = #tpu.pipeline_mode<synchronous>, transform_indices = @transform_1, window_bounds = array<i64: 63, 64>}, {pipeline_mode = #tpu.pipeline_mode<synchronous>, transform_indices = @transform_2, window_bounds = array<i64: 1, 64>}, {transform_indices = @transform_3, window_bounds = array<i64: 360, 64>}]} {
    %c0 = arith.constant 0 : index
    %c0_0 = arith.constant 0 : index
    %0 = vector.load %arg1[%c0, %c0_0] : memref<360x63xbf16, #tpu.memory_space<vmem>>, vector<360x63xbf16>
    %c0_1 = arith.constant 0 : index
    %c0_2 = arith.constant 0 : index
    %1 = vector.load %arg2[%c0_1, %c0_2] : memref<63x64xbf16, #tpu.memory_space<vmem>>, vector<63x64xbf16>
    %cst = arith.constant dense<0.000000e+00> : vector<360x64xf32>
    %2 = tpu.matmul %0, %1, %cst {dimension_numbers = #tpu.dot_dimension_numbers<[1], [0], [0], [1], [0, 0, 1, 1], [], []>} : vector<360x63xbf16>, vector<63x64xbf16>, vector<360x64xf32> -> vector<360x64xf32>
    %c0_3 = arith.constant 0 : index
    %c0_4 = arith.constant 0 : index
    %3 = vector.load %arg3[%c0_3, %c0_4] : memref<1x64xf32, #tpu.memory_space<vmem>>, vector<1x64xf32>
    %4 = vector.broadcast %3 : vector<1x64xf32> to vector<360x64xf32>
    %5 = arith.addf %2, %4 : vector<360x64xf32>
    %cst_5 = arith.constant 0.000000e+00 : f32
    %6 = vector.broadcast %cst_5 : f32 to vector<360x64xf32>
    %7 = arith.maximumf %5, %6 : vector<360x64xf32>
    %8 = arith.truncf %7 : vector<360x64xf32> to vector<360x64xbf16>
    %c0_6 = arith.constant 0 : index
    %c0_7 = arith.constant 0 : index
    %9 = vector.load %arg4[%c0_6, %c0_7] : memref<360x64xbf16, #tpu.memory_space<vmem>>, vector<360x64xbf16>
    tpu.vector_store %arg4[%c0_6, %c0_7], %8 {strides = array<i32>} : memref<360x64xbf16, #tpu.memory_space<vmem>>, vector<360x64xbf16>,
    return
  }
  func.func @transform_0(%arg0: i32) -> (i32, i32) {
    %c0_i32 = arith.constant 0 : i32
    %c0_i32_0 = arith.constant 0 : i32
    return %arg0, %c0_i32 : i32, i32
  }
  func.func @transform_1(%arg0: i32) -> (i32, i32) {
    %c0_i32 = arith.constant 0 : i32
    %c0_i32_0 = arith.constant 0 : i32
    %c0_i32_1 = arith.constant 0 : i32
    return %c0_i32, %c0_i32_0 : i32, i32
  }
  func.func @transform_2(%arg0: i32) -> (i32, i32) {
    %c0_i32 = arith.constant 0 : i32
    %c0_i32_0 = arith.constant 0 : i32
    %c0_i32_1 = arith.constant 0 : i32
    return %c0_i32, %c0_i32_0 : i32, i32
  }
  func.func @transform_3(%arg0: i32) -> (i32, i32) {
    %c0_i32 = arith.constant 0 : i32
    %c0_i32_0 = arith.constant 0 : i32
    return %arg0, %c0_i32 : i32, i32
  }
}

module attributes {stable_mosaic.version = 11 : i64} {
  func.func @kernel(%arg0: i32, %arg1: memref<392x576xbf16, #tpu.memory_space<vmem>>, %arg2: memref<576x64xbf16, #tpu.memory_space<vmem>>, %arg3: memref<1x64xf32, #tpu.memory_space<vmem>>, %arg4: memref<392x64xbf16, #tpu.memory_space<vmem>>) attributes {dimension_semantics = [#tpu.dimension_semantics<parallel>], iteration_bounds = array<i64: 4>, scalar_prefetch = 0 : i64, scratch_operands = 0 : i64, tpu.core_type = #tpu.core_type<tc>, window_params = [{transform_indices = @transform_0, window_bounds = array<i64: 392, 576>}, {pipeline_mode = #tpu.pipeline_mode<synchronous>, transform_indices = @transform_1, window_bounds = array<i64: 576, 64>}, {pipeline_mode = #tpu.pipeline_mode<synchronous>, transform_indices = @transform_2, window_bounds = array<i64: 1, 64>}, {transform_indices = @transform_3, window_bounds = array<i64: 392, 64>}]} {
    %c0 = arith.constant 0 : index
    %c0_0 = arith.constant 0 : index
    %0 = vector.load %arg1[%c0, %c0_0] : memref<392x576xbf16, #tpu.memory_space<vmem>>, vector<392x576xbf16>
    %c0_1 = arith.constant 0 : index
    %c0_2 = arith.constant 0 : index
    %1 = vector.load %arg2[%c0_1, %c0_2] : memref<576x64xbf16, #tpu.memory_space<vmem>>, vector<576x64xbf16>
    %cst = arith.constant dense<0.000000e+00> : vector<392x64xf32>
    %2 = tpu.matmul %0, %1, %cst {dimension_numbers = #tpu.dot_dimension_numbers<[1], [0], [0], [1], [0, 0, 1, 1], [], []>} : vector<392x576xbf16>, vector<576x64xbf16>, vector<392x64xf32> -> vector<392x64xf32>
    %c0_3 = arith.constant 0 : index
    %c0_4 = arith.constant 0 : index
    %3 = vector.load %arg3[%c0_3, %c0_4] : memref<1x64xf32, #tpu.memory_space<vmem>>, vector<1x64xf32>
    %4 = vector.broadcast %3 : vector<1x64xf32> to vector<392x64xf32>
    %5 = arith.addf %2, %4 : vector<392x64xf32>
    %cst_5 = arith.constant 0.000000e+00 : f32
    %6 = vector.broadcast %cst_5 : f32 to vector<392x64xf32>
    %7 = arith.maximumf %5, %6 : vector<392x64xf32>
    %8 = arith.truncf %7 : vector<392x64xf32> to vector<392x64xbf16>
    %c0_6 = arith.constant 0 : index
    %c0_7 = arith.constant 0 : index
    %9 = vector.load %arg4[%c0_6, %c0_7] : memref<392x64xbf16, #tpu.memory_space<vmem>>, vector<392x64xbf16>
    tpu.vector_store %arg4[%c0_6, %c0_7], %8 {strides = array<i32>} : memref<392x64xbf16, #tpu.memory_space<vmem>>, vector<392x64xbf16>,
    return
  }
  func.func @transform_0(%arg0: i32) -> (i32, i32) {
    %c0_i32 = arith.constant 0 : i32
    %c0_i32_0 = arith.constant 0 : i32
    return %arg0, %c0_i32 : i32, i32
  }
  func.func @transform_1(%arg0: i32) -> (i32, i32) {
    %c0_i32 = arith.constant 0 : i32
    %c0_i32_0 = arith.constant 0 : i32
    %c0_i32_1 = arith.constant 0 : i32
    return %c0_i32, %c0_i32_0 : i32, i32
  }
  func.func @transform_2(%arg0: i32) -> (i32, i32) {
    %c0_i32 = arith.constant 0 : i32
    %c0_i32_0 = arith.constant 0 : i32
    %c0_i32_1 = arith.constant 0 : i32
    return %c0_i32, %c0_i32_0 : i32, i32
  }
  func.func @transform_3(%arg0: i32) -> (i32, i32) {
    %c0_i32 = arith.constant 0 : i32
    %c0_i32_0 = arith.constant 0 : i32
    return %arg0, %c0_i32 : i32, i32
  }
}

module attributes {stable_mosaic.version = 11 : i64} {
  func.func @kernel(%arg0: i32, %arg1: memref<2x12544xbf16, #tpu.memory_space<vmem>>, %arg2: memref<12544x128xbf16, #tpu.memory_space<vmem>>, %arg3: memref<1x128xf32, #tpu.memory_space<vmem>>, %arg4: memref<2x128xf32, #tpu.memory_space<vmem>>) attributes {dimension_semantics = [#tpu.dimension_semantics<parallel>], iteration_bounds = array<i64: 1>, scalar_prefetch = 0 : i64, scratch_operands = 0 : i64, tpu.core_type = #tpu.core_type<tc>, window_params = [{transform_indices = @transform_0, window_bounds = array<i64: 2, 12544>}, {pipeline_mode = #tpu.pipeline_mode<synchronous>, transform_indices = @transform_1, window_bounds = array<i64: 12544, 128>}, {pipeline_mode = #tpu.pipeline_mode<synchronous>, transform_indices = @transform_2, window_bounds = array<i64: 1, 128>}, {transform_indices = @transform_3, window_bounds = array<i64: 2, 128>}]} {
    %c0 = arith.constant 0 : index
    %c0_0 = arith.constant 0 : index
    %0 = vector.load %arg1[%c0, %c0_0] : memref<2x12544xbf16, #tpu.memory_space<vmem>>, vector<2x12544xbf16>
    %c0_1 = arith.constant 0 : index
    %c0_2 = arith.constant 0 : index
    %1 = vector.load %arg2[%c0_1, %c0_2] : memref<12544x128xbf16, #tpu.memory_space<vmem>>, vector<12544x128xbf16>
    %cst = arith.constant dense<0.000000e+00> : vector<2x128xf32>
    %2 = tpu.matmul %0, %1, %cst {dimension_numbers = #tpu.dot_dimension_numbers<[1], [0], [0], [1], [0, 0, 1, 1], [], []>} : vector<2x12544xbf16>, vector<12544x128xbf16>, vector<2x128xf32> -> vector<2x128xf32>
    %c0_3 = arith.constant 0 : index
    %c0_4 = arith.constant 0 : index
    %3 = vector.load %arg3[%c0_3, %c0_4] : memref<1x128xf32, #tpu.memory_space<vmem>>, vector<1x128xf32>
    %4 = vector.broadcast %3 : vector<1x128xf32> to vector<2x128xf32>
    %5 = arith.addf %2, %4 : vector<2x128xf32>
    %cst_5 = arith.constant 0.000000e+00 : f32
    %6 = vector.broadcast %cst_5 : f32 to vector<2x128xf32>
    %7 = arith.maximumf %5, %6 : vector<2x128xf32>
    %c0_6 = arith.constant 0 : index
    %c0_7 = arith.constant 0 : index
    %8 = vector.load %arg4[%c0_6, %c0_7] : memref<2x128xf32, #tpu.memory_space<vmem>>, vector<2x128xf32>
    tpu.vector_store %arg4[%c0_6, %c0_7], %7 {strides = array<i32>} : memref<2x128xf32, #tpu.memory_space<vmem>>, vector<2x128xf32>,
    return
  }
  func.func @transform_0(%arg0: i32) -> (i32, i32) {
    %c0_i32 = arith.constant 0 : i32
    %c0_i32_0 = arith.constant 0 : i32
    return %arg0, %c0_i32 : i32, i32
  }
  func.func @transform_1(%arg0: i32) -> (i32, i32) {
    %c0_i32 = arith.constant 0 : i32
    %c0_i32_0 = arith.constant 0 : i32
    %c0_i32_1 = arith.constant 0 : i32
    return %c0_i32, %c0_i32_0 : i32, i32
  }
  func.func @transform_2(%arg0: i32) -> (i32, i32) {
    %c0_i32 = arith.constant 0 : i32
    %c0_i32_0 = arith.constant 0 : i32
    %c0_i32_1 = arith.constant 0 : i32
    return %c0_i32, %c0_i32_0 : i32, i32
  }
  func.func @transform_3(%arg0: i32) -> (i32, i32) {
    %c0_i32 = arith.constant 0 : i32
    %c0_i32_0 = arith.constant 0 : i32
    return %arg0, %c0_i32 : i32, i32
  }
}

</mosaic_0001>

<bundles_post_ra>
// kernel: _lambda_.3
= control target key start
LH: loop header
LB: loop body
LE: loop exit
PB: predicated region body
PF: predicated region fallthrough
CT: control target
= control target key end

     0   :  { %s1346_s12 = smov 0   ;;  %s1626_s0 = inlined_call_operand.vmem [shape: bf16[1800,63], index: 0, kind: input, shape index: {}]   ;;  %s1627_s1 = inlined_call_operand.vmem [shape: bf16[63,64], index: 1, kind: input, shape index: {}]   ;;  %s1628_s2 = inlined_call_operand.vmem [shape: f32[1,64], index: 2, kind: input, shape index: {}]   ;;  %s1629_s3 = inlined_call_operand.vmem [shape: bf16[1800,64], index: 3, kind: output, shape index: {}]  }
   0x1 LB: > { %s992_s13 = sadd.s32 4294967295, %s1321_s12   ;;  %p996_p0 = scmp.ge.s32.totalorder %s1321_s12, 1  ;;  %s1321_s12 = sphi %s1346_s12, %s13_s12  }
   0x2   : > { %p138_p1 = scmp.lt.s32.totalorder %s1321_s12, 6 }
   0x4   : > { %p139_p2 = pnand %p996_p0, %p138_p1 }
   0x5   : > { %s162_s16 = smul.u32 (!%p139_p2), 45, %s992_s13 }
   0x6   : > { %142 = sbr.rel (%p139_p2) target bundleno = 323 (0x143), region = 32 }
   0x7   : > { %p163_p3 = scmp.lt.s32.totalorder (!%p139_p2), %s162_s16, 224 }
   0xb   : > { %v1288_v0 = vld [vmem:[%s1627_s1 + $0x18] sm:$0xff]   ;;  %v1323_v1 = vmov 0.0   ;;  %vm441_vm0 = vcmask 1046528   ;;  %vm442_vm1 = vcmask 1047552   ;;  %v1324_v2 = vmov 65535   ;;  %v1289_v6 = vld [vmem:[%s1627_s1 + $0x10] sm:$0xff]  }
   0xc   : > { %1169 = vmatprep.subr.bf16.mxu0 %v1323_v1  ;;  %1269 = vmatprep.subr.bf16.mxu1 %v1323_v1  ;;  %v443_v3 = vsel %vm441_vm0, 4294967295, %v1324_v2  ;;  %vm1325_vm2 = vmmov 0   ;;  %s1631_s16 = smov (!%p163_p3, %s162_s16), 224  ;;  %v1290_v7 = vld [vmem:[%s1627_s1 + $0x8] sm:$0xff]   ;;  %v1291_v8 = vld [vmem:[%s1627_s1] sm:$0xff]   ;;  %vm371_vm3 = vcmask 515072  }
   0xd   : > { %v444_v4 = vsel %vm442_vm1, %v443_v3, 0  ;;  %1177 = vmatprep.mubr.msk.bf16.mxu0 %vm1325_vm2, %v1323_v1  ;;  %1225 = vmatprep.mubr.msk.bf16.mxu1 %vm1325_vm2, %v1323_v1  ;;  %s997_s21 = sshll.u32 %s1631_s16, 2  ;;  %v1479_v32 = vld [vmem:[%s1628_s2] ss:$0 sm:$0xff]  ;;  %vm890_vm4 = vcmask 519168  }
   0xe   : > { %v446_v5 = vand.u32 %v1288_v0, %v444_v4  ;;  %s1381_s24 = scalar_lea.vmem %s1626_s0, %s997_s21  ;;  %s1488_s4 = scalar_lea.vmem %s1629_s3, %s997_s21 }
   0xf   : > { %v1292_v9 = vld [vmem:[%s1381_s24] sm:$0xff]   ;;  %v1294_v11 = vld [vmem:[%s1381_s24 + $0x8] sm:$0xff]   ;;  %v1296_v13 = vld [vmem:[%s1381_s24 + $0x10] sm:$0xff]  }
  0x10   : > { %1170 = vmatpush3.bf16.msra.mxu0 %v446_v5  ;;  %1273 = vmatpush3.bf16.msra.mxu1 %v446_v5  ;;  %v1293_v10 = vld [vmem:[%s1381_s24 + $0x60] sm:$0xff]   ;;  %v1295_v12 = vld [vmem:[%s1381_s24 + $0x68] sm:$0xff]   ;;  %v1297_v14 = vld [vmem:[%s1381_s24 + $0x70] sm:$0xff]  }
  0x11   : > { %1171 = vmatprep.subr.bf16.mxu0 %v1323_v1  ;;  %1270 = vmatprep.subr.bf16.mxu1 %v1323_v1  ;;  %v1298_v15 = vld [vmem:[%s1381_s24 + $0x18] sm:$0xff]   ;;  %v1300_v17 = vld [vmem:[%s1381_s24 + $0x20] sm:$0xff]   ;;  %v1302_v19 = vld [vmem:[%s1381_s24 + $0x28] sm:$0xff]  }
  0x12   : > { %v1299_v16 = vld [vmem:[%s1381_s24 + $0x78] sm:$0xff]   ;;  %v1301_v18 = vld [vmem:[%s1381_s24 + $0x80] sm:$0xff]   ;;  %v1303_v20 = vld [vmem:[%s1381_s24 + $0x88] sm:$0xff]  }
  0x13   : > { %v1304_v21 = vld [vmem:[%s1381_s24 + $0x30] sm:$0xff]   ;;  %v1306_v23 = vld [vmem:[%s1381_s24 + $0x38] sm:$0xff]   ;;  %v1308_v25 = vld [vmem:[%s1381_s24 + $0x40] sm:$0xff]  }
  0x14   : > { %1172 = vmatpush3.bf16.msra.mxu0 %v1289_v6  ;;  %1274 = vmatpush3.bf16.msra.mxu1 %v1289_v6  ;;  %v1305_v22 = vld [vmem:[%s1381_s24 + $0x90] sm:$0xff]   ;;  %v1307_v24 = vld [vmem:[%s1381_s24 + $0x98] sm:$0xff]   ;;  %v1309_v26 = vld [vmem:[%s1381_s24 + $0xa0] sm:$0xff]  }
  0x15   : > { %1173 = vmatprep.subr.bf16.mxu0 %v1323_v1  ;;  %1271 = vmatprep.subr.bf16.mxu1 %v1323_v1  ;;  %v1310_v27 = vld [vmem:[%s1381_s24 + $0x48] sm:$0xff]   ;;  %v1312_v29 = vld [vmem:[%s1381_s24 + $0x50] sm:$0xff]   ;;  %v1314_v31 = vld [vmem:[%s1381_s24 + $0x58] sm:$0xff]  }
  0x16   : > { %v1311_v28 = vld [vmem:[%s1381_s24 + $0xa8] sm:$0xff]   ;;  %v1313_v30 = vld [vmem:[%s1381_s24 + $0xb0] ss:$0 sps:$4 sm:$0xff]  }
  0x18   : > { %1174 = vmatpush3.bf16.msra.mxu0 %v1290_v7  ;;  %1275 = vmatpush3.bf16.msra.mxu1 %v1290_v7 }
  0x19   : > { %1175 = vmatprep.subr.bf16.mxu0 %v1323_v1  ;;  %1272 = vmatprep.subr.bf16.mxu1 %v1323_v1 }
  0x1c   : > { %1176 = vmatpush3.bf16.msra.mxu0 %v1291_v8  ;;  %1276 = vmatpush3.bf16.msra.mxu1 %v1291_v8 }
  0x1f   : > { %1178 = vmatmul.mubr.msk.bf16.vlgmr.msra.gmra.mxu0 %vm371_vm3, %v1292_v9  ;;  %1226 = vmatmul.mubr.msk.bf16.vlgmr.msra.gmra.mxu1 %vm371_vm3, %v1293_v10 }
  0x20   : > { %1181 = vmatprep.mubr.msk.bf16.mxu0 %vm1325_vm2, %v1323_v1  ;;  %1229 = vmatprep.mubr.msk.bf16.mxu1 %vm1325_vm2, %v1323_v1 }
  0x27   : > { %1182 = vmatmul.mubr.msk.bf16.gmra.mxu0 %vm371_vm3, %v1294_v11  ;;  %1230 = vmatmul.mubr.msk.bf16.gmra.mxu1 %vm371_vm3, %v1295_v12 }
  0x28   : > { %1185 = vmatprep.mubr.msk.bf16.mxu0 %vm1325_vm2, %v1323_v1  ;;  %1233 = vmatprep.mubr.msk.bf16.mxu1 %vm1325_vm2, %v1323_v1 }
  0x2f   : > { %1186 = vmatmul.mubr.msk.bf16.gmra.mxu0 %vm371_vm3, %v1296_v13  ;;  %1234 = vmatmul.mubr.msk.bf16.gmra.mxu1 %vm371_vm3, %v1297_v14 }
  0x30   : > { %1189 = vmatprep.mubr.msk.bf16.mxu0 %vm1325_vm2, %v1323_v1  ;;  %1237 = vmatprep.mubr.msk.bf16.mxu1 %vm1325_vm2, %v1323_v1 }
  0x37   : > { %1190 = vmatmul.mubr.msk.bf16.gmra.mxu0 %vm371_vm3, %v1298_v15  ;;  %1238 = vmatmul.mubr.msk.bf16.gmra.mxu1 %vm371_vm3, %v1299_v16 }
  0x38   : > { %1193 = vmatprep.mubr.msk.bf16.mxu0 %vm1325_vm2, %v1323_v1  ;;  %1241 = vmatprep.mubr.msk.bf16.mxu1 %vm1325_vm2, %v1323_v1 }
  0x3f   : > { %1194 = vmatmul.mubr.msk.bf16.gmra.mxu0 %vm371_vm3, %v1300_v17  ;;  %1242 = vmatmul.mubr.msk.bf16.gmra.mxu1 %vm371_vm3, %v1301_v18 }
  0x40   : > { %1197 = vmatprep.mubr.msk.bf16.mxu0 %vm1325_vm2, %v1323_v1  ;;  %1245 = vmatprep.mubr.msk.bf16.mxu1 %vm1325_vm2, %v1323_v1 }
  0x47   : > { %1198 = vmatmul.mubr.msk.bf16.gmra.mxu0 %vm371_vm3, %v1302_v19  ;;  %1246 = vmatmul.mubr.msk.bf16.gmra.mxu1 %vm371_vm3, %v1303_v20 }
  0x48   : > { %1201 = vmatprep.mubr.msk.bf16.mxu0 %vm1325_vm2, %v1323_v1  ;;  %1249 = vmatprep.mubr.msk.bf16.mxu1 %vm1325_vm2, %v1323_v1 }
  0x4f   : > { %1202 = vmatmul.mubr.msk.bf16.gmra.mxu0 %vm371_vm3, %v1304_v21  ;;  %1250 = vmatmul.mubr.msk.bf16.gmra.mxu1 %vm371_vm3, %v1305_v22 }
  0x50   : > { %1205 = vmatprep.mubr.msk.bf16.mxu0 %vm1325_vm2, %v1323_v1  ;;  %1253 = vmatprep.mubr.msk.bf16.mxu1 %vm1325_vm2, %v1323_v1 }
  0x57   : > { %1206 = vmatmul.mubr.msk.bf16.gmra.mxu0 %vm371_vm3, %v1306_v23  ;;  %1254 = vmatmul.mubr.msk.bf16.gmra.mxu1 %vm371_vm3, %v1307_v24 }
  0x58   : > { %1209 = vmatprep.mubr.msk.bf16.mxu0 %vm1325_vm2, %v1323_v1  ;;  %1257 = vmatprep.mubr.msk.bf16.mxu1 %vm1325_vm2, %v1323_v1 }
  0x5f   : > { %1210 = vmatmul.mubr.msk.bf16.gmra.mxu0 %vm371_vm3, %v1308_v25  ;;  %1258 = vmatmul.mubr.msk.bf16.gmra.mxu1 %vm371_vm3, %v1309_v26 }
  0x60   : > { %1213 = vmatprep.mubr.msk.bf16.mxu0 %vm1325_vm2, %v1323_v1  ;;  %1261 = vmatprep.mubr.msk.bf16.mxu1 %vm1325_vm2, %v1323_v1 }
  0x67   : > { %1214 = vmatmul.mubr.msk.bf16.gmra.mxu0 %vm371_vm3, %v1310_v27  ;;  %1262 = vmatmul.mubr.msk.bf16.gmra.mxu1 %vm371_vm3, %v1311_v28 }
  0x68   : > { %1217 = vmatprep.mubr.msk.bf16.mxu0 %vm1325_vm2, %v1323_v1  ;;  %1265 = vmatprep.mubr.msk.bf16.mxu1 %vm1325_vm2, %v1323_v1 }
  0x6f   : > { %1218 = vmatmul.mubr.msk.bf16.gmra.mxu0 %vm371_vm3, %v1312_v29  ;;  %1266 = vmatmul.mubr.msk.bf16.gmra.mxu1 %vm371_vm3, %v1313_v30 }
  0x70   : > { %1221 = vmatprep.mubr.msk.bf16.mxu0 %vm1325_vm2, %v1323_v1 }
  0x77   : > { %1222 = vmatmul.mubr.msk.bf16.gmra.mxu0 %vm371_vm3, %v1314_v31 }
  0xdf   : > { %v482_v33 = vpop.f32.mrf.mxu0  ;;  %v578_v34 = vpop.f32.mrf.mxu1 }
  0xe0   : > { %v483_v35 = vadd.f32 %v1479_v32, %v482_v33  ;;  %v579_v36 = vadd.f32 %v1479_v32, %v578_v34 }
  0xe1   : > { %v1179_v37 = vpop.f32.mrf.mxu0  ;;  %v1227_v38 = vpop.f32.mrf.mxu1 }
  0xe2   : > { %v664_v39 = vmax.f32 %v483_v35, 0.0  ;;  %v688_v40 = vmax.f32 %v579_v36, 0.0 }
  0xe3   : > { %v485_v41 = vpop.f32.mrf.mxu0  ;;  %v581_v42 = vpop.f32.mrf.mxu1 }
  0xe4   : > { %v1097_v43 = vpack.c.bf16 %v664_v39, %v664_v39  ;;  %v486_v44 = vadd.f32 %v1479_v32, %v485_v41  ;;  %v1121_v45 = vpack.c.bf16 %v688_v40, %v688_v40  ;;  %v582_v46 = vadd.f32 %v1479_v32, %v581_v42 }
  0xe5   : > { %v1180_v47 = vpop.f32.mrf.mxu0  ;;  %v1228_v48 = vpop.f32.mrf.mxu1 }
  0xe6   : > { %891 = vst.msk [vmem:[%s1488_s4] sm:$0xf] %vm890_vm4, %v1097_v43  ;;  %v665_v49 = vmax.f32 %v486_v44, 0.0  ;;  %915 = vst.msk [vmem:[%s1488_s4 + $0x60] sm:$0xf] %vm890_vm4, %v1121_v45  ;;  %v689_v50 = vmax.f32 %v582_v46, 0.0 }
  0xe7   : > { %v490_v51 = vpop.f32.mrf.mxu0  ;;  %v586_v52 = vpop.f32.mrf.mxu1 }
  0xe8   : > { %v1098_v53 = vpack.c.bf16 %v665_v49, %v665_v49  ;;  %v491_v54 = vadd.f32 %v1479_v32, %v490_v51  ;;  %v1122_v55 = vpack.c.bf16 %v689_v50, %v689_v50  ;;  %v587_v56 = vadd.f32 %v1479_v32, %v586_v52 }
  0xe9   : > { %v1183_v57 = vpop.f32.mrf.mxu0  ;;  %v1231_v58 = vpop.f32.mrf.mxu1 }
  0xea   : > { %892 = vst.msk [vmem:[%s1488_s4 + $0x4] sm:$0xf] %vm890_vm4, %v1098_v53  ;;  %v666_v59 = vmax.f32 %v491_v54, 0.0  ;;  %916 = vst.msk [vmem:[%s1488_s4 + $0x64] sm:$0xf] %vm890_vm4, %v1122_v55  ;;  %v690_v60 = vmax.f32 %v587_v56, 0.0 }
  0xeb   : > { %v493_v61 = vpop.f32.mrf.mxu0  ;;  %v589_v62 = vpop.f32.mrf.mxu1 }
  0xec   : > { %v1099_v63 = vpack.c.bf16 %v666_v59, %v666_v59  ;;  %v494_v0 = vadd.f32 %v1479_v32, %v493_v61  ;;  %v1123_v1 = vpack.c.bf16 %v690_v60, %v690_v60  ;;  %v590_v2 = vadd.f32 %v1479_v32, %v589_v62 }
  0xed   : > { %v1184_v3 = vpop.f32.mrf.mxu0  ;;  %v1232_v4 = vpop.f32.mrf.mxu1 }
  0xee   : > { %893 = vst.msk [vmem:[%s1488_s4 + $0x8] sm:$0xf] %vm890_vm4, %v1099_v63  ;;  %v667_v5 = vmax.f32 %v494_v0, 0.0  ;;  %917 = vst.msk [vmem:[%s1488_s4 + $0x68] sm:$0xf] %vm890_vm4, %v1123_v1  ;;  %v691_v6 = vmax.f32 %v590_v2, 0.0 }
  0xef   : > { %v498_v7 = vpop.f32.mrf.mxu0  ;;  %v594_v8 = vpop.f32.mrf.mxu1 }
  0xf0   : > { %v1100_v9 = vpack.c.bf16 %v667_v5, %v667_v5  ;;  %v499_v10 = vadd.f32 %v1479_v32, %v498_v7  ;;  %v1124_v11 = vpack.c.bf16 %v691_v6, %v691_v6  ;;  %v595_v12 = vadd.f32 %v1479_v32, %v594_v8 }
  0xf1   : > { %v1187_v13 = vpop.f32.mrf.mxu0  ;;  %v1235_v14 = vpop.f32.mrf.mxu1 }
  0xf2   : > { %894 = vst.msk [vmem:[%s1488_s4 + $0xc] sm:$0xf] %vm890_vm4, %v1100_v9  ;;  %v668_v15 = vmax.f32 %v499_v10, 0.0  ;;  %918 = vst.msk [vmem:[%s1488_s4 + $0x6c] sm:$0xf] %vm890_vm4, %v1124_v11  ;;  %v692_v16 = vmax.f32 %v595_v12, 0.0 }
  0xf3   : > { %v501_v17 = vpop.f32.mrf.mxu0  ;;  %v597_v18 = vpop.f32.mrf.mxu1 }
  0xf4   : > { %v1101_v19 = vpack.c.bf16 %v668_v15, %v668_v15  ;;  %v502_v20 = vadd.f32 %v1479_v32, %v501_v17  ;;  %v1125_v21 = vpack.c.bf16 %v692_v16, %v692_v16  ;;  %v598_v22 = vadd.f32 %v1479_v32, %v597_v18 }
  0xf5   : > { %v1188_v23 = vpop.f32.mrf.mxu0  ;;  %v1236_v24 = vpop.f32.mrf.mxu1 }
  0xf6   : > { %895 = vst.msk [vmem:[%s1488_s4 + $0x10] sm:$0xf] %vm890_vm4, %v1101_v19  ;;  %v669_v25 = vmax.f32 %v502_v20, 0.0  ;;  %919 = vst.msk [vmem:[%s1488_s4 + $0x70] sm:$0xf] %vm890_vm4, %v1125_v21  ;;  %v693_v26 = vmax.f32 %v598_v22, 0.0 }
  0xf7   : > { %v506_v27 = vpop.f32.mrf.mxu0  ;;  %v602_v28 = vpop.f32.mrf.mxu1 }
  0xf8   : > { %v1102_v29 = vpack.c.bf16 %v669_v25, %v669_v25  ;;  %v507_v30 = vadd.f32 %v1479_v32, %v506_v27  ;;  %v1126_v31 = vpack.c.bf16 %v693_v26, %v693_v26  ;;  %v603_v33 = vadd.f32 %v1479_v32, %v602_v28 }
  0xf9   : > { %v1191_v34 = vpop.f32.mrf.mxu0  ;;  %v1239_v35 = vpop.f32.mrf.mxu1 }
  0xfa   : > { %896 = vst.msk [vmem:[%s1488_s4 + $0x14] sm:$0xf] %vm890_vm4, %v1102_v29  ;;  %v670_v36 = vmax.f32 %v507_v30, 0.0  ;;  %920 = vst.msk [vmem:[%s1488_s4 + $0x74] sm:$0xf] %vm890_vm4, %v1126_v31  ;;  %v694_v37 = vmax.f32 %v603_v33, 0.0 }
  0xfb   : > { %v509_v38 = vpop.f32.mrf.mxu0  ;;  %v605_v39 = vpop.f32.mrf.mxu1 }
  0xfc   : > { %v1103_v40 = vpack.c.bf16 %v670_v36, %v670_v36  ;;  %v510_v41 = vadd.f32 %v1479_v32, %v509_v38  ;;  %v1127_v42 = vpack.c.bf16 %v694_v37, %v694_v37  ;;  %v606_v43 = vadd.f32 %v1479_v32, %v605_v39 }
  0xfd   : > { %v1192_v44 = vpop.f32.mrf.mxu0  ;;  %v1240_v45 = vpop.f32.mrf.mxu1 }
  0xfe   : > { %897 = vst.msk [vmem:[%s1488_s4 + $0x18] sm:$0xf] %vm890_vm4, %v1103_v40  ;;  %v671_v46 = vmax.f32 %v510_v41, 0.0  ;;  %921 = vst.msk [vmem:[%s1488_s4 + $0x78] sm:$0xf] %vm890_vm4, %v1127_v42  ;;  %v695_v47 = vmax.f32 %v606_v43, 0.0 }
  0xff   : > { %v514_v48 = vpop.f32.mrf.mxu0  ;;  %v610_v49 = vpop.f32.mrf.mxu1 }
 0x100   : > { %v1104_v50 = vpack.c.bf16 %v671_v46, %v671_v46  ;;  %v515_v51 = vadd.f32 %v1479_v32, %v514_v48  ;;  %v1128_v52 = vpack.c.bf16 %v695_v47, %v695_v47  ;;  %v611_v53 = vadd.f32 %v1479_v32, %v610_v49 }
 0x101   : > { %v1195_v54 = vpop.f32.mrf.mxu0  ;;  %v1243_v55 = vpop.f32.mrf.mxu1 }
 0x102   : > { %898 = vst.msk [vmem:[%s1488_s4 + $0x1c] sm:$0xf] %vm890_vm4, %v1104_v50  ;;  %v672_v56 = vmax.f32 %v515_v51, 0.0  ;;  %922 = vst.msk [vmem:[%s1488_s4 + $0x7c] sm:$0xf] %vm890_vm4, %v1128_v52  ;;  %v696_v57 = vmax.f32 %v611_v53, 0.0 }
 0x103   : > { %v517_v58 = vpop.f32.mrf.mxu0  ;;  %v613_v59 = vpop.f32.mrf.mxu1 }
 0x104   : > { %v1105_v60 = vpack.c.bf16 %v672_v56, %v672_v56  ;;  %v518_v61 = vadd.f32 %v1479_v32, %v517_v58  ;;  %v1129_v62 = vpack.c.bf16 %v696_v57, %v696_v57  ;;  %v614_v63 = vadd.f32 %v1479_v32, %v613_v59 }
 0x105   : > { %v1196_v0 = vpop.f32.mrf.mxu0  ;;  %v1244_v1 = vpop.f32.mrf.mxu1 }
 0x106   : > { %899 = vst.msk [vmem:[%s1488_s4 + $0x20] sm:$0xf] %vm890_vm4, %v1105_v60  ;;  %v673_v2 = vmax.f32 %v518_v61, 0.0  ;;  %923 = vst.msk [vmem:[%s1488_s4 + $0x80] sm:$0xf] %vm890_vm4, %v1129_v62  ;;  %v697_v3 = vmax.f32 %v614_v63, 0.0 }
 0x107   : > { %v522_v4 = vpop.f32.mrf.mxu0  ;;  %v618_v5 = vpop.f32.mrf.mxu1 }
 0x108   : > { %v1106_v6 = vpack.c.bf16 %v673_v2, %v673_v2  ;;  %v523_v7 = vadd.f32 %v1479_v32, %v522_v4  ;;  %v1130_v8 = vpack.c.bf16 %v697_v3, %v697_v3  ;;  %v619_v9 = vadd.f32 %v1479_v32, %v618_v5 }
 0x109   : > { %v1199_v10 = vpop.f32.mrf.mxu0  ;;  %v1247_v11 = vpop.f32.mrf.mxu1 }
 0x10a   : > { %900 = vst.msk [vmem:[%s1488_s4 + $0x24] sm:$0xf] %vm890_vm4, %v1106_v6  ;;  %v674_v12 = vmax.f32 %v523_v7, 0.0  ;;  %924 = vst.msk [vmem:[%s1488_s4 + $0x84] sm:$0xf] %vm890_vm4, %v1130_v8  ;;  %v698_v13 = vmax.f32 %v619_v9, 0.0 }
 0x10b   : > { %v525_v14 = vpop.f32.mrf.mxu0  ;;  %v621_v15 = vpop.f32.mrf.mxu1 }
 0x10c   : > { %v1107_v16 = vpack.c.bf16 %v674_v12, %v674_v12  ;;  %v526_v17 = vadd.f32 %v1479_v32, %v525_v14  ;;  %v1131_v18 = vpack.c.bf16 %v698_v13, %v698_v13  ;;  %v622_v19 = vadd.f32 %v1479_v32, %v621_v15 }
 0x10d   : > { %v1200_v20 = vpop.f32.mrf.mxu0  ;;  %v1248_v21 = vpop.f32.mrf.mxu1 }
 0x10e   : > { %901 = vst.msk [vmem:[%s1488_s4 + $0x28] sm:$0xf] %vm890_vm4, %v1107_v16  ;;  %v675_v22 = vmax.f32 %v526_v17, 0.0  ;;  %925 = vst.msk [vmem:[%s1488_s4 + $0x88] sm:$0xf] %vm890_vm4, %v1131_v18  ;;  %v699_v23 = vmax.f32 %v622_v19, 0.0 }
 0x10f   : > { %v530_v24 = vpop.f32.mrf.mxu0  ;;  %v626_v25 = vpop.f32.mrf.mxu1 }
 0x110   : > { %v1108_v26 = vpack.c.bf16 %v675_v22, %v675_v22  ;;  %v531_v27 = vadd.f32 %v1479_v32, %v530_v24  ;;  %v1132_v28 = vpack.c.bf16 %v699_v23, %v699_v23  ;;  %v627_v29 = vadd.f32 %v1479_v32, %v626_v25 }
 0x111   : > { %v1203_v30 = vpop.f32.mrf.mxu0  ;;  %v1251_v31 = vpop.f32.mrf.mxu1 }
 0x112   : > { %902 = vst.msk [vmem:[%s1488_s4 + $0x2c] sm:$0xf] %vm890_vm4, %v1108_v26  ;;  %v676_v33 = vmax.f32 %v531_v27, 0.0  ;;  %926 = vst.msk [vmem:[%s1488_s4 + $0x8c] sm:$0xf] %vm890_vm4, %v1132_v28  ;;  %v700_v34 = vmax.f32 %v627_v29, 0.0 }
 0x113   : > { %v533_v35 = vpop.f32.mrf.mxu0  ;;  %v629_v36 = vpop.f32.mrf.mxu1 }
 0x114   : > { %v1109_v37 = vpack.c.bf16 %v676_v33, %v676_v33  ;;  %v534_v38 = vadd.f32 %v1479_v32, %v533_v35  ;;  %v1133_v39 = vpack.c.bf16 %v700_v34, %v700_v34  ;;  %v630_v40 = vadd.f32 %v1479_v32, %v629_v36 }
 0x115   : > { %v1204_v41 = vpop.f32.mrf.mxu0  ;;  %v1252_v42 = vpop.f32.mrf.mxu1 }
 0x116   : > { %903 = vst.msk [vmem:[%s1488_s4 + $0x30] sm:$0xf] %vm890_vm4, %v1109_v37  ;;  %v677_v43 = vmax.f32 %v534_v38, 0.0  ;;  %927 = vst.msk [vmem:[%s1488_s4 + $0x90] sm:$0xf] %vm890_vm4, %v1133_v39  ;;  %v701_v44 = vmax.f32 %v630_v40, 0.0 }
 0x117   : > { %v538_v45 = vpop.f32.mrf.mxu0  ;;  %v634_v46 = vpop.f32.mrf.mxu1 }
 0x118   : > { %v1110_v47 = vpack.c.bf16 %v677_v43, %v677_v43  ;;  %v539_v48 = vadd.f32 %v1479_v32, %v538_v45  ;;  %v1134_v49 = vpack.c.bf16 %v701_v44, %v701_v44  ;;  %v635_v50 = vadd.f32 %v1479_v32, %v634_v46 }
 0x119   : > { %v1207_v51 = vpop.f32.mrf.mxu0  ;;  %v1255_v52 = vpop.f32.mrf.mxu1 }
 0x11a   : > { %904 = vst.msk [vmem:[%s1488_s4 + $0x34] sm:$0xf] %vm890_vm4, %v1110_v47  ;;  %v678_v53 = vmax.f32 %v539_v48, 0.0  ;;  %928 = vst.msk [vmem:[%s1488_s4 + $0x94] sm:$0xf] %vm890_vm4, %v1134_v49  ;;  %v702_v54 = vmax.f32 %v635_v50, 0.0 }
 0x11b   : > { %v541_v55 = vpop.f32.mrf.mxu0  ;;  %v637_v56 = vpop.f32.mrf.mxu1 }
 0x11c   : > { %v1111_v57 = vpack.c.bf16 %v678_v53, %v678_v53  ;;  %v542_v58 = vadd.f32 %v1479_v32, %v541_v55  ;;  %v1135_v59 = vpack.c.bf16 %v702_v54, %v702_v54  ;;  %v638_v60 = vadd.f32 %v1479_v32, %v637_v56 }
 0x11d   : > { %v1208_v61 = vpop.f32.mrf.mxu0  ;;  %v1256_v62 = vpop.f32.mrf.mxu1 }
 0x11e   : > { %905 = vst.msk [vmem:[%s1488_s4 + $0x38] sm:$0xf] %vm890_vm4, %v1111_v57  ;;  %v679_v63 = vmax.f32 %v542_v58, 0.0  ;;  %929 = vst.msk [vmem:[%s1488_s4 + $0x98] sm:$0xf] %vm890_vm4, %v1135_v59  ;;  %v703_v0 = vmax.f32 %v638_v60, 0.0 }
 0x11f   : > { %v546_v1 = vpop.f32.mrf.mxu0  ;;  %v642_v2 = vpop.f32.mrf.mxu1 }
 0x120   : > { %v1112_v3 = vpack.c.bf16 %v679_v63, %v679_v63  ;;  %v547_v4 = vadd.f32 %v1479_v32, %v546_v1  ;;  %v1136_v5 = vpack.c.bf16 %v703_v0, %v703_v0  ;;  %v643_v6 = vadd.f32 %v1479_v32, %v642_v2 }
 0x121   : > { %v1211_v7 = vpop.f32.mrf.mxu0  ;;  %v1259_v8 = vpop.f32.mrf.mxu1 }
 0x122   : > { %906 = vst.msk [vmem:[%s1488_s4 + $0x3c] sm:$0xf] %vm890_vm4, %v1112_v3  ;;  %v680_v9 = vmax.f32 %v547_v4, 0.0  ;;  %930 = vst.msk [vmem:[%s1488_s4 + $0x9c] sm:$0xf] %vm890_vm4, %v1136_v5  ;;  %v704_v10 = vmax.f32 %v643_v6, 0.0 }
 0x123   : > { %v549_v11 = vpop.f32.mrf.mxu0  ;;  %v645_v12 = vpop.f32.mrf.mxu1 }
 0x124   : > { %v1113_v13 = vpack.c.bf16 %v680_v9, %v680_v9  ;;  %v550_v14 = vadd.f32 %v1479_v32, %v549_v11  ;;  %v1137_v15 = vpack.c.bf16 %v704_v10, %v704_v10  ;;  %v646_v16 = vadd.f32 %v1479_v32, %v645_v12 }
 0x125   : > { %v1212_v17 = vpop.f32.mrf.mxu0  ;;  %v1260_v18 = vpop.f32.mrf.mxu1 }
 0x126   : > { %907 = vst.msk [vmem:[%s1488_s4 + $0x40] sm:$0xf] %vm890_vm4, %v1113_v13  ;;  %v681_v19 = vmax.f32 %v550_v14, 0.0  ;;  %931 = vst.msk [vmem:[%s1488_s4 + $0xa0] sm:$0xf] %vm890_vm4, %v1137_v15  ;;  %v705_v20 = vmax.f32 %v646_v16, 0.0 }
 0x127   : > { %v554_v21 = vpop.f32.mrf.mxu0  ;;  %v650_v22 = vpop.f32.mrf.mxu1 }
 0x128   : > { %v1114_v23 = vpack.c.bf16 %v681_v19, %v681_v19  ;;  %v555_v24 = vadd.f32 %v1479_v32, %v554_v21  ;;  %v1138_v25 = vpack.c.bf16 %v705_v20, %v705_v20  ;;  %v651_v26 = vadd.f32 %v1479_v32, %v650_v22 }
 0x129   : > { %v1215_v27 = vpop.f32.mrf.mxu0  ;;  %v1263_v28 = vpop.f32.mrf.mxu1 }
 0x12a   : > { %908 = vst.msk [vmem:[%s1488_s4 + $0x44] sm:$0xf] %vm890_vm4, %v1114_v23  ;;  %v682_v29 = vmax.f32 %v555_v24, 0.0  ;;  %932 = vst.msk [vmem:[%s1488_s4 + $0xa4] sm:$0xf] %vm890_vm4, %v1138_v25  ;;  %v706_v30 = vmax.f32 %v651_v26, 0.0 }
 0x12b   : > { %v557_v31 = vpop.f32.mrf.mxu0  ;;  %v653_v33 = vpop.f32.mrf.mxu1 }
 0x12c   : > { %v1115_v34 = vpack.c.bf16 %v682_v29, %v682_v29  ;;  %v558_v35 = vadd.f32 %v1479_v32, %v557_v31  ;;  %v1139_v36 = vpack.c.bf16 %v706_v30, %v706_v30  ;;  %v654_v37 = vadd.f32 %v1479_v32, %v653_v33 }
 0x12d   : > { %v1216_v38 = vpop.f32.mrf.mxu0  ;;  %v1264_v39 = vpop.f32.mrf.mxu1 }
 0x12e   : > { %909 = vst.msk [vmem:[%s1488_s4 + $0x48] sm:$0xf] %vm890_vm4, %v1115_v34  ;;  %v683_v40 = vmax.f32 %v558_v35, 0.0  ;;  %933 = vst.msk [vmem:[%s1488_s4 + $0xa8] sm:$0xf] %vm890_vm4, %v1139_v36  ;;  %v707_v41 = vmax.f32 %v654_v37, 0.0 }
 0x12f   : > { %v562_v42 = vpop.f32.mrf.mxu0  ;;  %v658_v43 = vpop.f32.mrf.mxu1 }
 0x130   : > { %v1116_v44 = vpack.c.bf16 %v683_v40, %v683_v40  ;;  %v563_v45 = vadd.f32 %v1479_v32, %v562_v42  ;;  %v1140_v46 = vpack.c.bf16 %v707_v41, %v707_v41  ;;  %v659_v47 = vadd.f32 %v1479_v32, %v658_v43 }
 0x131   : > { %v1219_v48 = vpop.f32.mrf.mxu0  ;;  %v1267_v49 = vpop.f32.mrf.mxu1 }
 0x132   : > { %910 = vst.msk [vmem:[%s1488_s4 + $0x4c] sm:$0xf] %vm890_vm4, %v1116_v44  ;;  %v684_v50 = vmax.f32 %v563_v45, 0.0  ;;  %934 = vst.msk [vmem:[%s1488_s4 + $0xac] sm:$0xf] %vm890_vm4, %v1140_v46  ;;  %v708_v51 = vmax.f32 %v659_v47, 0.0 }
 0x133   : > { %v565_v52 = vpop.f32.mrf.mxu0  ;;  %v661_v53 = vpop.f32.mrf.mxu1 }
 0x134   : > { %v1117_v54 = vpack.c.bf16 %v684_v50, %v684_v50  ;;  %v566_v55 = vadd.f32 %v1479_v32, %v565_v52  ;;  %v1141_v56 = vpack.c.bf16 %v708_v51, %v708_v51 }
 0x135   : > { %v1220_v57 = vpop.f32.mrf.mxu0  ;;  %v1268_v58 = vpop.f32.mrf.mxu1 }
 0x136   : > { %911 = vst.msk [vmem:[%s1488_s4 + $0x50] sm:$0xf] %vm890_vm4, %v1117_v54  ;;  %v685_v59 = vmax.f32 %v566_v55, 0.0  ;;  %935 = vst.msk [vmem:[%s1488_s4 + $0xb0] sm:$0xf] %vm890_vm4, %v1141_v56 }
 0x137   : > { %v570_v60 = vpop.f32.mrf.mxu0 }
 0x138   : > { %v1118_v61 = vpack.c.bf16 %v685_v59, %v685_v59  ;;  %v571_v62 = vadd.f32 %v1479_v32, %v570_v60 }
 0x139   : > { %v1223_v63 = vpop.f32.mrf.mxu0 }
 0x13a   : > { %912 = vst.msk [vmem:[%s1488_s4 + $0x54] sm:$0xf] %vm890_vm4, %v1118_v61  ;;  %v686_v0 = vmax.f32 %v571_v62, 0.0 }
 0x13b   : > { %v573_v1 = vpop.f32.mrf.mxu0 }
 0x13c   : > { %v1119_v2 = vpack.c.bf16 %v686_v0, %v686_v0  ;;  %v574_v3 = vadd.f32 %v1479_v32, %v573_v1 }
 0x13d   : > { %v1224_v4 = vpop.f32.mrf.mxu0 }
 0x13e   : > { %913 = vst.msk [vmem:[%s1488_s4 + $0x58] sm:$0xf] %vm890_vm4, %v1119_v2  ;;  %v687_v5 = vmax.f32 %v574_v3, 0.0 }
 0x140   : > { %v1120_v6 = vpack.c.bf16 %v687_v5, %v687_v5 }
 0x142   : > { %914 = vst.msk [vmem:[%s1488_s4 + $0x5c] sm:$0xf] %vm890_vm4, %v1120_v6 }
 0x143 PF: > { %s13_s12 = sadd.s32 1, %s1321_s12  }
 0x144   : > { %p10_p4 = scmp.ge.s32.totalorder %s13_s12, 7  }
 0x146   :  { %12 = sbr.rel (!%p10_p4) target bundleno = 1 (0x1), region = 62 }

// kernel: _lambda_.4
= control target key start
LH: loop header
LB: loop body
LE: loop exit
PB: predicated region body
PF: predicated region fallthrough
CT: control target
= control target key end

     0   :  { %s3076_s12 = smov 0   ;;  %s3758_s0 = inlined_call_operand.vmem [shape: bf16[1568,576], index: 0, kind: input, shape index: {}]   ;;  %s3759_s1 = inlined_call_operand.vmem [shape: bf16[576,64], index: 1, kind: input, shape index: {}]   ;;  %s3760_s2 = inlined_call_operand.vmem [shape: f32[1,64], index: 2, kind: input, shape index: {}]   ;;  %s3761_s3 = inlined_call_operand.vmem [shape: bf16[1568,64], index: 3, kind: output, shape index: {}]  }
   0x1 LB: > { %s2361_s13 = sadd.s32 4294967295, %s3051_s12   ;;  %p2365_p0 = scmp.ge.s32.totalorder %s3051_s12, 1  ;;  %s3051_s12 = sphi %s3076_s12, %s13_s12  }
   0x2   : > { %p139_p1 = scmp.lt.s32.totalorder %s3051_s12, 5 }
   0x4   : > { %p140_p2 = pnand %p2365_p0, %p139_p1 }
   0x6   : > { %143 = sbr.rel (%p140_p2) target bundleno = 572 (0x23c), region = 32 }
   0xb   : > { %v2836_v0 = vld [vmem:[%s3759_s1 + $0x38] sm:$0xff]   ;;  %v3053_v1 = vmov 0   ;;  %s164_s16 = smul.u32 49, %s2361_s13  ;;  %v2837_v2 = vld [vmem:[%s3759_s1 + $0x30] sm:$0xff]   ;;  %v2838_v3 = vld [vmem:[%s3759_s1 + $0x28] sm:$0xff]   ;;  %v3054_v24 = vmov 0.0  }
   0xc   : > { %1313 = vmatprep.subr.bf16.mxu0 %v3053_v1  ;;  %2792 = vmatprep.subr.bf16.mxu1 %v3053_v1  ;;  %v2839_v4 = vld [vmem:[%s3759_s1 + $0x20] sm:$0xff]   ;;  %v2840_v5 = vld [vmem:[%s3759_s1 + $0x18] sm:$0xff]   ;;  %v2841_v7 = vld [vmem:[%s3759_s1 + $0x10] sm:$0xff]   ;;  %vm3055_vm0 = vmmov 0   ;;  %vm1237_vm1 = vcmask 523264   ;;  %vm2255_vm2 = vcmask 519168  }
   0xd   : > { %1314 = vmatpush1.bf16.msra.mxu0 %v2836_v0  ;;  %2808 = vmatpush1.bf16.msra.mxu1 %v2836_v0  ;;  %p165_p3 = scmp.lt.s32.totalorder %s164_s16, 195  ;;  %v2842_v9 = vld [vmem:[%s3759_s1 + $0x8] sm:$0xff]   ;;  %v2843_v10 = vld [vmem:[%s3759_s1] sm:$0xff]   ;;  %v2844_v11 = vld [vmem:[%s3759_s1 + $0x78] sm:$0xff]  }
   0xe   : > { %1315 = vmatprep.subr.bf16.mxu0 %v3053_v1  ;;  %2793 = vmatprep.subr.bf16.mxu1 %v3053_v1  ;;  %v2845_v12 = vld [vmem:[%s3759_s1 + $0x70] sm:$0xff]   ;;  %v2846_v13 = vld [vmem:[%s3759_s1 + $0x68] sm:$0xff]   ;;  %v2847_v14 = vld [vmem:[%s3759_s1 + $0x60] sm:$0xff]  }
   0xf   : > { %s3769_s16 = smov (!%p165_p3, %s164_s16), 195  ;;  %v2848_v15 = vld [vmem:[%s3759_s1 + $0x58] sm:$0xff]   ;;  %v2849_v16 = vld [vmem:[%s3759_s1 + $0x50] sm:$0xff]   ;;  %v2850_v17 = vld [vmem:[%s3759_s1 + $0x48] sm:$0xff]  }
  0x10   : > { %s2824_s23 = smul.u32 20, %s3769_s16  ;;  %v2851_v18 = vld [vmem:[%s3759_s1 + $0x40] sm:$0xff]   ;;  %v2858_v21 = vld [vmem:[%s3759_s1 + $0x118] sm:$0xff]   ;;  %v2881_v26 = vld [vmem:[%s3759_s1 + $0x110] sm:$0xff]   ;;  %s2367_s20 = sshll.u32 %s3769_s16, 2 }
  0x11   : > { %1316 = vmatpush1.bf16.msra.mxu0 %v2837_v2  ;;  %2809 = vmatpush1.bf16.msra.mxu1 %v2837_v2  ;;  %v2863_v25 = vld [vmem:[%s3759_s1 + $0xb8] sm:$0xff]   ;;  %v2866_v27 = vld [vmem:[%s3759_s1 + $0xb0] sm:$0xff]   ;;  %v2873_v32 = vld [vmem:[%s3759_s1 + $0xa8] sm:$0xff]   ;;  %s3561_s22 = scalar_lea.vmem %s3761_s3, %s2367_s20 }
  0x12   : > { %1317 = vmatprep.subr.bf16.mxu0 %v3053_v1  ;;  %2794 = vmatprep.subr.bf16.mxu1 %v3053_v1  ;;  %s3113_s28 = scalar_lea.vmem %s3758_s0, %s2824_s23  ;;  %v2904_v33 = vld [vmem:[%s3759_s1 + $0x108] sm:$0xff]   ;;  %v2880_v34 = vld [vmem:[%s3759_s1 + $0xa0] sm:$0xff]   ;;  %v2886_v40 = vld [vmem:[%s3759_s1 + $0x98] sm:$0xff]  }
  0x13   : > { %v2854_v6 = vld [vmem:[%s3113_s28 + $0x4] ss:$20 sps:$4 sm:$0xff]   ;;  %v2857_v8 = vld [vmem:[%s3113_s28 + $0x20c] ss:$20 sps:$4 sm:$0xff]   ;;  %v2855_v20 = vld [vmem:[%s3113_s28 + $0x208] ss:$20 sps:$4 sm:$0xff]  }
  0x14   : > { %1345 = vmatprep.mubr.bf16.mxu0 %v2854_v6  ;;  %1449 = vmatprep.mubr.bf16.mxu1 %v2857_v8  ;;  %v2852_v19 = vld [vmem:[%s3113_s28] ss:$20 sps:$4 sm:$0xff]   ;;  %v2864_v28 = vld [vmem:[%s3113_s28 + $0x28] ss:$20 sps:$4 sm:$0xff]   ;;  %v2865_v29 = vld [vmem:[%s3113_s28 + $0x230] ss:$20 sps:$4 sm:$0xff]  }
  0x15   : > { %1318 = vmatpush1.bf16.msra.mxu0 %v2838_v3  ;;  %2810 = vmatpush1.bf16.msra.mxu1 %v2838_v3  ;;  %v2859_v22 = vld [vmem:[%s3113_s28 + $0x2c] ss:$20 sps:$4 sm:$0xff]   ;;  %v2861_v23 = vld [vmem:[%s3113_s28 + $0x234] ss:$20 sps:$4 sm:$0xff]   ;;  %v2869_v31 = vld [vmem:[%s3113_s28 + $0x25c] ss:$20 sps:$4 sm:$0xff]  }
  0x16   : > { %1319 = vmatprep.subr.bf16.mxu0 %v3053_v1  ;;  %2795 = vmatprep.subr.bf16.mxu1 %v3053_v1  ;;  %v2867_v30 = vld [vmem:[%s3113_s28 + $0x54] ss:$20 sps:$4 sm:$0xff]   ;;  %v2932_v35 = vld [vmem:[%s3759_s1 + $0x100] sm:$0xff]   ;;  %v2872_v37 = vld [vmem:[%s3113_s28 + $0x258] ss:$20 sps:$4 sm:$0xff]  }
  0x17   : > { %v2871_v36 = vld [vmem:[%s3113_s28 + $0x50] ss:$20 sps:$4 sm:$0xff]   ;;  %v2878_v41 = vld [vmem:[%s3113_s28 + $0x78] ss:$20 sps:$4 sm:$0xff]   ;;  %v2879_v42 = vld [vmem:[%s3113_s28 + $0x280] ss:$20 sps:$4 sm:$0xff]  }
  0x18   : > { %v2874_v38 = vld [vmem:[%s3113_s28 + $0x7c] ss:$20 sps:$4 sm:$0xff]   ;;  %v2876_v39 = vld [vmem:[%s3113_s28 + $0x284] ss:$20 sps:$4 sm:$0xff]   ;;  %v2884_v45 = vld [vmem:[%s3113_s28 + $0x2ac] ss:$20 sps:$4 sm:$0xff]  }
  0x19   : > { %1320 = vmatpush1.bf16.msra.mxu0 %v2839_v4  ;;  %2811 = vmatpush1.bf16.msra.mxu1 %v2839_v4  ;;  %v2889_v43 = vld [vmem:[%s3759_s1 + $0x90] sm:$0xff]   ;;  %v2882_v44 = vld [vmem:[%s3113_s28 + $0xa4] ss:$20 sps:$4 sm:$0xff]   ;;  %v2896_v46 = vld [vmem:[%s3759_s1 + $0x88] sm:$0xff]  }
  0x1a   : > { %1321 = vmatprep.subr.bf16.mxu0 %v3053_v1  ;;  %2796 = vmatprep.subr.bf16.mxu1 %v3053_v1  ;;  %v2903_v47 = vld [vmem:[%s3759_s1 + $0x80] sm:$0xff]   ;;  %v2888_v49 = vld [vmem:[%s3113_s28 + $0x2a8] ss:$20 sps:$4 sm:$0xff]   ;;  %v2912_v53 = vld [vmem:[%s3759_s1 + $0xf0] sm:$0xff]  }
  0x1b   : > { %v2887_v48 = vld [vmem:[%s3113_s28 + $0xa0] ss:$20 sps:$4 sm:$0xff]   ;;  %v2909_v52 = vld [vmem:[%s3759_s1 + $0xf8] sm:$0xff]   ;;  %v2895_v55 = vld [vmem:[%s3113_s28 + $0x2d0] ss:$20 sps:$4 sm:$0xff]  }
  0x1c   : > { %v2890_v50 = vld [vmem:[%s3113_s28 + $0xcc] ss:$20 sps:$4 sm:$0xff]   ;;  %v2892_v51 = vld [vmem:[%s3113_s28 + $0x2d4] ss:$20 sps:$4 sm:$0xff]   ;;  %v2899_v57 = vld [vmem:[%s3113_s28 + $0x2fc] ss:$20 sps:$4 sm:$0xff]  }
  0x1d   : > { %1322 = vmatpush1.bf16.msra.mxu0 %v2840_v5  ;;  %2812 = vmatpush1.bf16.msra.mxu1 %v2840_v5  ;;  %v2894_v54 = vld [vmem:[%s3113_s28 + $0xc8] ss:$20 sps:$4 sm:$0xff]   ;;  %v2926_v59 = vld [vmem:[%s3759_s1 + $0xe0] sm:$0xff]   ;;  %v2902_v61 = vld [vmem:[%s3113_s28 + $0x2f8] ss:$20 sps:$4 sm:$0xff]  }
  0x1e   : > { %1323 = vmatprep.subr.bf16.mxu0 %v3053_v1  ;;  %2797 = vmatprep.subr.bf16.mxu1 %v3053_v1  ;;  %v2897_v56 = vld [vmem:[%s3113_s28 + $0xf4] ss:$20 sps:$4 sm:$0xff]   ;;  %v2901_v60 = vld [vmem:[%s3113_s28 + $0xf0] ss:$20 sps:$4 sm:$0xff]   ;;  %v2931_v0 = vld [vmem:[%s3759_s1 + $0xd8] sm:$0xff]  }
  0x1f   : > { %v2919_v58 = vld [vmem:[%s3759_s1 + $0xe8] sm:$0xff]   ;;  %v2905_v62 = vld [vmem:[%s3113_s28 + $0x11c] ss:$20 sps:$4 sm:$0xff]   ;;  %v2907_v63 = vld [vmem:[%s3113_s28 + $0x324] ss:$20 sps:$4 sm:$0xff]  }
  0x20   : > { %v2935_v2 = vld [vmem:[%s3759_s1 + $0xd0] sm:$0xff]   ;;  %v2910_v3 = vld [vmem:[%s3113_s28 + $0x118] ss:$20 sps:$4 sm:$0xff]   ;;  %v2942_v8 = vld [vmem:[%s3759_s1 + $0xc0] sm:$0xff]  }
  0x21   : > { %1324 = vmatpush1.bf16.msra.mxu0 %v2841_v7  ;;  %2813 = vmatpush1.bf16.msra.mxu1 %v2841_v7  ;;  %v2911_v4 = vld [vmem:[%s3113_s28 + $0x320] ss:$20 sps:$4 sm:$0xff]   ;;  %v2913_v5 = vld [vmem:[%s3113_s28 + $0x144] ss:$20 sps:$4 sm:$0xff]   ;;  %v2941_v7 = vld [vmem:[%s3759_s1 + $0xc8] sm:$0xff]  }
  0x22   : > { %1325 = vmatprep.subr.bf16.mxu0 %v3053_v1  ;;  %2798 = vmatprep.subr.bf16.mxu1 %v3053_v1  ;;  %v2915_v6 = vld [vmem:[%s3113_s28 + $0x34c] ss:$20 sps:$4 sm:$0xff]  }
  0x25   : > { %1326 = vmatpush1.bf16.msra.mxu0 %v2842_v9  ;;  %2814 = vmatpush1.bf16.msra.mxu1 %v2842_v9  ;;  %v2917_v9 = vld [vmem:[%s3113_s28 + $0x140] ss:$20 sps:$4 sm:$0xff]  }
  0x26   : > { %1327 = vmatprep.subr.bf16.mxu0 %v3053_v1  ;;  %2799 = vmatprep.subr.bf16.mxu1 %v3053_v1 }
  0x29   : > { %1328 = vmatpush1.bf16.msra.mxu0 %v2843_v10  ;;  %2815 = vmatpush1.bf16.msra.mxu1 %v2843_v10  ;;  %v2918_v10 = vld [vmem:[%s3113_s28 + $0x348] ss:$20 sps:$4 sm:$0xff]  }
  0x2a   : > { %1329 = vmatprep.subr.bf16.mxu0 %v3053_v1  ;;  %2800 = vmatprep.subr.bf16.mxu1 %v3053_v1 }
  0x2d   : > { %1330 = vmatpush2.bf16.msra.mxu0 %v2844_v11  ;;  %2816 = vmatpush2.bf16.msra.mxu1 %v2844_v11  ;;  %v2920_v11 = vld [vmem:[%s3113_s28 + $0x16c] ss:$20 sps:$4 sm:$0xff]  }
  0x2e   : > { %1331 = vmatprep.subr.bf16.mxu0 %v3053_v1  ;;  %2801 = vmatprep.subr.bf16.mxu1 %v3053_v1 }
  0x31   : > { %1332 = vmatpush2.bf16.msra.mxu0 %v2845_v12  ;;  %2817 = vmatpush2.bf16.msra.mxu1 %v2845_v12  ;;  %v2922_v12 = vld [vmem:[%s3113_s28 + $0x374] ss:$20 sps:$4 sm:$0xff]  }
  0x32   : > { %1333 = vmatprep.subr.bf16.mxu0 %v3053_v1  ;;  %2802 = vmatprep.subr.bf16.mxu1 %v3053_v1 }
  0x35   : > { %1334 = vmatpush2.bf16.msra.mxu0 %v2846_v13  ;;  %2818 = vmatpush2.bf16.msra.mxu1 %v2846_v13  ;;  %v2924_v13 = vld [vmem:[%s3113_s28 + $0x168] ss:$20 sps:$4 sm:$0xff]  }
  0x36   : > { %1335 = vmatprep.subr.bf16.mxu0 %v3053_v1  ;;  %2803 = vmatprep.subr.bf16.mxu1 %v3053_v1 }
  0x39   : > { %1336 = vmatpush2.bf16.msra.mxu0 %v2847_v14  ;;  %2819 = vmatpush2.bf16.msra.mxu1 %v2847_v14  ;;  %v2925_v14 = vld [vmem:[%s3113_s28 + $0x370] ss:$20 sps:$4 sm:$0xff]  }
  0x3a   : > { %1337 = vmatprep.subr.bf16.mxu0 %v3053_v1  ;;  %2804 = vmatprep.subr.bf16.mxu1 %v3053_v1 }
  0x3d   : > { %1338 = vmatpush2.bf16.msra.mxu0 %v2848_v15  ;;  %2820 = vmatpush2.bf16.msra.mxu1 %v2848_v15  ;;  %v2927_v15 = vld [vmem:[%s3113_s28 + $0x194] ss:$20 sps:$4 sm:$0xff]  }
  0x3e   : > { %1339 = vmatprep.subr.bf16.mxu0 %v3053_v1  ;;  %2805 = vmatprep.subr.bf16.mxu1 %v3053_v1 }
  0x41   : > { %1340 = vmatpush2.bf16.msra.mxu0 %v2849_v16  ;;  %2821 = vmatpush2.bf16.msra.mxu1 %v2849_v16  ;;  %v2929_v16 = vld [vmem:[%s3113_s28 + $0x39c] ss:$20 sps:$4 sm:$0xff]  }
  0x42   : > { %1341 = vmatprep.subr.bf16.mxu0 %v3053_v1  ;;  %2806 = vmatprep.subr.bf16.mxu1 %v3053_v1 }
  0x45   : > { %1342 = vmatpush2.bf16.msra.mxu0 %v2850_v17  ;;  %2822 = vmatpush2.bf16.msra.mxu1 %v2850_v17  ;;  %v2933_v17 = vld [vmem:[%s3113_s28 + $0x190] ss:$20 sps:$4 sm:$0xff]  }
  0x46   : > { %1343 = vmatprep.subr.bf16.mxu0 %v3053_v1  ;;  %2807 = vmatprep.subr.bf16.mxu1 %v3053_v1 }
  0x49   : > { %1344 = vmatpush2.bf16.msra.mxu0 %v2851_v18  ;;  %2823 = vmatpush2.bf16.msra.mxu1 %v2851_v18  ;;  %v2934_v18 = vld [vmem:[%s3113_s28 + $0x398] ss:$20 sps:$4 sm:$0xff]  }
  0x4a   : > { %2684 = vmatprep.subr.bf16.mxu0 %v3054_v24  ;;  %1545 = vmatprep.subr.bf16.mxu1 %v3053_v1 }
  0x4c   : > { %1346 = vmatmul.mubr.bf16.vlgmr.msra.gmra.mxu0 %v2852_v19  ;;  %1450 = vmatmul.mubr.bf16.vlgmr.msra.gmra.mxu1 %v2855_v20  ;;  %v2936_v19 = vld [vmem:[%s3113_s28 + $0x1bc] ss:$20 sps:$4 sm:$0xff]  }
  0x4d   : > { %2685 = vmatpush3.bf16.msra.mxu0 %v2858_v21  ;;  %1353 = vmatprep.mubr.bf16.mxu0 %v2859_v22  ;;  %v2939_v21 = vld [vmem:[%s3113_s28 + $0x1b8] ss:$20 sps:$4 sm:$0xff]  }
  0x4e   : > { %1457 = vmatprep.mubr.bf16.mxu1 %v2861_v23  ;;  %1546 = vmatpush1.bf16.msra.mxu1 %v2863_v25  ;;  %v2943_v23 = vld [vmem:[%s3113_s28 + $0x1e4] ss:$20 sps:$4 sm:$0xff]   ;;  %v2947_v25 = vld [vmem:[%s3113_s28 + $0xc] ss:$20 sps:$4 sm:$0xff]  }
  0x4f   : > { %1547 = vmatprep.subr.bf16.mxu1 %v3053_v1  ;;  %2686 = vmatprep.subr.bf16.mxu0 %v3054_v24 }
  0x51   : > { %2687 = vmatpush3.bf16.msra.mxu0 %v2881_v26  ;;  %v2945_v26 = vld [vmem:[%s3113_s28 + $0x8] ss:$20 sps:$4 sm:$0xff]  }
  0x52   : > { %1548 = vmatpush1.bf16.msra.mxu1 %v2866_v27  ;;  %2688 = vmatprep.subr.bf16.mxu0 %v3054_v24  ;;  %v2948_v27 = vld [vmem:[%s3113_s28 + $0x1e0] ss:$20 sps:$4 sm:$0xff]  }
  0x53   : > { %1549 = vmatprep.subr.bf16.mxu1 %v3053_v1 }
  0x54   : > { %1354 = vmatmul.mubr.bf16.gmra.mxu0 %v2864_v28  ;;  %1458 = vmatmul.mubr.bf16.gmra.mxu1 %v2865_v29  ;;  %v2949_v28 = vld [vmem:[%s3113_s28 + $0x34] ss:$20 sps:$4 sm:$0xff]   ;;  %v2951_v29 = vld [vmem:[%s3113_s28 + $0x30] ss:$20 sps:$4 sm:$0xff]  }
  0x55   : > { %1361 = vmatprep.mubr.bf16.mxu0 %v2867_v30  ;;  %1465 = vmatprep.mubr.bf16.mxu1 %v2869_v31  ;;  %v2952_v30 = vld [vmem:[%s3113_s28 + $0x10] ss:$20 sps:$4 sm:$0xff]  }
  0x56   : > { %1550 = vmatpush1.bf16.msra.mxu1 %v2873_v32  ;;  %2689 = vmatpush3.bf16.msra.mxu0 %v2904_v33  ;;  %v2953_v31 = vld [vmem:[%s3113_s28 + $0x5c] ss:$20 sps:$4 sm:$0xff]   ;;  %v2955_v32 = vld [vmem:[%s3113_s28 + $0x58] ss:$20 sps:$4 sm:$0xff]  }
  0x57   : > { %1551 = vmatprep.subr.bf16.mxu1 %v3053_v1  ;;  %2690 = vmatprep.subr.bf16.mxu0 %v3054_v24  ;;  %v2956_v33 = vld [vmem:[%s3113_s28 + $0x38] ss:$20 sps:$4 sm:$0xff]  }
  0x5a   : > { %1552 = vmatpush1.bf16.msra.mxu1 %v2880_v34  ;;  %2691 = vmatpush3.bf16.msra.mxu0 %v2932_v35  ;;  %v2957_v34 = vld [vmem:[%s3113_s28 + $0x84] ss:$20 sps:$4 sm:$0xff]   ;;  %v2959_v35 = vld [vmem:[%s3113_s28 + $0x80] ss:$20 sps:$4 sm:$0xff]  }
  0x5b   : > { %1553 = vmatprep.subr.bf16.mxu1 %v3053_v1 }
  0x5c   : > { %1362 = vmatmul.mubr.bf16.gmra.mxu0 %v2871_v36  ;;  %1466 = vmatmul.mubr.bf16.gmra.mxu1 %v2872_v37  ;;  %v2960_v36 = vld [vmem:[%s3113_s28 + $0x60] ss:$20 sps:$4 sm:$0xff]  }
  0x5d   : > { %1369 = vmatprep.mubr.bf16.mxu0 %v2874_v38  ;;  %1473 = vmatprep.mubr.bf16.mxu1 %v2876_v39  ;;  %v2961_v37 = vld [vmem:[%s3113_s28 + $0xac] ss:$20 sps:$4 sm:$0xff]   ;;  %v2963_v38 = vld [vmem:[%s3113_s28 + $0xa8] ss:$20 sps:$4 sm:$0xff]  }
  0x5e   : > { %1554 = vmatpush1.bf16.msra.mxu1 %v2886_v40  ;;  %v2964_v39 = vld [vmem:[%s3113_s28 + $0x88] ss:$20 sps:$4 sm:$0xff]  }
  0x5f   : > { %1555 = vmatprep.subr.bf16.mxu1 %v3053_v1  ;;  %v2965_v40 = vld [vmem:[%s3113_s28 + $0xd4] ss:$20 sps:$4 sm:$0xff]  }
  0x62   : > { %1556 = vmatpush1.bf16.msra.mxu1 %v2889_v43  ;;  %v2969_v43 = vld [vmem:[%s3113_s28 + $0xfc] ss:$20 sps:$4 sm:$0xff]  }
  0x63   : > { %1557 = vmatprep.subr.bf16.mxu1 %v3053_v1 }
  0x64   : > { %1370 = vmatmul.mubr.bf16.gmra.mxu0 %v2878_v41  ;;  %1474 = vmatmul.mubr.bf16.gmra.mxu1 %v2879_v42  ;;  %v2967_v41 = vld [vmem:[%s3113_s28 + $0xd0] ss:$20 sps:$4 sm:$0xff]  }
  0x65   : > { %1377 = vmatprep.mubr.bf16.mxu0 %v2882_v44  ;;  %1481 = vmatprep.mubr.bf16.mxu1 %v2884_v45  ;;  %v2968_v42 = vld [vmem:[%s3113_s28 + $0xb0] ss:$20 sps:$4 sm:$0xff]   ;;  %v2971_v44 = vld [vmem:[%s3113_s28 + $0xf8] ss:$20 sps:$4 sm:$0xff]  }
  0x66   : > { %1558 = vmatpush1.bf16.msra.mxu1 %v2896_v46  ;;  %v2972_v45 = vld [vmem:[%s3113_s28 + $0xd8] ss:$20 sps:$4 sm:$0xff]  }
  0x67   : > { %1559 = vmatprep.subr.bf16.mxu1 %v3053_v1  ;;  %v2973_v46 = vld [vmem:[%s3113_s28 + $0x124] ss:$20 sps:$4 sm:$0xff]  }
  0x6a   : > { %1560 = vmatpush1.bf16.msra.mxu1 %v2903_v47  ;;  %v2975_v47 = vld [vmem:[%s3113_s28 + $0x120] ss:$20 sps:$4 sm:$0xff]  }
  0x6b   : > { %1561 = vmatprep.subr.bf16.mxu1 %v3053_v1 }
  0x6c   : > { %1378 = vmatmul.mubr.bf16.gmra.mxu0 %v2887_v48  ;;  %1482 = vmatmul.mubr.bf16.gmra.mxu1 %v2888_v49  ;;  %v2976_v48 = vld [vmem:[%s3113_s28 + $0x100] ss:$20 sps:$4 sm:$0xff]  }
  0x6d   : > { %1385 = vmatprep.mubr.bf16.mxu0 %v2890_v50  ;;  %1489 = vmatprep.mubr.bf16.mxu1 %v2892_v51  ;;  %v2977_v49 = vld [vmem:[%s3113_s28 + $0x14c] ss:$20 sps:$4 sm:$0xff]   ;;  %v2979_v50 = vld [vmem:[%s3113_s28 + $0x148] ss:$20 sps:$4 sm:$0xff]  }
  0x6e   : > { %1562 = vmatpush2.bf16.msra.mxu1 %v2909_v52  ;;  %v2980_v51 = vld [vmem:[%s3113_s28 + $0x128] ss:$20 sps:$4 sm:$0xff]  }
  0x6f   : > { %1563 = vmatprep.subr.bf16.mxu1 %v3053_v1  ;;  %v2981_v52 = vld [vmem:[%s3113_s28 + $0x174] ss:$20 sps:$4 sm:$0xff]  }
  0x72   : > { %1564 = vmatpush2.bf16.msra.mxu1 %v2912_v53  ;;  %v2983_v53 = vld [vmem:[%s3113_s28 + $0x170] ss:$20 sps:$4 sm:$0xff]  }
  0x73   : > { %1565 = vmatprep.subr.bf16.mxu1 %v3053_v1 }
  0x74   : > { %1386 = vmatmul.mubr.bf16.gmra.mxu0 %v2894_v54  ;;  %1490 = vmatmul.mubr.bf16.gmra.mxu1 %v2895_v55  ;;  %v2984_v54 = vld [vmem:[%s3113_s28 + $0x150] ss:$20 sps:$4 sm:$0xff]  }
  0x75   : > { %1393 = vmatprep.mubr.bf16.mxu0 %v2897_v56  ;;  %1497 = vmatprep.mubr.bf16.mxu1 %v2899_v57  ;;  %v2985_v55 = vld [vmem:[%s3113_s28 + $0x19c] ss:$20 sps:$4 sm:$0xff]   ;;  %v2987_v56 = vld [vmem:[%s3113_s28 + $0x198] ss:$20 sps:$4 sm:$0xff]  }
  0x76   : > { %1566 = vmatpush2.bf16.msra.mxu1 %v2919_v58  ;;  %v2988_v57 = vld [vmem:[%s3113_s28 + $0x178] ss:$20 sps:$4 sm:$0xff]  }
  0x77   : > { %1567 = vmatprep.subr.bf16.mxu1 %v3053_v1  ;;  %v2989_v58 = vld [vmem:[%s3113_s28 + $0x1c4] ss:$20 sps:$4 sm:$0xff]  }
  0x7a   : > { %1568 = vmatpush2.bf16.msra.mxu1 %v2926_v59  ;;  %v2991_v59 = vld [vmem:[%s3113_s28 + $0x1c0] ss:$20 sps:$4 sm:$0xff]  }
  0x7b   : > { %1569 = vmatprep.subr.bf16.mxu1 %v3053_v1 }
  0x7c   : > { %1394 = vmatmul.mubr.bf16.gmra.mxu0 %v2901_v60  ;;  %1498 = vmatmul.mubr.bf16.gmra.mxu1 %v2902_v61  ;;  %v2992_v60 = vld [vmem:[%s3113_s28 + $0x1a0] ss:$20 sps:$4 sm:$0xff]  }
  0x7d   : > { %1401 = vmatprep.mubr.bf16.mxu0 %v2905_v62  ;;  %1505 = vmatprep.mubr.bf16.mxu1 %v2907_v63  ;;  %v2993_v61 = vld [vmem:[%s3113_s28 + $0x1ec] ss:$20 sps:$4 sm:$0xff]   ;;  %v2995_v62 = vld [vmem:[%s3113_s28 + $0x1e8] ss:$20 sps:$4 sm:$0xff]  }
  0x7e   : > { %1570 = vmatpush2.bf16.msra.mxu1 %v2931_v0  ;;  %v2996_v63 = vld [vmem:[%s3113_s28 + $0x1c8] ss:$20 sps:$4 sm:$0xff]  }
  0x7f   : > { %1571 = vmatprep.subr.bf16.mxu1 %v3053_v1  ;;  %v2997_v0 = vld [vmem:[%s3113_s28 + $0x214] ss:$20 sps:$4 sm:$0xff]  }
  0x82   : > { %1572 = vmatpush2.bf16.msra.mxu1 %v2935_v2 }
  0x83   : > { %1573 = vmatprep.subr.bf16.mxu1 %v3053_v1 }
  0x84   : > { %1402 = vmatmul.mubr.bf16.gmra.mxu0 %v2910_v3  ;;  %1506 = vmatmul.mubr.bf16.gmra.mxu1 %v2911_v4 }
  0x85   : > { %1409 = vmatprep.mubr.bf16.mxu0 %v2913_v5  ;;  %1513 = vmatprep.mubr.bf16.mxu1 %v2915_v6 }
  0x86   : > { %1574 = vmatpush2.bf16.msra.mxu1 %v2941_v7 }
  0x87   : > { %1575 = vmatprep.subr.bf16.mxu1 %v3053_v1  ;;  %v322_v1 = vld [vmem:[%s3113_s28 + $0x3c0] sm:$0xff] }
  0x88   : > { %v2490_v20 = vcombine.high %v322_v1, %v322_v1  ;;  %v2489_v22 = vcombine.low %v322_v1, %v322_v1 }
  0x8a   : > { %1576 = vmatpush2.bf16.msra.mxu1 %v2942_v8  ;;  %v2999_v8 = vld [vmem:[%s3113_s28 + $0x210] ss:$20 sps:$4 sm:$0xff]  }
  0x8c   : > { %1410 = vmatmul.mubr.bf16.gmra.mxu0 %v2917_v9  ;;  %1514 = vmatmul.mubr.bf16.gmra.mxu1 %v2918_v10  ;;  %v3000_v9 = vld [vmem:[%s3113_s28 + $0x1f0] ss:$20 sps:$4 sm:$0xff]  }
  0x8d   : > { %1417 = vmatprep.mubr.bf16.mxu0 %v2920_v11  ;;  %1521 = vmatprep.mubr.bf16.mxu1 %v2922_v12  ;;  %v3001_v10 = vld [vmem:[%s3113_s28 + $0x23c] ss:$20 sps:$4 sm:$0xff]  }
  0x94   : > { %1418 = vmatmul.mubr.bf16.gmra.mxu0 %v2924_v13  ;;  %1522 = vmatmul.mubr.bf16.gmra.mxu1 %v2925_v14 }
  0x95   : > { %1425 = vmatprep.mubr.bf16.mxu0 %v2927_v15  ;;  %1529 = vmatprep.mubr.bf16.mxu1 %v2929_v16 }
  0x9c   : > { %1426 = vmatmul.mubr.bf16.gmra.mxu0 %v2933_v17  ;;  %1530 = vmatmul.mubr.bf16.gmra.mxu1 %v2934_v18  ;;  %v3003_v18 = vld [vmem:[%s3113_s28 + $0x238] ss:$20 sps:$4 sm:$0xff]  }
  0x9d   : > { %1433 = vmatprep.mubr.bf16.mxu0 %v2936_v19  ;;  %1537 = vmatprep.mubr.bf16.mxu1 %v2490_v20  ;;  %v3004_v19 = vld [vmem:[%s3113_s28 + $0x218] ss:$20 sps:$4 sm:$0xff]  }
  0x9e   : > { %v3005_v20 = vld [vmem:[%s3113_s28 + $0x264] ss:$20 sps:$4 sm:$0xff]  }
  0xa4   : > { %1434 = vmatmul.mubr.bf16.gmra.mxu0 %v2939_v21  ;;  %1538 = vmatmul.mubr.bf16.gmra.mxu1 %v2489_v22 }
  0xa5   : > { %1441 = vmatprep.mubr.bf16.mxu0 %v2943_v23  ;;  %1577 = vmatprep.mubr.bf16.mxu1 %v2947_v25 }
  0xac   : > { %1442 = vmatmul.mubr.bf16.gmra.mxu0 %v2948_v27  ;;  %1578 = vmatmul.mubr.bf16.vlgmr.msra.gmra.mxu1 %v2945_v26 }
  0xad   : > { %1585 = vmatprep.mubr.bf16.mxu1 %v2949_v28  ;;  %2692 = vmatprep.mubr.msk.bf16.mxu0 %vm3055_vm0, %v3054_v24 }
  0xb4   : > { %1586 = vmatmul.mubr.bf16.gmra.mxu1 %v2951_v29  ;;  %2693 = vmatmul.mubr.msk.bf16.vlgmr.msra.gmra.mxu0 %vm1237_vm1, %v2952_v30  ;;  %v3007_v30 = vld [vmem:[%s3113_s28 + $0x260] ss:$20 sps:$4 sm:$0xff]  }
  0xb5   : > { %1593 = vmatprep.mubr.bf16.mxu1 %v2953_v31  ;;  %2696 = vmatprep.mubr.msk.bf16.mxu0 %vm3055_vm0, %v3054_v24  ;;  %v3008_v31 = vld [vmem:[%s3113_s28 + $0x240] ss:$20 sps:$4 sm:$0xff]  }
  0xbc   : > { %1594 = vmatmul.mubr.bf16.gmra.mxu1 %v2955_v32  ;;  %2697 = vmatmul.mubr.msk.bf16.gmra.mxu0 %vm1237_vm1, %v2956_v33  ;;  %v3011_v32 = vld [vmem:[%s3113_s28 + $0x28c] ss:$20 sps:$4 sm:$0xff]  }
  0xbd   : > { %1601 = vmatprep.mubr.bf16.mxu1 %v2957_v34  ;;  %2700 = vmatprep.mubr.msk.bf16.mxu0 %vm3055_vm0, %v3054_v24 }
  0xc4   : > { %1602 = vmatmul.mubr.bf16.gmra.mxu1 %v2959_v35  ;;  %2701 = vmatmul.mubr.msk.bf16.gmra.mxu0 %vm1237_vm1, %v2960_v36 }
  0xc5   : > { %1609 = vmatprep.mubr.bf16.mxu1 %v2961_v37  ;;  %2704 = vmatprep.mubr.msk.bf16.mxu0 %vm3055_vm0, %v3054_v24 }
  0xcc   : > { %1610 = vmatmul.mubr.bf16.gmra.mxu1 %v2963_v38  ;;  %2705 = vmatmul.mubr.msk.bf16.gmra.mxu0 %vm1237_vm1, %v2964_v39 }
  0xcd   : > { %1617 = vmatprep.mubr.bf16.mxu1 %v2965_v40  ;;  %2708 = vmatprep.mubr.msk.bf16.mxu0 %vm3055_vm0, %v3054_v24 }
  0xd4   : > { %1618 = vmatmul.mubr.bf16.gmra.mxu1 %v2967_v41  ;;  %2709 = vmatmul.mubr.msk.bf16.gmra.mxu0 %vm1237_vm1, %v2968_v42  ;;  %v3009_v41 = vld [vmem:[%s3113_s28 + $0x288] ss:$20 sps:$4 sm:$0xff]  }
  0xd5   : > { %1625 = vmatprep.mubr.bf16.mxu1 %v2969_v43  ;;  %2712 = vmatprep.mubr.msk.bf16.mxu0 %vm3055_vm0, %v3054_v24  ;;  %v3012_v42 = vld [vmem:[%s3113_s28 + $0x268] ss:$20 sps:$4 sm:$0xff]  }
  0xd6   : > { %v3015_v43 = vld [vmem:[%s3113_s28 + $0x2b4] ss:$20 sps:$4 sm:$0xff]  }
  0xdc   : > { %1626 = vmatmul.mubr.bf16.gmra.mxu1 %v2971_v44  ;;  %2713 = vmatmul.mubr.msk.bf16.gmra.mxu0 %vm1237_vm1, %v2972_v45 }
  0xdd   : > { %1633 = vmatprep.mubr.bf16.mxu1 %v2973_v46  ;;  %2716 = vmatprep.mubr.msk.bf16.mxu0 %vm3055_vm0, %v3054_v24 }
  0xe4   : > { %1634 = vmatmul.mubr.bf16.gmra.mxu1 %v2975_v47  ;;  %2717 = vmatmul.mubr.msk.bf16.gmra.mxu0 %vm1237_vm1, %v2976_v48 }
  0xe5   : > { %1641 = vmatprep.mubr.bf16.mxu1 %v2977_v49  ;;  %2720 = vmatprep.mubr.msk.bf16.mxu0 %vm3055_vm0, %v3054_v24 }
  0xec   : > { %1642 = vmatmul.mubr.bf16.gmra.mxu1 %v2979_v50  ;;  %2721 = vmatmul.mubr.msk.bf16.gmra.mxu0 %vm1237_vm1, %v2980_v51 }
  0xed   : > { %1649 = vmatprep.mubr.bf16.mxu1 %v2981_v52  ;;  %2724 = vmatprep.mubr.msk.bf16.mxu0 %vm3055_vm0, %v3054_v24  ;;  %v3013_v52 = vld [vmem:[%s3113_s28 + $0x2b0] ss:$20 sps:$4 sm:$0xff]  }
  0xf4   : > { %1650 = vmatmul.mubr.bf16.gmra.mxu1 %v2983_v53  ;;  %2725 = vmatmul.mubr.msk.bf16.gmra.mxu0 %vm1237_vm1, %v2984_v54  ;;  %v3016_v53 = vld [vmem:[%s3113_s28 + $0x290] ss:$20 sps:$4 sm:$0xff]  }
  0xf5   : > { %1657 = vmatprep.mubr.bf16.mxu1 %v2985_v55  ;;  %2728 = vmatprep.mubr.msk.bf16.mxu0 %vm3055_vm0, %v3054_v24  ;;  %v3019_v54 = vld [vmem:[%s3113_s28 + $0x2dc] ss:$20 sps:$4 sm:$0xff]  }
  0xfc   : > { %1658 = vmatmul.mubr.bf16.gmra.mxu1 %v2987_v56  ;;  %2729 = vmatmul.mubr.msk.bf16.gmra.mxu0 %vm1237_vm1, %v2988_v57 }
  0xfd   : > { %1665 = vmatprep.mubr.bf16.mxu1 %v2989_v58  ;;  %2732 = vmatprep.mubr.msk.bf16.mxu0 %vm3055_vm0, %v3054_v24 }
 0x104   : > { %1666 = vmatmul.mubr.bf16.gmra.mxu1 %v2991_v59  ;;  %2733 = vmatmul.mubr.msk.bf16.gmra.mxu0 %vm1237_vm1, %v2992_v60 }
 0x105   : > { %1673 = vmatprep.mubr.bf16.mxu1 %v2993_v61  ;;  %2736 = vmatprep.mubr.msk.bf16.mxu0 %vm3055_vm0, %v3054_v24 }
 0x10c   : > { %v3375_v2 = vpop.f32.mrf.mxu0  ;;  %v3377_v3 = vpop.f32.mrf.mxu1  ;;  %1674 = vmatmul.mubr.bf16.gmra.mxu1 %v2995_v62  ;;  %2737 = vmatmul.mubr.msk.bf16.gmra.mxu0 %vm1237_vm1, %v2996_v63  ;;  %v3017_v63 = vld [vmem:[%s3113_s28 + $0x2d8] ss:$20 sps:$4 sm:$0xff]  }
 0x10d   : > { %1681 = vmatprep.mubr.bf16.mxu1 %v2997_v0  ;;  %2740 = vmatprep.mubr.msk.bf16.mxu0 %vm3055_vm0, %v3054_v24  ;;  %v3020_v0 = vld [vmem:[%s3113_s28 + $0x2b8] ss:$20 sps:$4 sm:$0xff]  }
 0x10e   : > { %v1349_v4 = vpop.f32.mrf.mxu0  ;;  %v1453_v5 = vpop.f32.mrf.mxu1 }
 0x10f   : > { %v3023_v4 = vld [vmem:[%s3113_s28 + $0x304] ss:$20 sps:$4 sm:$0xff]  }
 0x110   : > { %v3382_v6 = vpop.f32.mrf.mxu0  ;;  %v3384_v7 = vpop.f32.mrf.mxu1 }
 0x112   : > { %v1352_v11 = vpop.f32.mrf.mxu0  ;;  %v1456_v12 = vpop.f32.mrf.mxu1 }
 0x114   : > { %v3389_v13 = vpop.f32.mrf.mxu0  ;;  %v3391_v14 = vpop.f32.mrf.mxu1  ;;  %1682 = vmatmul.mubr.bf16.gmra.mxu1 %v2999_v8  ;;  %2741 = vmatmul.mubr.msk.bf16.gmra.mxu0 %vm1237_vm1, %v3000_v9 }
 0x115   : > { %1689 = vmatprep.mubr.bf16.mxu1 %v3001_v10  ;;  %2744 = vmatprep.mubr.msk.bf16.mxu0 %vm3055_vm0, %v3054_v24 }
 0x116   : > { %v1357_v15 = vpop.f32.mrf.mxu0  ;;  %v1461_v16 = vpop.f32.mrf.mxu1 }
 0x118   : > { %v3396_v1 = vpop.f32.mrf.mxu0  ;;  %v3398_v17 = vpop.f32.mrf.mxu1 }
 0x11a   : > { %v1360_v21 = vpop.f32.mrf.mxu0  ;;  %v1464_v22 = vpop.f32.mrf.mxu1 }
 0x11c   : > { %v3403_v23 = vpop.f32.mrf.mxu0  ;;  %v3405_v25 = vpop.f32.mrf.mxu1  ;;  %1690 = vmatmul.mubr.bf16.gmra.mxu1 %v3003_v18  ;;  %2745 = vmatmul.mubr.msk.bf16.gmra.mxu0 %vm1237_vm1, %v3004_v19  ;;  %v3021_v18 = vld [vmem:[%s3113_s28 + $0x300] ss:$20 sps:$4 sm:$0xff]  }
 0x11d   : > { %1697 = vmatprep.mubr.bf16.mxu1 %v3005_v20  ;;  %2748 = vmatprep.mubr.msk.bf16.mxu0 %vm3055_vm0, %v3054_v24  ;;  %v3024_v19 = vld [vmem:[%s3113_s28 + $0x2e0] ss:$20 sps:$4 sm:$0xff]  }
 0x11e   : > { %v1365_v26 = vpop.f32.mrf.mxu0  ;;  %v1469_v27 = vpop.f32.mrf.mxu1  ;;  %v3027_v20 = vld [vmem:[%s3113_s28 + $0x32c] ss:$20 sps:$4 sm:$0xff]  }
 0x120   : > { %v3410_v28 = vpop.f32.mrf.mxu0  ;;  %v3412_v29 = vpop.f32.mrf.mxu1 }
 0x122   : > { %v1368_v33 = vpop.f32.mrf.mxu0  ;;  %v1472_v34 = vpop.f32.mrf.mxu1 }
 0x123   : > { %v3025_v34 = vld [vmem:[%s3113_s28 + $0x328] ss:$20 sps:$4 sm:$0xff]  }
 0x124   : > { %v3417_v35 = vpop.f32.mrf.mxu0  ;;  %v3419_v36 = vpop.f32.mrf.mxu1  ;;  %1698 = vmatmul.mubr.bf16.gmra.mxu1 %v3007_v30  ;;  %2749 = vmatmul.mubr.msk.bf16.gmra.mxu0 %vm1237_vm1, %v3008_v31 }
 0x125   : > { %1705 = vmatprep.mubr.bf16.mxu1 %v3011_v32  ;;  %2752 = vmatprep.mubr.msk.bf16.mxu0 %vm3055_vm0, %v3054_v24 }
 0x126   : > { %v1373_v37 = vpop.f32.mrf.mxu0  ;;  %v1477_v38 = vpop.f32.mrf.mxu1 }
 0x127   : > { %v3028_v37 = vld [vmem:[%s3113_s28 + $0x308] ss:$20 sps:$4 sm:$0xff]  }
 0x128   : > { %v3424_v39 = vpop.f32.mrf.mxu0  ;;  %v3426_v40 = vpop.f32.mrf.mxu1  ;;  %v3031_v38 = vld [vmem:[%s3113_s28 + $0x354] ss:$20 sps:$4 sm:$0xff]  }
 0x12a   : > { %v1376_v44 = vpop.f32.mrf.mxu0  ;;  %v1480_v45 = vpop.f32.mrf.mxu1 }
 0x12c   : > { %v3431_v46 = vpop.f32.mrf.mxu0  ;;  %v3433_v47 = vpop.f32.mrf.mxu1  ;;  %1706 = vmatmul.mubr.bf16.gmra.mxu1 %v3009_v41  ;;  %2753 = vmatmul.mubr.msk.bf16.gmra.mxu0 %vm1237_vm1, %v3012_v42 }
 0x12d   : > { %1713 = vmatprep.mubr.bf16.mxu1 %v3015_v43  ;;  %2756 = vmatprep.mubr.msk.bf16.mxu0 %vm3055_vm0, %v3054_v24 }
 0x12e   : > { %v1381_v48 = vpop.f32.mrf.mxu0  ;;  %v1485_v49 = vpop.f32.mrf.mxu1 }
 0x130   : > { %v3438_v50 = vpop.f32.mrf.mxu0  ;;  %v3440_v51 = vpop.f32.mrf.mxu1 }
 0x132   : > { %v1384_v55 = vpop.f32.mrf.mxu0  ;;  %v1488_v56 = vpop.f32.mrf.mxu1 }
 0x133   : > { %v3035_v55 = vld [vmem:[%s3113_s28 + $0x37c] ss:$20 sps:$4 sm:$0xff]  }
 0x134   : > { %v3445_v57 = vpop.f32.mrf.mxu0  ;;  %v3447_v58 = vpop.f32.mrf.mxu1  ;;  %1714 = vmatmul.mubr.bf16.gmra.mxu1 %v3013_v52  ;;  %2757 = vmatmul.mubr.msk.bf16.gmra.mxu0 %vm1237_vm1, %v3016_v53  ;;  %v3029_v53 = vld [vmem:[%s3113_s28 + $0x350] ss:$20 sps:$4 sm:$0xff]  }
 0x135   : > { %1721 = vmatprep.mubr.bf16.mxu1 %v3019_v54  ;;  %2760 = vmatprep.mubr.msk.bf16.mxu0 %vm3055_vm0, %v3054_v24  ;;  %v3032_v54 = vld [vmem:[%s3113_s28 + $0x330] ss:$20 sps:$4 sm:$0xff]  }
 0x136   : > { %v1389_v59 = vpop.f32.mrf.mxu0  ;;  %v1493_v60 = vpop.f32.mrf.mxu1 }
 0x138   : > { %v3452_v61 = vpop.f32.mrf.mxu0  ;;  %v3454_v62 = vpop.f32.mrf.mxu1 }
 0x13a   : > { %v1392_v5 = vpop.f32.mrf.mxu0  ;;  %v1496_v8 = vpop.f32.mrf.mxu1 }
 0x13c   : > { %v3459_v9 = vpop.f32.mrf.mxu0  ;;  %v3461_v10 = vpop.f32.mrf.mxu1  ;;  %1722 = vmatmul.mubr.bf16.gmra.mxu1 %v3017_v63  ;;  %2761 = vmatmul.mubr.msk.bf16.gmra.mxu0 %vm1237_vm1, %v3020_v0 }
 0x13d   : > { %1729 = vmatprep.mubr.bf16.mxu1 %v3023_v4  ;;  %2764 = vmatprep.mubr.msk.bf16.mxu0 %vm3055_vm0, %v3054_v24 }
 0x13e   : > { %v1397_v11 = vpop.f32.mrf.mxu0  ;;  %v1501_v12 = vpop.f32.mrf.mxu1 }
 0x13f   : > { %v3033_v11 = vld [vmem:[%s3113_s28 + $0x378] ss:$20 sps:$4 sm:$0xff]  }
 0x140   : > { %v3466_v15 = vpop.f32.mrf.mxu0  ;;  %v3468_v16 = vpop.f32.mrf.mxu1  ;;  %v3036_v12 = vld [vmem:[%s3113_s28 + $0x358] ss:$20 sps:$4 sm:$0xff]  }
 0x142   : > { %v1400_v21 = vpop.f32.mrf.mxu0  ;;  %v1504_v22 = vpop.f32.mrf.mxu1 }
 0x144   : > { %v3473_v26 = vpop.f32.mrf.mxu0  ;;  %v3475_v27 = vpop.f32.mrf.mxu1  ;;  %1730 = vmatmul.mubr.bf16.gmra.mxu1 %v3021_v18  ;;  %2765 = vmatmul.mubr.msk.bf16.gmra.mxu0 %vm1237_vm1, %v3024_v19  ;;  %v3039_v18 = vld [vmem:[%s3113_s28 + $0x3a4] ss:$20 sps:$4 sm:$0xff]  }
 0x145   : > { %1737 = vmatprep.mubr.bf16.mxu1 %v3027_v20  ;;  %2768 = vmatprep.mubr.msk.bf16.mxu0 %vm3055_vm0, %v3054_v24 }
 0x146   : > { %v1405_v30 = vpop.f32.mrf.mxu0  ;;  %v1509_v31 = vpop.f32.mrf.mxu1 }
 0x148   : > { %v3480_v32 = vpop.f32.mrf.mxu0  ;;  %v3482_v33 = vpop.f32.mrf.mxu1 }
 0x14a   : > { %v1408_v41 = vpop.f32.mrf.mxu0  ;;  %v1512_v42 = vpop.f32.mrf.mxu1 }
 0x14b   : > { %v3037_v41 = vld [vmem:[%s3113_s28 + $0x3a0] ss:$20 sps:$4 sm:$0xff]  }
 0x14c   : > { %v3487_v43 = vpop.f32.mrf.mxu0  ;;  %v3489_v44 = vpop.f32.mrf.mxu1  ;;  %1738 = vmatmul.mubr.bf16.gmra.mxu1 %v3025_v34  ;;  %2769 = vmatmul.mubr.msk.bf16.gmra.mxu0 %vm1237_vm1, %v3028_v37  ;;  %v323_v34 = vld [vmem:[%s3113_s28 + $0x3c8] sm:$0xff]  ;;  %v3040_v42 = vld [vmem:[%s3113_s28 + $0x380] ss:$20 sps:$4 sm:$0xff]  }
 0x14d   : > { %1745 = vmatprep.mubr.bf16.mxu1 %v3031_v38  ;;  %2772 = vmatprep.mubr.msk.bf16.mxu0 %vm3055_vm0, %v3054_v24 }
 0x14e   : > { %v1413_v45 = vpop.f32.mrf.mxu0  ;;  %v1517_v48 = vpop.f32.mrf.mxu1 }
 0x14f   : > { %v2492_v45 = vcombine.high %v323_v34, %v323_v34 }
 0x150   : > { %v3494_v49 = vpop.f32.mrf.mxu0  ;;  %v3496_v52 = vpop.f32.mrf.mxu1 }
 0x152   : > { %v1416_v56 = vpop.f32.mrf.mxu0  ;;  %v1520_v59 = vpop.f32.mrf.mxu1 }
 0x154   : > { %v3501_v60 = vpop.f32.mrf.mxu0  ;;  %v3503_v63 = vpop.f32.mrf.mxu1  ;;  %1746 = vmatmul.mubr.bf16.gmra.mxu1 %v3029_v53  ;;  %2773 = vmatmul.mubr.msk.bf16.gmra.mxu0 %vm1237_vm1, %v3032_v54 }
 0x155   : > { %1753 = vmatprep.mubr.bf16.mxu1 %v3035_v55  ;;  %2776 = vmatprep.mubr.msk.bf16.mxu0 %vm3055_vm0, %v3054_v24 }
 0x156   : > { %v1421_v0 = vpop.f32.mrf.mxu0  ;;  %v1525_v4 = vpop.f32.mrf.mxu1 }
 0x158   : > { %v3508_v5 = vpop.f32.mrf.mxu0  ;;  %v3510_v8 = vpop.f32.mrf.mxu1 }
 0x15a   : > { %v1424_v19 = vpop.f32.mrf.mxu0  ;;  %v1528_v20 = vpop.f32.mrf.mxu1 }
 0x15c   : > { %v3515_v21 = vpop.f32.mrf.mxu0  ;;  %v3517_v22 = vpop.f32.mrf.mxu1  ;;  %1754 = vmatmul.mubr.bf16.gmra.mxu1 %v3033_v11  ;;  %2777 = vmatmul.mubr.msk.bf16.gmra.mxu0 %vm1237_vm1, %v3036_v12  ;;  %v2491_v11 = vcombine.low %v323_v34, %v323_v34  ;;  %v3043_v12 = vld [vmem:[%s3113_s28 + $0x3a8] ss:$20 sps:$4 sm:$0xff]  }
 0x15d   : > { %3762 = vst [vmem:[#allocation2_spill] sm:$0xff] %v3517_v22  ;;  %1761 = vmatprep.mubr.bf16.mxu1 %v3039_v18  ;;  %2780 = vmatprep.mubr.msk.bf16.mxu0 %vm3055_vm0, %v3054_v24 }
 0x15e   : > { %v1429_v30 = vpop.f32.mrf.mxu0  ;;  %v1533_v31 = vpop.f32.mrf.mxu1 }
 0x15f   : > { %v3547_v31 = vld [vmem:[%s3760_s2] ss:$0 sm:$0xff] }
 0x160   : > { %v3523_v37 = vpop.f32.mrf.mxu0  ;;  %v3525_v38 = vpop.f32.mrf.mxu1 }
 0x161   : > { %3763 = vst [vmem:[#allocation3_spill] sm:$0xff] %v3525_v38 }
 0x162   : > { %v1432_v48 = vpop.f32.mrf.mxu0  ;;  %v1536_v53 = vpop.f32.mrf.mxu1 }
 0x163   : > { %v3044_v48 = vld [vmem:[%s3113_s28 + $0x3d0] ss:$0 sps:$4 sm:$0xff]   ;;  %v1348_v53 = vadd.f32 %v3547_v31, %v3375_v2 }
 0x164   : > { %v3529_v54 = vpop.f32.mrf.mxu0  ;;  %v3531_v55 = vpop.f32.mrf.mxu1  ;;  %1762 = vmatmul.mubr.bf16.gmra.mxu1 %v3037_v41  ;;  %2781 = vmatmul.mubr.msk.bf16.gmra.mxu0 %vm1237_vm1, %v3040_v42 }
 0x165   : > { %3764 = vst [vmem:[#allocation4_spill] sm:$0xff] %v3531_v55  ;;  %1769 = vmatprep.mubr.bf16.mxu1 %v2492_v45  ;;  %2784 = vmatprep.mubr.msk.bf16.mxu0 %vm3055_vm0, %v3054_v24 }
 0x166   : > { %v1437_v56 = vpop.f32.mrf.mxu0  ;;  %v1541_v59 = vpop.f32.mrf.mxu1 }
 0x168   : > { %v3536_v0 = vpop.f32.mrf.mxu0  ;;  %v1542_v4 = vpop.f32.mrf.mxu1 }
 0x16a   : > { %v1440_v18 = vpop.f32.mrf.mxu0  ;;  %v1543_v19 = vpop.f32.mrf.mxu1 }
 0x16c   : > { %v3539_v20 = vpop.f32.mrf.mxu0  ;;  %v1579_v30 = vpop.f32.mrf.mxu1  ;;  %1770 = vmatmul.mubr.bf16.gmra.mxu1 %v2491_v11  ;;  %2785 = vmatmul.mubr.msk.bf16.gmra.mxu0 %vm1237_vm1, %v3043_v12 }
 0x16d   : > { %2788 = vmatprep.mubr.msk.bf16.mxu0 %vm3055_vm0, %v3054_v24  ;;  %v1580_v4 = vadd.f32 %v1579_v30, %v1348_v53  ;;  %v1351_v24 = vadd.f32 %v3547_v31, %v3382_v6 }
 0x16e   : > { %v1445_v41 = vpop.f32.mrf.mxu0  ;;  %v1581_v34 = vpop.f32.mrf.mxu1 }
 0x170   : > { %v3549_v42 = vpop.f32.mrf.mxu0  ;;  %v1582_v45 = vpop.f32.mrf.mxu1 }
 0x171   : > { %v1583_v34 = vadd.f32 %v1582_v45, %v1351_v24 }
 0x172   : > { %v1448_v56 = vpop.f32.mrf.mxu0  ;;  %v1584_v59 = vpop.f32.mrf.mxu1 }
 0x174   : > { %v1587_v11 = vpop.f32.mrf.mxu1  ;;  %v1811_v12 = vpop.f32.mrf.mxu0  ;;  %2789 = vmatmul.mubr.msk.bf16.gmra.mxu0 %vm1237_vm1, %v3044_v48  ;;  %v1356_v48 = vadd.f32 %v3547_v31, %v3389_v13 }
 0x175   : > { %v1812_v18 = vadd.f32 %v1811_v12, %v1580_v4 }
 0x176   : > { %v1589_v19 = vpop.f32.mrf.mxu1  ;;  %v2694_v41 = vpop.f32.mrf.mxu0  ;;  %v1588_v4 = vadd.f32 %v1587_v11, %v1356_v48  ;;  %v1364_v11 = vadd.f32 %v3547_v31, %v3403_v23 }
 0x177   : > { %v2009_v55 = vmax.f32 %v1812_v18, 0.0  ;;  %v1359_v18 = vadd.f32 %v3547_v31, %v3396_v1 }
 0x178   : > { %v1590_v2 = vpop.f32.mrf.mxu1  ;;  %v1814_v30 = vpop.f32.mrf.mxu0 }
 0x179   : > { %v2606_v6 = vpack.c.bf16 %v2009_v55, %v2009_v55  ;;  %v1815_v53 = vadd.f32 %v1814_v30, %v1583_v34  ;;  %v1591_v13 = vadd.f32 %v1590_v2, %v1359_v18  ;;  %v1367_v2 = vadd.f32 %v3547_v31, %v3410_v28 }
 0x17a   : > { %v1592_v56 = vpop.f32.mrf.mxu1  ;;  %v2695_v59 = vpop.f32.mrf.mxu0 }
 0x17b   : > { %2256 = vst.msk [vmem:[%s3561_s22] sm:$0xf] %vm2255_vm2, %v2606_v6  ;;  %v2010_v45 = vmax.f32 %v1815_v53, 0.0 }
 0x17c   : > { %v1595_v12 = vpop.f32.mrf.mxu1  ;;  %v1819_v24 = vpop.f32.mrf.mxu0 }
 0x17d   : > { %v2607_v19 = vpack.c.bf16 %v2010_v45, %v2010_v45  ;;  %v1820_v41 = vadd.f32 %v1819_v24, %v1588_v4  ;;  %v1596_v1 = vadd.f32 %v1595_v12, %v1364_v11  ;;  %v1372_v12 = vadd.f32 %v3547_v31, %v3417_v35 }
 0x17e   : > { %v1597_v38 = vpop.f32.mrf.mxu1  ;;  %v2698_v22 = vpop.f32.mrf.mxu0 }
 0x17f   : > { %2257 = vst.msk [vmem:[%s3561_s22 + $0x4] sm:$0xf] %vm2255_vm2, %v2607_v19  ;;  %v2011_v55 = vmax.f32 %v1820_v41, 0.0 }
 0x180   : > { %v1598_v34 = vpop.f32.mrf.mxu1  ;;  %v1822_v30 = vpop.f32.mrf.mxu0 }
 0x181   : > { %v2608_v48 = vpack.c.bf16 %v2011_v55, %v2011_v55  ;;  %v1823_v6 = vadd.f32 %v1822_v30, %v1591_v13  ;;  %v1599_v23 = vadd.f32 %v1598_v34, %v1367_v2  ;;  %v1375_v34 = vadd.f32 %v3547_v31, %v3424_v39 }
 0x182   : > { %v1600_v53 = vpop.f32.mrf.mxu1  ;;  %v2699_v56 = vpop.f32.mrf.mxu0 }
 0x183   : > { %2258 = vst.msk [vmem:[%s3561_s22 + $0x8] sm:$0xf] %vm2255_vm2, %v2608_v48  ;;  %v2012_v59 = vmax.f32 %v1823_v6, 0.0 }
 0x184   : > { %v1603_v38 = vpop.f32.mrf.mxu1  ;;  %v1827_v22 = vpop.f32.mrf.mxu0 }
 0x185   : > { %v2609_v4 = vpack.c.bf16 %v2012_v59, %v2012_v59  ;;  %v1828_v45 = vadd.f32 %v1827_v22, %v1596_v1  ;;  %v1604_v28 = vadd.f32 %v1603_v38, %v1372_v12  ;;  %v1380_v38 = vadd.f32 %v3547_v31, %v3431_v46 }
 0x186   : > { %v1605_v24 = vpop.f32.mrf.mxu1  ;;  %v2702_v18 = vpop.f32.mrf.mxu0 }
 0x187   : > { %2259 = vst.msk [vmem:[%s3561_s22 + $0xc] sm:$0xf] %vm2255_vm2, %v2609_v4  ;;  %v2013_v19 = vmax.f32 %v1828_v45, 0.0 }
 0x188   : > { %v1606_v41 = vpop.f32.mrf.mxu1  ;;  %v1830_v13 = vpop.f32.mrf.mxu0 }
 0x189   : > { %v2610_v55 = vpack.c.bf16 %v2013_v19, %v2013_v19  ;;  %v1831_v30 = vadd.f32 %v1830_v13, %v1599_v23  ;;  %v1607_v35 = vadd.f32 %v1606_v41, %v1375_v34  ;;  %v1383_v41 = vadd.f32 %v3547_v31, %v3438_v50 }
 0x18a   : > { %v1608_v11 = vpop.f32.mrf.mxu1  ;;  %v2703_v48 = vpop.f32.mrf.mxu0 }
 0x18b   : > { %2260 = vst.msk [vmem:[%s3561_s22 + $0x10] sm:$0xf] %vm2255_vm2, %v2610_v55  ;;  %v2014_v6 = vmax.f32 %v1831_v30, 0.0 }
 0x18c   : > { %v1611_v53 = vpop.f32.mrf.mxu1  ;;  %v1835_v56 = vpop.f32.mrf.mxu0 }
 0x18d   : > { %v2611_v1 = vpack.c.bf16 %v2014_v6, %v2014_v6  ;;  %v1836_v59 = vadd.f32 %v1835_v56, %v1604_v28  ;;  %v1612_v39 = vadd.f32 %v1611_v53, %v1380_v38  ;;  %v1388_v53 = vadd.f32 %v3547_v31, %v3445_v57 }
 0x18e   : > { %v1613_v22 = vpop.f32.mrf.mxu1  ;;  %v2706_v2 = vpop.f32.mrf.mxu0 }
 0x18f   : > { %2261 = vst.msk [vmem:[%s3561_s22 + $0x14] sm:$0xf] %vm2255_vm2, %v2611_v1  ;;  %v2015_v4 = vmax.f32 %v1836_v59, 0.0 }
 0x190   : > { %v1614_v45 = vpop.f32.mrf.mxu1  ;;  %v1838_v24 = vpop.f32.mrf.mxu0 }
 0x191   : > { %v2612_v18 = vpack.c.bf16 %v2015_v4, %v2015_v4  ;;  %v1839_v23 = vadd.f32 %v1838_v24, %v1607_v35  ;;  %v1615_v46 = vadd.f32 %v1614_v45, %v1383_v41  ;;  %v1391_v45 = vadd.f32 %v3547_v31, %v3452_v61 }
 0x192   : > { %v1616_v19 = vpop.f32.mrf.mxu1  ;;  %v2707_v13 = vpop.f32.mrf.mxu0 }
 0x193   : > { %2262 = vst.msk [vmem:[%s3561_s22 + $0x18] sm:$0xf] %vm2255_vm2, %v2612_v18  ;;  %v2016_v12 = vmax.f32 %v1839_v23, 0.0 }
 0x194   : > { %v1619_v55 = vpop.f32.mrf.mxu1  ;;  %v1843_v30 = vpop.f32.mrf.mxu0 }
 0x195   : > { %v2613_v11 = vpack.c.bf16 %v2016_v12, %v2016_v12  ;;  %v1844_v48 = vadd.f32 %v1843_v30, %v1612_v39  ;;  %v1620_v50 = vadd.f32 %v1619_v55, %v1388_v53  ;;  %v1396_v55 = vadd.f32 %v3547_v31, %v3459_v9 }
 0x196   : > { %v1621_v28 = vpop.f32.mrf.mxu1  ;;  %v2710_v6 = vpop.f32.mrf.mxu0 }
 0x197   : > { %2263 = vst.msk [vmem:[%s3561_s22 + $0x1c] sm:$0xf] %vm2255_vm2, %v2613_v11  ;;  %v2017_v56 = vmax.f32 %v1844_v48, 0.0 }
 0x198   : > { %v1622_v34 = vpop.f32.mrf.mxu1  ;;  %v1846_v1 = vpop.f32.mrf.mxu0 }
 0x199   : > { %v2614_v59 = vpack.c.bf16 %v2017_v56, %v2017_v56  ;;  %v1847_v22 = vadd.f32 %v1846_v1, %v1615_v46  ;;  %v1623_v57 = vadd.f32 %v1622_v34, %v1391_v45  ;;  %v1399_v34 = vadd.f32 %v3547_v31, %v3466_v15 }
 0x19a   : > { %v1624_v2 = vpop.f32.mrf.mxu1  ;;  %v2711_v35 = vpop.f32.mrf.mxu0 }
 0x19b   : > { %2264 = vst.msk [vmem:[%s3561_s22 + $0x20] sm:$0xf] %vm2255_vm2, %v2614_v59  ;;  %v2018_v4 = vmax.f32 %v1847_v22, 0.0 }
 0x19c   : > { %v1627_v24 = vpop.f32.mrf.mxu1  ;;  %v1851_v38 = vpop.f32.mrf.mxu0 }
 0x19d   : > { %v2615_v18 = vpack.c.bf16 %v2018_v4, %v2018_v4  ;;  %v1852_v23 = vadd.f32 %v1851_v38, %v1620_v50  ;;  %v1628_v61 = vadd.f32 %v1627_v24, %v1396_v55  ;;  %v1404_v4 = vadd.f32 %v3547_v31, %v3473_v26 }
 0x19e   : > { %v1629_v19 = vpop.f32.mrf.mxu1  ;;  %v2714_v13 = vpop.f32.mrf.mxu0 }
 0x19f   : > { %2265 = vst.msk [vmem:[%s3561_s22 + $0x24] sm:$0xf] %vm2255_vm2, %v2615_v18  ;;  %v2019_v39 = vmax.f32 %v1852_v23, 0.0 }
 0x1a0   : > { %v1630_v12 = vpop.f32.mrf.mxu1  ;;  %v1854_v30 = vpop.f32.mrf.mxu0 }
 0x1a1   : > { %v2616_v41 = vpack.c.bf16 %v2019_v39, %v2019_v39  ;;  %v1855_v11 = vadd.f32 %v1854_v30, %v1623_v57  ;;  %v1631_v9 = vadd.f32 %v1630_v12, %v1399_v34  ;;  %v1407_v57 = vadd.f32 %v3547_v31, %v3480_v32 }
 0x1a2   : > { %v1632_v48 = vpop.f32.mrf.mxu1  ;;  %v2715_v28 = vpop.f32.mrf.mxu0 }
 0x1a3   : > { %2266 = vst.msk [vmem:[%s3561_s22 + $0x28] sm:$0xf] %vm2255_vm2, %v2616_v41  ;;  %v2020_v6 = vmax.f32 %v1855_v11, 0.0  ;;  %v1412_v28 = vadd.f32 %v3547_v31, %v3487_v43 }
 0x1a4   : > { %v1635_v46 = vpop.f32.mrf.mxu1  ;;  %v1859_v56 = vpop.f32.mrf.mxu0 }
 0x1a5   : > { %v2617_v1 = vpack.c.bf16 %v2020_v6, %v2020_v6  ;;  %v1860_v53 = vadd.f32 %v1859_v56, %v1628_v61  ;;  %v1636_v15 = vadd.f32 %v1635_v46, %v1404_v4 }
 0x1a6   : > { %v1637_v59 = vpop.f32.mrf.mxu1  ;;  %v2718_v22 = vpop.f32.mrf.mxu0 }
 0x1a7   : > { %2267 = vst.msk [vmem:[%s3561_s22 + $0x2c] sm:$0xf] %vm2255_vm2, %v2617_v1  ;;  %v2021_v2 = vmax.f32 %v1860_v53, 0.0  ;;  %v1415_v59 = vadd.f32 %v3547_v31, %v3494_v49 }
 0x1a8   : > { %v1638_v35 = vpop.f32.mrf.mxu1  ;;  %v1862_v50 = vpop.f32.mrf.mxu0 }
 0x1a9   : > { %v2618_v24 = vpack.c.bf16 %v2021_v2, %v2021_v2  ;;  %v1863_v38 = vadd.f32 %v1862_v50, %v1631_v9  ;;  %v1639_v26 = vadd.f32 %v1638_v35, %v1407_v57 }
 0x1aa   : > { %v1640_v45 = vpop.f32.mrf.mxu1  ;;  %v2719_v18 = vpop.f32.mrf.mxu0 }
 0x1ab   : > { %2268 = vst.msk [vmem:[%s3561_s22 + $0x30] sm:$0xf] %vm2255_vm2, %v2618_v24  ;;  %v2022_v23 = vmax.f32 %v1863_v38, 0.0  ;;  %v1420_v38 = vadd.f32 %v3547_v31, %v3501_v60 }
 0x1ac   : > { %v1643_v19 = vpop.f32.mrf.mxu1  ;;  %v1867_v13 = vpop.f32.mrf.mxu0 }
 0x1ad   : > { %v2619_v39 = vpack.c.bf16 %v2022_v23, %v2022_v23  ;;  %v1868_v12 = vadd.f32 %v1867_v13, %v1636_v15  ;;  %v1644_v32 = vadd.f32 %v1643_v19, %v1412_v28  ;;  %v1428_v28 = vadd.f32 %v3547_v31, %v3515_v21 }
 0x1ae   : > { %v1645_v30 = vpop.f32.mrf.mxu1  ;;  %v2722_v55 = vpop.f32.mrf.mxu0 }
 0x1af   : > { %2269 = vst.msk [vmem:[%s3561_s22 + $0x34] sm:$0xf] %vm2255_vm2, %v2619_v39  ;;  %v2023_v41 = vmax.f32 %v1868_v12, 0.0  ;;  %v1423_v39 = vadd.f32 %v3547_v31, %v3508_v5 }
 0x1b0   : > { %v1646_v11 = vpop.f32.mrf.mxu1  ;;  %v1870_v48 = vpop.f32.mrf.mxu0 }
 0x1b1   : > { %v2620_v61 = vpack.c.bf16 %v2023_v41, %v2023_v41  ;;  %v1871_v6 = vadd.f32 %v1870_v48, %v1639_v26  ;;  %v1647_v43 = vadd.f32 %v1646_v11, %v1415_v59 }
 0x1b2   : > { %v1648_v46 = vpop.f32.mrf.mxu1  ;;  %v2723_v56 = vpop.f32.mrf.mxu0 }
 0x1b3   : > { %2270 = vst.msk [vmem:[%s3561_s22 + $0x38] sm:$0xf] %vm2255_vm2, %v2620_v61  ;;  %v2024_v34 = vmax.f32 %v1871_v6, 0.0 }
 0x1b4   : > { %v1651_v1 = vpop.f32.mrf.mxu1  ;;  %v1875_v53 = vpop.f32.mrf.mxu0 }
 0x1b5   : > { %v2621_v22 = vpack.c.bf16 %v2024_v34, %v2024_v34  ;;  %v1876_v9 = vadd.f32 %v1875_v53, %v1644_v32  ;;  %v1652_v49 = vadd.f32 %v1651_v1, %v1420_v38  ;;  %v1431_v53 = vadd.f32 %v3547_v31, %v3523_v37 }
 0x1b6   : > { %v1653_v2 = vpop.f32.mrf.mxu1  ;;  %v2726_v35 = vpop.f32.mrf.mxu0 }
 0x1b7   : > { %2271 = vst.msk [vmem:[%s3561_s22 + $0x3c] sm:$0xf] %vm2255_vm2, %v2621_v22  ;;  %v2025_v50 = vmax.f32 %v1876_v9, 0.0 }
 0x1b8   : > { %v1654_v4 = vpop.f32.mrf.mxu1  ;;  %v1878_v24 = vpop.f32.mrf.mxu0 }
 0x1b9   : > { %v2622_v45 = vpack.c.bf16 %v2025_v50, %v2025_v50  ;;  %v1879_v18 = vadd.f32 %v1878_v24, %v1647_v43  ;;  %v1655_v60 = vadd.f32 %v1654_v4, %v1423_v39  ;;  %v1436_v4 = vadd.f32 %v3547_v31, %v3529_v54 }
 0x1ba   : > { %v1656_v15 = vpop.f32.mrf.mxu1  ;;  %v2727_v23 = vpop.f32.mrf.mxu0 }
 0x1bb   : > { %2272 = vst.msk [vmem:[%s3561_s22 + $0x40] sm:$0xf] %vm2255_vm2, %v2622_v45  ;;  %v2026_v19 = vmax.f32 %v1879_v18, 0.0 }
 0x1bc   : > { %v1659_v13 = vpop.f32.mrf.mxu1  ;;  %v1883_v57 = vpop.f32.mrf.mxu0 }
 0x1bd   : > { %v2623_v12 = vpack.c.bf16 %v2026_v19, %v2026_v19  ;;  %v1884_v30 = vadd.f32 %v1883_v57, %v1652_v49  ;;  %v1660_v5 = vadd.f32 %v1659_v13, %v1428_v28  ;;  %v1439_v19 = vadd.f32 %v3547_v31, %v3536_v0 }
 0x1be   : > { %v1661_v55 = vpop.f32.mrf.mxu1  ;;  %v2730_v26 = vpop.f32.mrf.mxu0 }
 0x1bf   : > { %2273 = vst.msk [vmem:[%s3561_s22 + $0x44] sm:$0xf] %vm2255_vm2, %v2623_v12  ;;  %v2027_v41 = vmax.f32 %v1884_v30, 0.0 }
 0x1c0   : > { %v1662_v11 = vpop.f32.mrf.mxu1  ;;  %v1886_v48 = vpop.f32.mrf.mxu0 }
 0x1c1   : > { %v2624_v61 = vpack.c.bf16 %v2027_v41, %v2027_v41  ;;  %v1887_v6 = vadd.f32 %v1886_v48, %v1655_v60  ;;  %v1663_v21 = vadd.f32 %v1662_v11, %v1431_v53  ;;  %v1444_v60 = vadd.f32 %v3547_v31, %v3539_v20 }
 0x1c2   : > { %v1664_v46 = vpop.f32.mrf.mxu1  ;;  %v2731_v56 = vpop.f32.mrf.mxu0 }
 0x1c3   : > { %2274 = vst.msk [vmem:[%s3561_s22 + $0x48] sm:$0xf] %vm2255_vm2, %v2624_v61  ;;  %v2028_v32 = vmax.f32 %v1887_v6, 0.0  ;;  %v1447_v56 = vadd.f32 %v3547_v31, %v3549_v42 }
 0x1c4   : > { %v1667_v34 = vpop.f32.mrf.mxu1  ;;  %v1891_v1 = vpop.f32.mrf.mxu0 }
 0x1c5   : > { %v2625_v59 = vpack.c.bf16 %v2028_v32, %v2028_v32  ;;  %v1892_v22 = vadd.f32 %v1891_v1, %v1660_v5  ;;  %v1668_v37 = vadd.f32 %v1667_v34, %v1436_v4 }
 0x1c6   : > { %v1669_v9 = vpop.f32.mrf.mxu1  ;;  %v2734_v2 = vpop.f32.mrf.mxu0 }
 0x1c7   : > { %2275 = vst.msk [vmem:[%s3561_s22 + $0x4c] sm:$0xf] %vm2255_vm2, %v2625_v59  ;;  %v2029_v35 = vmax.f32 %v1892_v22, 0.0  ;;  %v1452_v9 = vadd.f32 %v3547_v31, %v3377_v3 }
 0x1c8   : > { %v1670_v43 = vpop.f32.mrf.mxu1  ;;  %v1894_v50 = vpop.f32.mrf.mxu0 }
 0x1c9   : > { %v2626_v24 = vpack.c.bf16 %v2029_v35, %v2029_v35  ;;  %v1895_v38 = vadd.f32 %v1894_v50, %v1663_v21  ;;  %v1671_v54 = vadd.f32 %v1670_v43, %v1439_v19 }
 0x1ca   : > { %v1672_v45 = vpop.f32.mrf.mxu1  ;;  %v2735_v18 = vpop.f32.mrf.mxu0 }
 0x1cb   : > { %2276 = vst.msk [vmem:[%s3561_s22 + $0x50] sm:$0xf] %vm2255_vm2, %v2626_v24  ;;  %v2030_v15 = vmax.f32 %v1895_v38, 0.0  ;;  %v1455_v38 = vadd.f32 %v3547_v31, %v3384_v7 }
 0x1cc   : > { %v1675_v23 = vpop.f32.mrf.mxu1  ;;  %v1899_v49 = vpop.f32.mrf.mxu0 }
 0x1cd   : > { %v2627_v13 = vpack.c.bf16 %v2030_v15, %v2030_v15  ;;  %v1900_v57 = vadd.f32 %v1899_v49, %v1668_v37  ;;  %v1676_v0 = vadd.f32 %v1675_v23, %v1444_v60  ;;  %v1463_v60 = vadd.f32 %v3547_v31, %v3398_v17 }
 0x1ce   : > { %v1677_v39 = vpop.f32.mrf.mxu1  ;;  %v2738_v12 = vpop.f32.mrf.mxu0 }
 0x1cf   : > { %2277 = vst.msk [vmem:[%s3561_s22 + $0x54] sm:$0xf] %vm2255_vm2, %v2627_v13  ;;  %v2031_v30 = vmax.f32 %v1900_v57, 0.0  ;;  %v1460_v13 = vadd.f32 %v3547_v31, %v3391_v14 }
 0x1d0   : > { %v1678_v55 = vpop.f32.mrf.mxu1  ;;  %v1902_v26 = vpop.f32.mrf.mxu0 }
 0x1d1   : > { %v2628_v41 = vpack.c.bf16 %v2031_v30, %v2031_v30  ;;  %v1903_v11 = vadd.f32 %v1902_v26, %v1671_v54  ;;  %v1679_v20 = vadd.f32 %v1678_v55, %v1447_v56 }
 0x1d2   : > { %v1680_v48 = vpop.f32.mrf.mxu1  ;;  %v2739_v28 = vpop.f32.mrf.mxu0 }
 0x1d3   : > { %2278 = vst.msk [vmem:[%s3561_s22 + $0x58] sm:$0xf] %vm2255_vm2, %v2628_v41  ;;  %v2032_v61 = vmax.f32 %v1903_v11, 0.0 }
 0x1d4   : > { %v1683_v6 = vpop.f32.mrf.mxu1  ;;  %v1907_v46 = vpop.f32.mrf.mxu0 }
 0x1d5   : > { %v2629_v5 = vpack.c.bf16 %v2032_v61, %v2032_v61  ;;  %v1908_v32 = vadd.f32 %v1907_v46, %v1676_v0  ;;  %v1684_v42 = vadd.f32 %v1683_v6, %v1452_v9  ;;  %v1468_v46 = vadd.f32 %v3547_v31, %v3405_v25 }
 0x1d6   : > { %v1685_v34 = vpop.f32.mrf.mxu1  ;;  %v2742_v1 = vpop.f32.mrf.mxu0 }
 0x1d7   : > { %2279 = vst.msk [vmem:[%s3561_s22 + $0x5c] sm:$0xf] %vm2255_vm2, %v2629_v5  ;;  %v2033_v53 = vmax.f32 %v1908_v32, 0.0 }
 0x1d8   : > { %v1686_v59 = vpop.f32.mrf.mxu1  ;;  %v1910_v22 = vpop.f32.mrf.mxu0 }
 0x1d9   : > { %v2630_v2 = vpack.c.bf16 %v2033_v53, %v2033_v53  ;;  %v1911_v21 = vadd.f32 %v1910_v22, %v1679_v20  ;;  %v1687_v3 = vadd.f32 %v1686_v59, %v1455_v38  ;;  %v1471_v59 = vadd.f32 %v3547_v31, %v3412_v29 }
 0x1da   : > { %v1688_v35 = vpop.f32.mrf.mxu1  ;;  %v2743_v43 = vpop.f32.mrf.mxu0 }
 0x1db   : > { %2280 = vst.msk [vmem:[%s3561_s22 + $0x60] sm:$0xf] %vm2255_vm2, %v2630_v2  ;;  %v2034_v50 = vmax.f32 %v1911_v21, 0.0 }
 0x1dc   : > { %v1691_v4 = vpop.f32.mrf.mxu1  ;;  %v1915_v24 = vpop.f32.mrf.mxu0 }
 0x1dd   : > { %v2631_v45 = vpack.c.bf16 %v2034_v50, %v2034_v50  ;;  %v1916_v18 = vadd.f32 %v1915_v24, %v1684_v42  ;;  %v1692_v7 = vadd.f32 %v1691_v4, %v1460_v13  ;;  %v1476_v50 = vadd.f32 %v3547_v31, %v3419_v36 }
 0x1de   : > { %v1693_v37 = vpop.f32.mrf.mxu1  ;;  %v2746_v15 = vpop.f32.mrf.mxu0 }
 0x1df   : > { %2281 = vst.msk [vmem:[%s3561_s22 + $0x64] sm:$0xf] %vm2255_vm2, %v2631_v45  ;;  %v2035_v23 = vmax.f32 %v1916_v18, 0.0 }
 0x1e0   : > { %v1694_v49 = vpop.f32.mrf.mxu1  ;;  %v1918_v19 = vpop.f32.mrf.mxu0 }
 0x1e1   : > { %v2632_v57 = vpack.c.bf16 %v2035_v23, %v2035_v23  ;;  %v1919_v39 = vadd.f32 %v1918_v19, %v1687_v3  ;;  %v1695_v14 = vadd.f32 %v1694_v49, %v1463_v60  ;;  %v1479_v3 = vadd.f32 %v3547_v31, %v3426_v40 }
 0x1e2   : > { %v1696_v12 = vpop.f32.mrf.mxu1  ;;  %v2747_v54 = vpop.f32.mrf.mxu0 }
 0x1e3   : > { %2282 = vst.msk [vmem:[%s3561_s22 + $0x68] sm:$0xf] %vm2255_vm2, %v2632_v57  ;;  %v2036_v30 = vmax.f32 %v1919_v39, 0.0  ;;  %v1484_v54 = vadd.f32 %v3547_v31, %v3433_v47 }
 0x1e4   : > { %v1699_v55 = vpop.f32.mrf.mxu1  ;;  %v1923_v26 = vpop.f32.mrf.mxu0 }
 0x1e5   : > { %v2633_v41 = vpack.c.bf16 %v2036_v30, %v2036_v30  ;;  %v1924_v11 = vadd.f32 %v1923_v26, %v1692_v7  ;;  %v1700_v17 = vadd.f32 %v1699_v55, %v1468_v46 }
 0x1e6   : > { %v1701_v48 = vpop.f32.mrf.mxu1  ;;  %v2750_v28 = vpop.f32.mrf.mxu0 }
 0x1e7   : > { %2283 = vst.msk [vmem:[%s3561_s22 + $0x6c] sm:$0xf] %vm2255_vm2, %v2633_v41  ;;  %v2037_v0 = vmax.f32 %v1924_v11, 0.0  ;;  %v1487_v48 = vadd.f32 %v3547_v31, %v3440_v51 }
 0x1e8   : > { %v1702_v61 = vpop.f32.mrf.mxu1  ;;  %v1926_v6 = vpop.f32.mrf.mxu0 }
 0x1e9   : > { %v2634_v56 = vpack.c.bf16 %v2037_v0, %v2037_v0  ;;  %v1927_v5 = vadd.f32 %v1926_v6, %v1695_v14  ;;  %v1703_v25 = vadd.f32 %v1702_v61, %v1471_v59 }
 0x1ea   : > { %v1704_v32 = vpop.f32.mrf.mxu1  ;;  %v2751_v34 = vpop.f32.mrf.mxu0 }
 0x1eb   : > { %2284 = vst.msk [vmem:[%s3561_s22 + $0x70] sm:$0xf] %vm2255_vm2, %v2634_v56  ;;  %v2038_v1 = vmax.f32 %v1927_v5, 0.0  ;;  %v1492_v5 = vadd.f32 %v3547_v31, %v3447_v58 }
 0x1ec   : > { %v1707_v20 = vpop.f32.mrf.mxu1  ;;  %v1931_v53 = vpop.f32.mrf.mxu0 }
 0x1ed   : > { %v2635_v22 = vpack.c.bf16 %v2038_v1, %v2038_v1  ;;  %v1932_v9 = vadd.f32 %v1931_v53, %v1700_v17  ;;  %v1708_v29 = vadd.f32 %v1707_v20, %v1476_v50  ;;  %v1500_v50 = vadd.f32 %v3547_v31, %v3461_v10 }
 0x1ee   : > { %v1709_v2 = vpop.f32.mrf.mxu1  ;;  %v2754_v21 = vpop.f32.mrf.mxu0 }
 0x1ef   : > { %2285 = vst.msk [vmem:[%s3561_s22 + $0x74] sm:$0xf] %vm2255_vm2, %v2635_v22  ;;  %v2039_v35 = vmax.f32 %v1932_v9, 0.0  ;;  %v1495_v22 = vadd.f32 %v3547_v31, %v3454_v62 }
 0x1f0   : > { %v1710_v43 = vpop.f32.mrf.mxu1  ;;  %v1934_v42 = vpop.f32.mrf.mxu0 }
 0x1f1   : > { %v2636_v4 = vpack.c.bf16 %v2039_v35, %v2039_v35  ;;  %v1935_v24 = vadd.f32 %v1934_v42, %v1703_v25  ;;  %v1711_v36 = vadd.f32 %v1710_v43, %v1479_v3 }
 0x1f2   : > { %v1712_v38 = vpop.f32.mrf.mxu1  ;;  %v2755_v45 = vpop.f32.mrf.mxu0 }
 0x1f3   : > { %2286 = vst.msk [vmem:[%s3561_s22 + $0x78] sm:$0xf] %vm2255_vm2, %v2636_v4  ;;  %v2040_v18 = vmax.f32 %v1935_v24, 0.0 }
 0x1f4   : > { %v1715_v37 = vpop.f32.mrf.mxu1  ;;  %v1939_v15 = vpop.f32.mrf.mxu0 }
 0x1f5   : > { %v2637_v23 = vpack.c.bf16 %v2040_v18, %v2040_v18  ;;  %v1940_v49 = vadd.f32 %v1939_v15, %v1708_v29  ;;  %v1716_v40 = vadd.f32 %v1715_v37, %v1484_v54  ;;  %v1503_v15 = vadd.f32 %v3547_v31, %v3468_v16 }
 0x1f6   : > { %v1717_v19 = vpop.f32.mrf.mxu1  ;;  %v2758_v13 = vpop.f32.mrf.mxu0 }
 0x1f7   : > { %2287 = vst.msk [vmem:[%s3561_s22 + $0x7c] sm:$0xf] %vm2255_vm2, %v2637_v23  ;;  %v2041_v57 = vmax.f32 %v1940_v49, 0.0 }
 0x1f8   : > { %v1718_v39 = vpop.f32.mrf.mxu1  ;;  %v1942_v12 = vpop.f32.mrf.mxu0 }
 0x1f9   : > { %v2638_v7 = vpack.c.bf16 %v2041_v57, %v2041_v57  ;;  %v1943_v30 = vadd.f32 %v1942_v12, %v1711_v36  ;;  %v1719_v47 = vadd.f32 %v1718_v39, %v1487_v48  ;;  %v1508_v39 = vadd.f32 %v3547_v31, %v3475_v27 }
 0x1fa   : > { %v1720_v55 = vpop.f32.mrf.mxu1  ;;  %v2759_v26 = vpop.f32.mrf.mxu0 }
 0x1fb   : > { %2288 = vst.msk [vmem:[%s3561_s22 + $0x80] sm:$0xf] %vm2255_vm2, %v2638_v7  ;;  %v2042_v60 = vmax.f32 %v1943_v30, 0.0 }
 0x1fc   : > { %v1723_v41 = vpop.f32.mrf.mxu1  ;;  %v1947_v11 = vpop.f32.mrf.mxu0 }
 0x1fd   : > { %v2639_v28 = vpack.c.bf16 %v2042_v60, %v2042_v60  ;;  %v1948_v14 = vadd.f32 %v1947_v11, %v1716_v40  ;;  %v1724_v51 = vadd.f32 %v1723_v41, %v1492_v5  ;;  %v1511_v60 = vadd.f32 %v3547_v31, %v3482_v33 }
 0x1fe   : > { %v1725_v0 = vpop.f32.mrf.mxu1  ;;  %v2762_v61 = vpop.f32.mrf.mxu0 }
 0x1ff   : > { %2289 = vst.msk [vmem:[%s3561_s22 + $0x84] sm:$0xf] %vm2255_vm2, %v2639_v28  ;;  %v2043_v6 = vmax.f32 %v1948_v14, 0.0 }
 0x200   : > { %v1726_v46 = vpop.f32.mrf.mxu1  ;;  %v1950_v56 = vpop.f32.mrf.mxu0 }
 0x201   : > { %v2640_v32 = vpack.c.bf16 %v2043_v6, %v2043_v6  ;;  %v1951_v34 = vadd.f32 %v1950_v56, %v1719_v47  ;;  %v1727_v58 = vadd.f32 %v1726_v46, %v1495_v22  ;;  %v1516_v47 = vadd.f32 %v3547_v31, %v3489_v44 }
 0x202   : > { %v1728_v17 = vpop.f32.mrf.mxu1  ;;  %v2763_v1 = vpop.f32.mrf.mxu0 }
 0x203   : > { %2290 = vst.msk [vmem:[%s3561_s22 + $0x88] sm:$0xf] %vm2255_vm2, %v2640_v32  ;;  %v2044_v20 = vmax.f32 %v1951_v34, 0.0  ;;  %v1519_v1 = vadd.f32 %v3547_v31, %v3496_v52 }
 0x204   : > { %v1731_v53 = vpop.f32.mrf.mxu1  ;;  %v1955_v59 = vpop.f32.mrf.mxu0 }
 0x205   : > { %v2641_v9 = vpack.c.bf16 %v2044_v20, %v2044_v20  ;;  %v1956_v2 = vadd.f32 %v1955_v59, %v1724_v51  ;;  %v1732_v62 = vadd.f32 %v1731_v53, %v1500_v50 }
 0x206   : > { %v1733_v21 = vpop.f32.mrf.mxu1  ;;  %v2766_v25 = vpop.f32.mrf.mxu0 }
 0x207   : > { %2291 = vst.msk [vmem:[%s3561_s22 + $0x8c] sm:$0xf] %vm2255_vm2, %v2641_v9  ;;  %v2045_v35 = vmax.f32 %v1956_v2, 0.0  ;;  %v1524_v21 = vadd.f32 %v3547_v31, %v3503_v63 }
 0x208   : > { %v1734_v43 = vpop.f32.mrf.mxu1  ;;  %v1958_v42 = vpop.f32.mrf.mxu0 }
 0x209   : > { %v2642_v4 = vpack.c.bf16 %v2045_v35, %v2045_v35  ;;  %v1959_v24 = vadd.f32 %v1958_v42, %v1727_v58  ;;  %v1735_v10 = vadd.f32 %v1734_v43, %v1503_v15 }
 0x20a   : > { %v1736_v38 = vpop.f32.mrf.mxu1  ;;  %v2767_v45 = vpop.f32.mrf.mxu0 }
 0x20b   : > { %2292 = vst.msk [vmem:[%s3561_s22 + $0x90] sm:$0xf] %vm2255_vm2, %v2642_v4  ;;  %v2046_v29 = vmax.f32 %v1959_v24, 0.0  ;;  %v1527_v24 = vadd.f32 %v3547_v31, %v3510_v8 }
 0x20c   : > { %v1739_v18 = vpop.f32.mrf.mxu1  ;;  %v1963_v37 = vpop.f32.mrf.mxu0 }
 0x20d   : > { %v2643_v3 = vpack.c.bf16 %v2046_v29, %v2046_v29  ;;  %v1964_v23 = vadd.f32 %v1963_v37, %v1732_v62  ;;  %v1740_v16 = vadd.f32 %v1739_v18, %v1508_v39 }
 0x20e   : > { %v1741_v49 = vpop.f32.mrf.mxu1  ;;  %v2770_v19 = vpop.f32.mrf.mxu0 }
 0x20f   : > { %2293 = vst.msk [vmem:[%s3561_s22 + $0x94] sm:$0xf] %vm2255_vm2, %v2643_v3  ;;  %v2047_v13 = vmax.f32 %v1964_v23, 0.0  ;;  %v3765_v3 = vld [vmem:[#allocation2_spill] sm:$0xff] }
 0x210   : > { %v1742_v36 = vpop.f32.mrf.mxu1  ;;  %v1966_v57 = vpop.f32.mrf.mxu0  ;;  %v1532_v23 = vadd.f32 %v3547_v31, %v3765_v3 }
 0x211   : > { %v2644_v12 = vpack.c.bf16 %v2047_v13, %v2047_v13  ;;  %v1967_v54 = vadd.f32 %v1966_v57, %v1735_v10  ;;  %v1743_v27 = vadd.f32 %v1742_v36, %v1511_v60 }
 0x212   : > { %v1744_v7 = vpop.f32.mrf.mxu1  ;;  %v2771_v30 = vpop.f32.mrf.mxu0 }
 0x213   : > { %2294 = vst.msk [vmem:[%s3561_s22 + $0x98] sm:$0xf] %vm2255_vm2, %v2644_v12  ;;  %v2048_v55 = vmax.f32 %v1967_v54, 0.0  ;;  %v3766_v12 = vld [vmem:[#allocation3_spill] sm:$0xff] }
 0x214   : > { %v1747_v26 = vpop.f32.mrf.mxu1  ;;  %v1971_v40 = vpop.f32.mrf.mxu0  ;;  %v1535_v54 = vadd.f32 %v3547_v31, %v3766_v12 }
 0x215   : > { %v2645_v41 = vpack.c.bf16 %v2048_v55, %v2048_v55  ;;  %v1972_v11 = vadd.f32 %v1971_v40, %v1740_v16  ;;  %v1748_v33 = vadd.f32 %v1747_v26, %v1516_v47 }
 0x216   : > { %v1749_v48 = vpop.f32.mrf.mxu1  ;;  %v2774_v28 = vpop.f32.mrf.mxu0 }
 0x217   : > { %2295 = vst.msk [vmem:[%s3561_s22 + $0x9c] sm:$0xf] %vm2255_vm2, %v2645_v41  ;;  %v2049_v14 = vmax.f32 %v1972_v11, 0.0  ;;  %v3767_v11 = vld [vmem:[#allocation4_spill] sm:$0xff] }
 0x218   : > { %v1750_v0 = vpop.f32.mrf.mxu1  ;;  %v1974_v61 = vpop.f32.mrf.mxu0  ;;  %v1540_v48 = vadd.f32 %v3547_v31, %v3767_v11 }
 0x219   : > { %v2646_v6 = vpack.c.bf16 %v2049_v14, %v2049_v14  ;;  %v1975_v46 = vadd.f32 %v1974_v61, %v1743_v27  ;;  %v1751_v44 = vadd.f32 %v1750_v0, %v1519_v1 }
 0x21a   : > { %v1752_v56 = vpop.f32.mrf.mxu1  ;;  %v2775_v5 = vpop.f32.mrf.mxu0 }
 0x21b   : > { %2296 = vst.msk [vmem:[%s3561_s22 + $0xa0] sm:$0xf] %vm2255_vm2, %v2646_v6  ;;  %v2050_v32 = vmax.f32 %v1975_v46, 0.0 }
 0x21c   : > { %v1755_v34 = vpop.f32.mrf.mxu1  ;;  %v1979_v17 = vpop.f32.mrf.mxu0 }
 0x21d   : > { %v2647_v51 = vpack.c.bf16 %v2050_v32, %v2050_v32  ;;  %v1980_v20 = vadd.f32 %v1979_v17, %v1748_v33  ;;  %v1756_v52 = vadd.f32 %v1755_v34, %v1524_v21 }
 0x21e   : > { %v1757_v53 = vpop.f32.mrf.mxu1  ;;  %v2778_v59 = vpop.f32.mrf.mxu0 }
 0x21f   : > { %2297 = vst.msk [vmem:[%s3561_s22 + $0xa4] sm:$0xf] %vm2255_vm2, %v2647_v51  ;;  %v2051_v22 = vmax.f32 %v1980_v20, 0.0 }
 0x220   : > { %v1758_v9 = vpop.f32.mrf.mxu1  ;;  %v1982_v2 = vpop.f32.mrf.mxu0 }
 0x221   : > { %v2648_v25 = vpack.c.bf16 %v2051_v22, %v2051_v22  ;;  %v1983_v58 = vadd.f32 %v1982_v2, %v1751_v44  ;;  %v1759_v63 = vadd.f32 %v1758_v9, %v1527_v24 }
 0x222   : > { %v1760_v35 = vpop.f32.mrf.mxu1  ;;  %v2779_v43 = vpop.f32.mrf.mxu0 }
 0x223   : > { %2298 = vst.msk [vmem:[%s3561_s22 + $0xa8] sm:$0xf] %vm2255_vm2, %v2648_v25  ;;  %v2052_v42 = vmax.f32 %v1983_v58, 0.0 }
 0x224   : > { %v1763_v50 = vpop.f32.mrf.mxu1  ;;  %v1987_v4 = vpop.f32.mrf.mxu0 }
 0x225   : > { %v2649_v38 = vpack.c.bf16 %v2052_v42, %v2052_v42  ;;  %v1988_v45 = vadd.f32 %v1987_v4, %v1756_v52  ;;  %v1764_v8 = vadd.f32 %v1763_v50, %v1532_v23 }
 0x226   : > { %v1765_v62 = vpop.f32.mrf.mxu1  ;;  %v2782_v29 = vpop.f32.mrf.mxu0 }
 0x227   : > { %2299 = vst.msk [vmem:[%s3561_s22 + $0xac] sm:$0xf] %vm2255_vm2, %v2649_v38  ;;  %v2053_v18 = vmax.f32 %v1988_v45, 0.0 }
 0x228   : > { %v1766_v37 = vpop.f32.mrf.mxu1  ;;  %v1990_v15 = vpop.f32.mrf.mxu0 }
 0x229   : > { %v2650_v49 = vpack.c.bf16 %v2053_v18, %v2053_v18  ;;  %v1991_v19 = vadd.f32 %v1990_v15, %v1759_v63  ;;  %v1767_v26 = vadd.f32 %v1766_v37, %v1535_v54 }
 0x22a   : > { %v1768_v10 = vpop.f32.mrf.mxu1  ;;  %v2783_v13 = vpop.f32.mrf.mxu0 }
 0x22b   : > { %2300 = vst.msk [vmem:[%s3561_s22 + $0xb0] sm:$0xf] %vm2255_vm2, %v2650_v49  ;;  %v2054_v36 = vmax.f32 %v1991_v19, 0.0 }
 0x22c   : > { %v1771_v57 = vpop.f32.mrf.mxu1  ;;  %v1995_v39 = vpop.f32.mrf.mxu0 }
 0x22d   : > { %v2651_v7 = vpack.c.bf16 %v2054_v36, %v2054_v36  ;;  %v1996_v30 = vadd.f32 %v1995_v39, %v1764_v8  ;;  %v1772_v61 = vadd.f32 %v1771_v57, %v1540_v48 }
 0x22e   : > { %v2786_v16 = vpop.f32.mrf.mxu0  ;;  %v1773_v55 = vpop.f32.mrf.mxu1 }
 0x22f   : > { %2301 = vst.msk [vmem:[%s3561_s22 + $0xb4] sm:$0xf] %vm2255_vm2, %v2651_v7  ;;  %v2055_v40 = vmax.f32 %v1996_v30, 0.0 }
 0x230   : > { %v1998_v60 = vpop.f32.mrf.mxu0  ;;  %v1774_v41 = vpop.f32.mrf.mxu1 }
 0x231   : > { %v2652_v28 = vpack.c.bf16 %v2055_v40, %v2055_v40  ;;  %v1999_v27 = vadd.f32 %v1998_v60, %v1767_v26 }
 0x232   : > { %v2787_v14 = vpop.f32.mrf.mxu0  ;;  %v1775_v0 = vpop.f32.mrf.mxu1 }
 0x233   : > { %2302 = vst.msk [vmem:[%s3561_s22 + $0xb8] sm:$0xf] %vm2255_vm2, %v2652_v28  ;;  %v2056_v47 = vmax.f32 %v1999_v27, 0.0 }
 0x234   : > { %v2003_v6 = vpop.f32.mrf.mxu0 }
 0x235   : > { %v2653_v46 = vpack.c.bf16 %v2056_v47, %v2056_v47  ;;  %v2004_v56 = vadd.f32 %v2003_v6, %v1772_v61 }
 0x236   : > { %v2790_v5 = vpop.f32.mrf.mxu0 }
 0x237   : > { %2303 = vst.msk [vmem:[%s3561_s22 + $0xbc] sm:$0xf] %vm2255_vm2, %v2653_v46  ;;  %v2057_v33 = vmax.f32 %v2004_v56, 0.0 }
 0x238   : > { %v2006_v32 = vpop.f32.mrf.mxu0 }
 0x239   : > { %v2654_v34 = vpack.c.bf16 %v2057_v33, %v2057_v33 }
 0x23a   : > { %v2791_v17 = vpop.f32.mrf.mxu0 }
 0x23b   : > { %2304 = vst.msk [vmem:[%s3561_s22 + $0xc0] sm:$0xf] %vm2255_vm2, %v2654_v34 }
 0x23c PF: > { %s13_s12 = sadd.s32 1, %s3051_s12  }
 0x23d   : > { %p10_p4 = scmp.ge.s32.totalorder %s13_s12, 6  }
 0x23f   :  { %12 = sbr.rel (!%p10_p4) target bundleno = 1 (0x1), region = 62 }

// kernel: _lambda_.5
= control target key start
LH: loop header
LB: loop body
LE: loop exit
PB: predicated region body
PF: predicated region fallthrough
CT: control target
= control target key end

     0   :  { %v11655_v21 = vmov 1966171168   ;;  %v1620_v23 = vlaneseq  ;;  %s14260_s1 = inlined_call_operand.vmem [shape: bf16[12544,128], index: 1, kind: input, shape index: {}]   ;;  %s14261_s0 = inlined_call_operand.vmem [shape: bf16[2,12544], index: 0, kind: input, shape index: {}]   ;;  %s14262_s2 = inlined_call_operand.vmem [shape: f32[1,128], index: 2, kind: input, shape index: {}]   ;;  %s14263_s3 = inlined_call_operand.vmem [shape: f32[2,128], index: 3, kind: output, shape index: {}]  }
   0x1   :  { %v10859_v0 = vld [vmem:[%s14260_s1 + $0x78] sm:$0xff]   ;;  %v10863_v4 = vld [vmem:[%s14260_s1 + $0x70] sm:$0xff]   ;;  %v10867_v8 = vld [vmem:[%s14260_s1 + $0x68] sm:$0xff]   ;;  %v1618_v22 = vunpack.c.l.s4 %v11655_v21 }
   0x2   :  { %v10860_v1 = vld [vmem:[%s14260_s1 + $0x38] sm:$0xff]   ;;  %9780 = vmatprep.subr.bf16.mxu0 %v10859_v0  ;;  %v10864_v5 = vld [vmem:[%s14260_s1 + $0x30] sm:$0xff]   ;;  %v10868_v9 = vld [vmem:[%s14260_s1 + $0x28] sm:$0xff]   ;;  %v1621_v29 = vshrl.u32 %v1620_v23, 7 }
   0x3   :  { %v10861_v2 = vld [vmem:[%s14260_s1 + $0xf8] sm:$0xff]   ;;  %9781 = vmatpush3.bf16.msra.mxu0 %v10860_v1  ;;  %v10865_v6 = vld [vmem:[%s14260_s1 + $0xf0] sm:$0xff]   ;;  %v10869_v10 = vld [vmem:[%s14260_s1 + $0xe8] sm:$0xff]   ;;  %v1619_v28 = vunpack.c.0.s8 %v1618_v22 }
   0x4   :  { %v10862_v3 = vld [vmem:[%s14260_s1 + $0xb8] sm:$0xff]   ;;  %9802 = vmatprep.subr.bf16.mxu1 %v10861_v2  ;;  %9782 = vmatprep.subr.bf16.mxu0 %v10863_v4  ;;  %v10866_v7 = vld [vmem:[%s14260_s1 + $0xb0] sm:$0xff]   ;;  %v10870_v11 = vld [vmem:[%s14260_s1 + $0xa8] sm:$0xff]  }
   0x5   :  { %9803 = vmatpush3.bf16.msra.mxu1 %v10862_v3  ;;  %v10871_v12 = vld [vmem:[%s14260_s1 + $0x60] sm:$0xff]   ;;  %v10875_v16 = vld [vmem:[%s14260_s1 + $0x58] sm:$0xff]   ;;  %v10879_v20 = vld [vmem:[%s14260_s1 + $0x50] sm:$0xff]   ;;  %v11763_v34 = vsub.s32 %v1619_v28, %v1621_v29 }
   0x6   :  { %9804 = vmatprep.subr.bf16.mxu1 %v10865_v6  ;;  %v10872_v13 = vld [vmem:[%s14260_s1 + $0x20] sm:$0xff]   ;;  %v10876_v17 = vld [vmem:[%s14260_s1 + $0x18] sm:$0xff]   ;;  %v10880_v24 = vld [vmem:[%s14260_s1 + $0x10] sm:$0xff]  }
   0x7   :  { %9783 = vmatpush3.bf16.msra.mxu0 %v10864_v5  ;;  %v10873_v14 = vld [vmem:[%s14260_s1 + $0xe0] sm:$0xff]   ;;  %v10877_v18 = vld [vmem:[%s14260_s1 + $0xd8] sm:$0xff]   ;;  %v10881_v25 = vld [vmem:[%s14260_s1 + $0xd0] sm:$0xff]  }
   0x8   :  { %9784 = vmatprep.subr.bf16.mxu0 %v10867_v8  ;;  %v10874_v15 = vld [vmem:[%s14260_s1 + $0xa0] sm:$0xff]   ;;  %v10878_v19 = vld [vmem:[%s14260_s1 + $0x98] sm:$0xff]   ;;  %v10882_v26 = vld [vmem:[%s14260_s1 + $0x90] sm:$0xff]  }
   0x9   :  { %9805 = vmatpush3.bf16.msra.mxu1 %v10866_v7  ;;  %v10883_v27 = vld [vmem:[%s14260_s1 + $0x48] sm:$0xff]   ;;  %v10887_v33 = vld [vmem:[%s14260_s1 + $0x40] sm:$0xff]   ;;  %v10892_v41 = vld [vmem:[%s14260_s1 + $0x178] sm:$0xff]  }
   0xa   :  { %9806 = vmatprep.subr.bf16.mxu1 %v10869_v10  ;;  %v10884_v30 = vld [vmem:[%s14260_s1 + $0x8] sm:$0xff]   ;;  %v10888_v35 = vld [vmem:[%s14260_s1] sm:$0xff]   ;;  %v10893_v44 = vld [vmem:[%s14260_s1 + $0x138] sm:$0xff]  }
   0xb   :  { %9785 = vmatpush3.bf16.msra.mxu0 %v10868_v9  ;;  %v10885_v31 = vld [vmem:[%s14260_s1 + $0xc8] sm:$0xff]   ;;  %v10889_v36 = vld [vmem:[%s14260_s1 + $0xc0] sm:$0xff]   ;;  %v10894_v46 = vld [vmem:[%s14260_s1 + $0x1f8] sm:$0xff]  }
   0xc   :  { %9786 = vmatprep.subr.bf16.mxu0 %v10871_v12  ;;  %v10886_v32 = vld [vmem:[%s14260_s1 + $0x88] sm:$0xff]   ;;  %v15_v37 = vld [vmem:[%s14261_s0] sm:$0xff]  ;;  %v10895_v48 = vld [vmem:[%s14260_s1 + $0x1b8] sm:$0xff]  }
   0xd   :  { %9807 = vmatpush3.bf16.msra.mxu1 %v10870_v11  ;;  %v1616_v38 = vcombine.high %v15_v37, %v15_v37  ;;  %v1623_v39 = vrot.slane %v15_v37, %v11763_v34  ;;  %v10891_v40 = vld [vmem:[%s14260_s1 + $0x80] sm:$0xff]   ;;  %v10896_v51 = vld [vmem:[%s14260_s1 + $0x170] sm:$0xff]   ;;  %v10900_v58 = vld [vmem:[%s14260_s1 + $0x168] sm:$0xff]  }
   0xe   :  { %9808 = vmatprep.subr.bf16.mxu1 %v10873_v14  ;;  %v10897_v53 = vld [vmem:[%s14260_s1 + $0x130] sm:$0xff]   ;;  %v10901_v59 = vld [vmem:[%s14260_s1 + $0x128] sm:$0xff]   ;;  %v10904_v62 = vld [vmem:[%s14260_s1 + $0x160] sm:$0xff]  }
   0xf   :  { %9787 = vmatpush3.bf16.msra.mxu0 %v10872_v13  ;;  %v1631_v42 = vcombine.high %v1623_v39, %v1623_v39  ;;  %v1639_v43 = vrot.slane %v1623_v39, %v11763_v34  ;;  %v11786_v45 = vrot.slane %v1616_v38, %v11763_v34  ;;  %v10898_v55 = vld [vmem:[%s14260_s1 + $0x1f0] sm:$0xff]   ;;  %v10902_v60 = vld [vmem:[%s14260_s1 + $0x1e8] sm:$0xff]   ;;  %v10905_v63 = vld [vmem:[%s14260_s1 + $0x120] sm:$0xff]  }
  0x10   :  { %9788 = vmatprep.subr.bf16.mxu0 %v10875_v16  ;;  %v10899_v56 = vld [vmem:[%s14260_s1 + $0x1b0] sm:$0xff]   ;;  %v10903_v61 = vld [vmem:[%s14260_s1 + $0x1a8] sm:$0xff]   ;;  %v10906_v0 = vld [vmem:[%s14260_s1 + $0x1e0] sm:$0xff]  }
  0x11   :  { %9809 = vmatpush3.bf16.msra.mxu1 %v10874_v15  ;;  %v1653_v47 = vrot.slane %v1631_v42, %v11763_v34  ;;  %v1632_v49 = vcombine.high %v11786_v45, %v11786_v45  ;;  %v1661_v50 = vcombine.high %v1639_v43, %v1639_v43  ;;  %v10907_v1 = vld [vmem:[%s14260_s1 + $0x1a0] sm:$0xff]   ;;  %v10908_v2 = vld [vmem:[%s14260_s1 + $0x158] sm:$0xff]   ;;  %v10912_v6 = vld [vmem:[%s14260_s1 + $0x150] sm:$0xff]  }
  0x12   :  { %9810 = vmatprep.subr.bf16.mxu1 %v10877_v18  ;;  %v10909_v3 = vld [vmem:[%s14260_s1 + $0x118] sm:$0xff]   ;;  %v10913_v7 = vld [vmem:[%s14260_s1 + $0x110] sm:$0xff]   ;;  %v10916_v10 = vld [vmem:[%s14260_s1 + $0x148] sm:$0xff]   ;;  %v1646_v18 = vrot.slane %v11786_v45, %v11763_v34 }
  0x13   :  { %9789 = vmatpush3.bf16.msra.mxu0 %v10876_v17  ;;  %7060 = vmatprep.mubr.bf16.mxu0 %v1653_v47  ;;  %v1663_v52 = vcombine.high %v1653_v47, %v1653_v47  ;;  %v1660_v54 = vrot.slane %v1632_v49, %v11763_v34  ;;  %v10910_v4 = vld [vmem:[%s14260_s1 + $0x1d8] sm:$0xff]   ;;  %v10914_v8 = vld [vmem:[%s14260_s1 + $0x1d0] sm:$0xff]   ;;  %v10917_v11 = vld [vmem:[%s14260_s1 + $0x108] sm:$0xff]  }
  0x14   :  { %9790 = vmatprep.subr.bf16.mxu0 %v10879_v20  ;;  %v10911_v5 = vld [vmem:[%s14260_s1 + $0x198] sm:$0xff]   ;;  %v10915_v9 = vld [vmem:[%s14260_s1 + $0x190] sm:$0xff]   ;;  %v10918_v12 = vld [vmem:[%s14260_s1 + $0x1c8] sm:$0xff]   ;;  %v1662_v23 = vcombine.high %v1646_v18, %v1646_v18 }
  0x15   :  { %9811 = vmatpush3.bf16.msra.mxu1 %v10878_v19  ;;  %7100 = vmatprep.mubr.bf16.mxu1 %v1663_v52  ;;  %v1664_v57 = vcombine.high %v1660_v54, %v1660_v54  ;;  %v10919_v13 = vld [vmem:[%s14260_s1 + $0x188] sm:$0xff]   ;;  %v10920_v14 = vld [vmem:[%s14260_s1 + $0x140] sm:$0xff]   ;;  %v10924_v19 = vld [vmem:[%s14260_s1 + $0x278] sm:$0xff]  }
  0x16   :  { %9812 = vmatprep.subr.bf16.mxu1 %v10881_v25  ;;  %v10921_v15 = vld [vmem:[%s14260_s1 + $0x100] sm:$0xff]   ;;  %v10925_v20 = vld [vmem:[%s14260_s1 + $0x238] sm:$0xff]   ;;  %v10929_v25 = vld [vmem:[%s14260_s1 + $0x230] sm:$0xff]  }
  0x17   :  { %9791 = vmatpush3.bf16.msra.mxu0 %v10880_v24  ;;  %v10922_v16 = vld [vmem:[%s14260_s1 + $0x1c0] sm:$0xff]   ;;  %v10926_v21 = vld [vmem:[%s14260_s1 + $0x2f8] sm:$0xff]   ;;  %v10928_v24 = vld [vmem:[%s14260_s1 + $0x270] sm:$0xff]  }
  0x18   :  { %9792 = vmatprep.subr.bf16.mxu0 %v10883_v27  ;;  %v10923_v17 = vld [vmem:[%s14260_s1 + $0x180] sm:$0xff]   ;;  %v10927_v22 = vld [vmem:[%s14260_s1 + $0x2b8] sm:$0xff]   ;;  %v10931_v27 = vld [vmem:[%s14260_s1 + $0x2b0] sm:$0xff]  }
  0x19   :  { %9813 = vmatpush3.bf16.msra.mxu1 %v10882_v26  ;;  %v10930_v26 = vld [vmem:[%s14260_s1 + $0x2f0] sm:$0xff]   ;;  %v10932_v28 = vld [vmem:[%s14260_s1 + $0x268] sm:$0xff]   ;;  %v10940_v37 = vld [vmem:[%s14260_s1 + $0x258] sm:$0xff]  }
  0x1a   :  { %9814 = vmatprep.subr.bf16.mxu1 %v10885_v31  ;;  %v10933_v29 = vld [vmem:[%s14260_s1 + $0x228] sm:$0xff]   ;;  %v10941_v38 = vld [vmem:[%s14260_s1 + $0x218] sm:$0xff]   ;;  %v10945_v42 = vld [vmem:[%s14260_s1 + $0x210] sm:$0xff]  }
  0x1b   :  { %9793 = vmatpush3.bf16.msra.mxu0 %v10884_v30  ;;  %v10934_v30 = vld [vmem:[%s14260_s1 + $0x2e8] sm:$0xff]   ;;  %v10942_v39 = vld [vmem:[%s14260_s1 + $0x2d8] sm:$0xff]   ;;  %v10952_v49 = vld [vmem:[%s14260_s1 + $0x240] sm:$0xff]  }
  0x1c   :  { %9794 = vmatprep.subr.bf16.mxu0 %v10887_v33  ;;  %v10935_v31 = vld [vmem:[%s14260_s1 + $0x2a8] sm:$0xff]   ;;  %v10937_v33 = vld [vmem:[%s14260_s1 + $0x220] sm:$0xff]  }
  0x1d   :  { %9815 = vmatpush3.bf16.msra.mxu1 %v10886_v32  ;;  %v10936_v32 = vld [vmem:[%s14260_s1 + $0x260] sm:$0xff]   ;;  %v10948_v45 = vld [vmem:[%s14260_s1 + $0x248] sm:$0xff]  }
  0x1e   :  { %9816 = vmatprep.subr.bf16.mxu1 %v10889_v36  ;;  %v10939_v36 = vld [vmem:[%s14260_s1 + $0x2a0] sm:$0xff]   ;;  %v10950_v47 = vld [vmem:[%s14260_s1 + $0x2c8] sm:$0xff]  }
  0x1f   :  { %9795 = vmatpush3.bf16.msra.mxu0 %v10888_v35  ;;  %v10938_v35 = vld [vmem:[%s14260_s1 + $0x2e0] sm:$0xff]   ;;  %v16_v52 = vld [vmem:[%s14261_s0 + $0x8] sm:$0xff] }
  0x20   :  { %9824 = vmatprep.subr.bf16.mxu0 %v10892_v41  ;;  %v10944_v41 = vld [vmem:[%s14260_s1 + $0x250] sm:$0xff]  }
  0x21   :  { %9817 = vmatpush3.bf16.msra.mxu1 %v10891_v40  ;;  %v10943_v40 = vld [vmem:[%s14260_s1 + $0x298] sm:$0xff]  }
  0x22   :  { %9846 = vmatprep.subr.bf16.mxu1 %v10894_v46  ;;  %7061 = vmatmul.mubr.bf16.vlgmr.msra.gmra.mxu0 %v1639_v43  ;;  %v10946_v43 = vld [vmem:[%s14260_s1 + $0x2d0] sm:$0xff]   ;;  %v10949_v46 = vld [vmem:[%s14260_s1 + $0x208] sm:$0xff]  }
  0x23   :  { %9825 = vmatpush3.bf16.msra.mxu0 %v10893_v44  ;;  %7140 = vmatprep.mubr.bf16.mxu0 %v1660_v54  ;;  %v10947_v44 = vld [vmem:[%s14260_s1 + $0x290] sm:$0xff]   ;;  %v10955_v54 = vld [vmem:[%s14260_s1 + $0x280] sm:$0xff]  }
  0x24   :  { %7101 = vmatmul.mubr.bf16.vlgmr.msra.gmra.mxu1 %v1661_v50  ;;  %9826 = vmatprep.subr.bf16.mxu0 %v10896_v51  ;;  %v10953_v50 = vld [vmem:[%s14260_s1 + $0x200] sm:$0xff]  }
  0x25   :  { %9847 = vmatpush3.bf16.msra.mxu1 %v10895_v48  ;;  %7180 = vmatprep.mubr.bf16.mxu1 %v1664_v57  ;;  %v10951_v48 = vld [vmem:[%s14260_s1 + $0x288] sm:$0xff]   ;;  %v10954_v51 = vld [vmem:[%s14260_s1 + $0x2c0] sm:$0xff]  }
  0x26   :  { %9848 = vmatprep.subr.bf16.mxu1 %v10898_v55  ;;  %v1665_v55 = vcombine.high %v16_v52, %v16_v52 }
  0x27   :  { %9827 = vmatpush3.bf16.msra.mxu0 %v10897_v53  ;;  %v1672_v53 = vrot.slane %v16_v52, %v11763_v34  ;;  %v11005_v52 = vld [vmem:[%s14260_s1 + $0x458] sm:$0xff]  }
  0x28   :  { %9828 = vmatprep.subr.bf16.mxu0 %v10900_v58 }
  0x29   :  { %9849 = vmatpush3.bf16.msra.mxu1 %v10899_v56  ;;  %v10956_v56 = vld [vmem:[%s14260_s1 + $0x378] sm:$0xff]   ;;  %v1680_v57 = vcombine.high %v1672_v53, %v1672_v53  ;;  %v1688_v58 = vrot.slane %v1672_v53, %v11763_v34 }
  0x2a   :  { %9850 = vmatprep.subr.bf16.mxu1 %v10902_v60  ;;  %v11992_v60 = vrot.slane %v1665_v55, %v11763_v34  ;;  %v11006_v53 = vld [vmem:[%s14260_s1 + $0x418] sm:$0xff]  }
  0x2b   :  { %9829 = vmatpush3.bf16.msra.mxu0 %v10901_v59  ;;  %v10957_v59 = vld [vmem:[%s14260_s1 + $0x338] sm:$0xff]  }
  0x2c   :  { %9830 = vmatprep.subr.bf16.mxu0 %v10904_v62  ;;  %v1702_v62 = vrot.slane %v1680_v57, %v11763_v34  ;;  %v11008_v55 = vld [vmem:[%s14260_s1 + $0x498] sm:$0xff]   ;;  %v11010_v57 = vld [vmem:[%s14260_s1 + $0x410] sm:$0xff]  }
  0x2d   :  { %9851 = vmatpush3.bf16.msra.mxu1 %v10903_v61  ;;  %v10958_v61 = vld [vmem:[%s14260_s1 + $0x3f8] sm:$0xff]  }
  0x2e   :  { %9852 = vmatprep.subr.bf16.mxu1 %v10906_v0  ;;  %v1681_v0 = vcombine.high %v11992_v60, %v11992_v60 }
  0x2f   :  { %9831 = vmatpush3.bf16.msra.mxu0 %v10905_v63  ;;  %v10959_v63 = vld [vmem:[%s14260_s1 + $0x3b8] sm:$0xff]  }
  0x30   :  { %9832 = vmatprep.subr.bf16.mxu0 %v10908_v2  ;;  %v10960_v2 = vld [vmem:[%s14260_s1 + $0x370] sm:$0xff]  }
  0x31   :  { %9853 = vmatpush3.bf16.msra.mxu1 %v10907_v1  ;;  %v1710_v1 = vcombine.high %v1688_v58, %v1688_v58 }
  0x32   :  { %9854 = vmatprep.subr.bf16.mxu1 %v10910_v4  ;;  %v10961_v4 = vld [vmem:[%s14260_s1 + $0x330] sm:$0xff]  }
  0x33   :  { %9833 = vmatpush3.bf16.msra.mxu0 %v10909_v3  ;;  %v1712_v3 = vcombine.high %v1702_v62, %v1702_v62 }
  0x34   :  { %9834 = vmatprep.subr.bf16.mxu0 %v10912_v6  ;;  %v10962_v6 = vld [vmem:[%s14260_s1 + $0x3f0] sm:$0xff]  }
  0x35   :  { %9855 = vmatpush3.bf16.msra.mxu1 %v10911_v5  ;;  %v1709_v5 = vrot.slane %v1681_v0, %v11763_v34  ;;  %v11017_v0 = vld [vmem:[%s14260_s1 + $0x440] sm:$0xff]  }
  0x36   :  { %9856 = vmatprep.subr.bf16.mxu1 %v10914_v8 }
  0x37   :  { %9835 = vmatpush3.bf16.msra.mxu0 %v10913_v7  ;;  %v10963_v7 = vld [vmem:[%s14260_s1 + $0x3b0] sm:$0xff]   ;;  %v1713_v8 = vcombine.high %v1709_v5, %v1709_v5 }
  0x38   :  { %9836 = vmatprep.subr.bf16.mxu0 %v10916_v10  ;;  %v10965_v10 = vld [vmem:[%s14260_s1 + $0x328] sm:$0xff]  }
  0x39   :  { %9857 = vmatpush3.bf16.msra.mxu1 %v10915_v9  ;;  %v10964_v9 = vld [vmem:[%s14260_s1 + $0x368] sm:$0xff]  }
  0x3a   :  { %9858 = vmatprep.subr.bf16.mxu1 %v10918_v12  ;;  %v10967_v12 = vld [vmem:[%s14260_s1 + $0x3a8] sm:$0xff]  }
  0x3b   :  { %9837 = vmatpush3.bf16.msra.mxu0 %v10917_v11  ;;  %v10966_v11 = vld [vmem:[%s14260_s1 + $0x3e8] sm:$0xff]  }
  0x3c   :  { %9838 = vmatprep.subr.bf16.mxu0 %v10920_v14  ;;  %v10969_v14 = vld [vmem:[%s14260_s1 + $0x320] sm:$0xff]  }
  0x3d   :  { %9859 = vmatpush3.bf16.msra.mxu1 %v10919_v13  ;;  %v10968_v13 = vld [vmem:[%s14260_s1 + $0x360] sm:$0xff]  }
  0x3e   :  { %9860 = vmatprep.subr.bf16.mxu1 %v10922_v16  ;;  %v10971_v16 = vld [vmem:[%s14260_s1 + $0x3a0] sm:$0xff]  }
  0x3f   :  { %9839 = vmatpush3.bf16.msra.mxu0 %v10921_v15  ;;  %v10970_v15 = vld [vmem:[%s14260_s1 + $0x3e0] sm:$0xff]  }
  0x40   :  { %9868 = vmatprep.subr.bf16.mxu0 %v10924_v19  ;;  %v10974_v19 = vld [vmem:[%s14260_s1 + $0x3d8] sm:$0xff]  }
  0x41   :  { %9861 = vmatpush3.bf16.msra.mxu1 %v10923_v17  ;;  %v10972_v17 = vld [vmem:[%s14260_s1 + $0x358] sm:$0xff]  }
  0x42   :  { %7141 = vmatmul.mubr.bf16.vlgmr.msra.gmra.mxu0 %v1646_v18  ;;  %9890 = vmatprep.subr.bf16.mxu1 %v10926_v21  ;;  %v10973_v18 = vld [vmem:[%s14260_s1 + $0x318] sm:$0xff]   ;;  %v10976_v21 = vld [vmem:[%s14260_s1 + $0x350] sm:$0xff]  }
  0x43   :  { %9869 = vmatpush3.bf16.msra.mxu0 %v10925_v20  ;;  %7220 = vmatprep.mubr.bf16.mxu0 %v1702_v62  ;;  %v10975_v20 = vld [vmem:[%s14260_s1 + $0x398] sm:$0xff]   ;;  %v11015_v62 = vld [vmem:[%s14260_s1 + $0x4c8] sm:$0xff]  }
  0x44   :  { %7181 = vmatmul.mubr.bf16.vlgmr.msra.gmra.mxu1 %v1662_v23  ;;  %9870 = vmatprep.subr.bf16.mxu0 %v10928_v24  ;;  %v10978_v23 = vld [vmem:[%s14260_s1 + $0x3d0] sm:$0xff]  }
  0x45   :  { %9891 = vmatpush3.bf16.msra.mxu1 %v10927_v22  ;;  %7260 = vmatprep.mubr.bf16.mxu1 %v1712_v3  ;;  %v10977_v22 = vld [vmem:[%s14260_s1 + $0x310] sm:$0xff]  }
  0x46   :  { %9892 = vmatprep.subr.bf16.mxu1 %v10930_v26  ;;  %v10979_v24 = vld [vmem:[%s14260_s1 + $0x390] sm:$0xff]   ;;  %v10981_v26 = vld [vmem:[%s14260_s1 + $0x308] sm:$0xff]  }
  0x47   :  { %9871 = vmatpush3.bf16.msra.mxu0 %v10929_v25  ;;  %v10980_v25 = vld [vmem:[%s14260_s1 + $0x348] sm:$0xff]   ;;  %v17_v3 = vld [vmem:[%s14261_s0 + $0x10] sm:$0xff] }
  0x48   :  { %9872 = vmatprep.subr.bf16.mxu0 %v10932_v28  ;;  %v10983_v28 = vld [vmem:[%s14260_s1 + $0x388] sm:$0xff]  }
  0x49   :  { %9893 = vmatpush3.bf16.msra.mxu1 %v10931_v27  ;;  %v10982_v27 = vld [vmem:[%s14260_s1 + $0x3c8] sm:$0xff]  }
  0x4a   :  { %9894 = vmatprep.subr.bf16.mxu1 %v10934_v30  ;;  %v10985_v30 = vld [vmem:[%s14260_s1 + $0x300] sm:$0xff]  }
  0x4b   :  { %9873 = vmatpush3.bf16.msra.mxu0 %v10933_v29  ;;  %v10984_v29 = vld [vmem:[%s14260_s1 + $0x340] sm:$0xff]  }
  0x4c   :  { %9874 = vmatprep.subr.bf16.mxu0 %v10936_v32  ;;  %v10988_v32 = vld [vmem:[%s14260_s1 + $0x380] sm:$0xff]  }
  0x4d   :  { %9895 = vmatpush3.bf16.msra.mxu1 %v10935_v31  ;;  %v10986_v31 = vld [vmem:[%s14260_s1 + $0x3c0] sm:$0xff]  }
  0x4e   :  { %9896 = vmatprep.subr.bf16.mxu1 %v10938_v35  ;;  %v10989_v35 = vld [vmem:[%s14260_s1 + $0x478] sm:$0xff]  }
  0x4f   :  { %9875 = vmatpush3.bf16.msra.mxu0 %v10937_v33  ;;  %v1695_v33 = vrot.slane %v11992_v60, %v11763_v34  ;;  %v11013_v60 = vld [vmem:[%s14260_s1 + $0x448] sm:$0xff]  }
  0x50   :  { %9876 = vmatprep.subr.bf16.mxu0 %v10940_v37  ;;  %v10991_v37 = vld [vmem:[%s14260_s1 + $0x4f8] sm:$0xff]  }
  0x51   :  { %9897 = vmatpush3.bf16.msra.mxu1 %v10939_v36  ;;  %v10990_v36 = vld [vmem:[%s14260_s1 + $0x438] sm:$0xff]  }
  0x52   :  { %9898 = vmatprep.subr.bf16.mxu1 %v10942_v39  ;;  %v1711_v39 = vcombine.high %v1695_v33, %v1695_v33 }
  0x53   :  { %9877 = vmatpush3.bf16.msra.mxu0 %v10941_v38  ;;  %v10992_v38 = vld [vmem:[%s14260_s1 + $0x4b8] sm:$0xff]  }
  0x54   :  { %9878 = vmatprep.subr.bf16.mxu0 %v10944_v41  ;;  %v10994_v41 = vld [vmem:[%s14260_s1 + $0x430] sm:$0xff]  }
  0x55   :  { %9899 = vmatpush3.bf16.msra.mxu1 %v10943_v40  ;;  %v10993_v40 = vld [vmem:[%s14260_s1 + $0x470] sm:$0xff]  }
  0x56   :  { %9900 = vmatprep.subr.bf16.mxu1 %v10946_v43  ;;  %v10996_v43 = vld [vmem:[%s14260_s1 + $0x4b0] sm:$0xff]  }
  0x57   :  { %9879 = vmatpush3.bf16.msra.mxu0 %v10945_v42  ;;  %v10995_v42 = vld [vmem:[%s14260_s1 + $0x4f0] sm:$0xff]  }
  0x58   :  { %9880 = vmatprep.subr.bf16.mxu0 %v10948_v45  ;;  %v10998_v45 = vld [vmem:[%s14260_s1 + $0x428] sm:$0xff]  }
  0x59   :  { %9901 = vmatpush3.bf16.msra.mxu1 %v10947_v44  ;;  %v10997_v44 = vld [vmem:[%s14260_s1 + $0x468] sm:$0xff]  }
  0x5a   :  { %9902 = vmatprep.subr.bf16.mxu1 %v10950_v47  ;;  %v11000_v47 = vld [vmem:[%s14260_s1 + $0x4a8] sm:$0xff]  }
  0x5b   :  { %9881 = vmatpush3.bf16.msra.mxu0 %v10949_v46  ;;  %v10999_v46 = vld [vmem:[%s14260_s1 + $0x4e8] sm:$0xff]  }
  0x5c   :  { %9882 = vmatprep.subr.bf16.mxu0 %v10952_v49  ;;  %v11002_v49 = vld [vmem:[%s14260_s1 + $0x420] sm:$0xff]  }
  0x5d   :  { %9903 = vmatpush3.bf16.msra.mxu1 %v10951_v48  ;;  %v11001_v48 = vld [vmem:[%s14260_s1 + $0x460] sm:$0xff]  }
  0x5e   :  { %9904 = vmatprep.subr.bf16.mxu1 %v10954_v51  ;;  %v11004_v51 = vld [vmem:[%s14260_s1 + $0x4a0] sm:$0xff]  }
  0x5f   :  { %9883 = vmatpush3.bf16.msra.mxu0 %v10953_v50  ;;  %v11003_v50 = vld [vmem:[%s14260_s1 + $0x4e0] sm:$0xff]  }
  0x60   :  { %9912 = vmatprep.subr.bf16.mxu0 %v10956_v56  ;;  %v11009_v56 = vld [vmem:[%s14260_s1 + $0x450] sm:$0xff]  }
  0x61   :  { %9905 = vmatpush3.bf16.msra.mxu1 %v10955_v54  ;;  %v11007_v54 = vld [vmem:[%s14260_s1 + $0x4d8] sm:$0xff]  }
  0x62   :  { %7221 = vmatmul.mubr.bf16.vlgmr.msra.gmra.mxu0 %v1688_v58  ;;  %9934 = vmatprep.subr.bf16.mxu1 %v10958_v61  ;;  %v11011_v58 = vld [vmem:[%s14260_s1 + $0x4d0] sm:$0xff]   ;;  %v11014_v61 = vld [vmem:[%s14260_s1 + $0x408] sm:$0xff]  }
  0x63   :  { %9913 = vmatpush3.bf16.msra.mxu0 %v10957_v59  ;;  %7300 = vmatprep.mubr.bf16.mxu0 %v1709_v5  ;;  %v11012_v59 = vld [vmem:[%s14260_s1 + $0x490] sm:$0xff]   ;;  %v11020_v5 = vld [vmem:[%s14260_s1 + $0x480] sm:$0xff]  }
  0x64   :  { %7261 = vmatmul.mubr.bf16.vlgmr.msra.gmra.mxu1 %v1710_v1  ;;  %9914 = vmatprep.subr.bf16.mxu0 %v10960_v2  ;;  %v11018_v1 = vld [vmem:[%s14260_s1 + $0x400] sm:$0xff]  }
  0x65   :  { %9935 = vmatpush3.bf16.msra.mxu1 %v10959_v63  ;;  %7340 = vmatprep.mubr.bf16.mxu1 %v1713_v8  ;;  %v11016_v63 = vld [vmem:[%s14260_s1 + $0x488] sm:$0xff]   ;;  %v11019_v2 = vld [vmem:[%s14260_s1 + $0x4c0] sm:$0xff]  }
  0x66   :  { %9936 = vmatprep.subr.bf16.mxu1 %v10962_v6  ;;  %v1714_v6 = vcombine.high %v17_v3, %v17_v3 }
  0x67   :  { %9915 = vmatpush3.bf16.msra.mxu0 %v10961_v4  ;;  %v1721_v4 = vrot.slane %v17_v3, %v11763_v34  ;;  %v11070_v3 = vld [vmem:[%s14260_s1 + $0x658] sm:$0xff]  }
  0x68   :  { %9916 = vmatprep.subr.bf16.mxu0 %v10964_v9 }
  0x69   :  { %9937 = vmatpush3.bf16.msra.mxu1 %v10963_v7  ;;  %v11021_v7 = vld [vmem:[%s14260_s1 + $0x578] sm:$0xff]   ;;  %v1729_v8 = vcombine.high %v1721_v4, %v1721_v4  ;;  %v1737_v9 = vrot.slane %v1721_v4, %v11763_v34 }
  0x6a   :  { %9938 = vmatprep.subr.bf16.mxu1 %v10966_v11  ;;  %v12198_v11 = vrot.slane %v1714_v6, %v11763_v34  ;;  %v11071_v4 = vld [vmem:[%s14260_s1 + $0x618] sm:$0xff]  }
  0x6b   :  { %9917 = vmatpush3.bf16.msra.mxu0 %v10965_v10  ;;  %v11022_v10 = vld [vmem:[%s14260_s1 + $0x538] sm:$0xff]  }
  0x6c   :  { %9918 = vmatprep.subr.bf16.mxu0 %v10968_v13  ;;  %v1751_v13 = vrot.slane %v1729_v8, %v11763_v34  ;;  %v11073_v6 = vld [vmem:[%s14260_s1 + $0x698] sm:$0xff]   ;;  %v11075_v8 = vld [vmem:[%s14260_s1 + $0x610] sm:$0xff]  }
  0x6d   :  { %9939 = vmatpush3.bf16.msra.mxu1 %v10967_v12  ;;  %v11023_v12 = vld [vmem:[%s14260_s1 + $0x5f8] sm:$0xff]  }
  0x6e   :  { %9940 = vmatprep.subr.bf16.mxu1 %v10970_v15  ;;  %v1730_v15 = vcombine.high %v12198_v11, %v12198_v11 }
  0x6f   :  { %9919 = vmatpush3.bf16.msra.mxu0 %v10969_v14  ;;  %v11024_v14 = vld [vmem:[%s14260_s1 + $0x5b8] sm:$0xff]  }
  0x70   :  { %9920 = vmatprep.subr.bf16.mxu0 %v10972_v17  ;;  %v11025_v17 = vld [vmem:[%s14260_s1 + $0x570] sm:$0xff]  }
  0x71   :  { %9941 = vmatpush3.bf16.msra.mxu1 %v10971_v16  ;;  %v1759_v16 = vcombine.high %v1737_v9, %v1737_v9 }
  0x72   :  { %9942 = vmatprep.subr.bf16.mxu1 %v10974_v19  ;;  %v11026_v19 = vld [vmem:[%s14260_s1 + $0x530] sm:$0xff]  }
  0x73   :  { %9921 = vmatpush3.bf16.msra.mxu0 %v10973_v18  ;;  %v1761_v18 = vcombine.high %v1751_v13, %v1751_v13 }
  0x74   :  { %9922 = vmatprep.subr.bf16.mxu0 %v10976_v21  ;;  %v11027_v21 = vld [vmem:[%s14260_s1 + $0x5f0] sm:$0xff]  }
  0x75   :  { %9943 = vmatpush3.bf16.msra.mxu1 %v10975_v20  ;;  %v1758_v20 = vrot.slane %v1730_v15, %v11763_v34  ;;  %v11082_v15 = vld [vmem:[%s14260_s1 + $0x640] sm:$0xff]  }
  0x76   :  { %9944 = vmatprep.subr.bf16.mxu1 %v10978_v23 }
  0x77   :  { %9923 = vmatpush3.bf16.msra.mxu0 %v10977_v22  ;;  %v11028_v22 = vld [vmem:[%s14260_s1 + $0x5b0] sm:$0xff]   ;;  %v1762_v23 = vcombine.high %v1758_v20, %v1758_v20 }
  0x78   :  { %9924 = vmatprep.subr.bf16.mxu0 %v10980_v25  ;;  %v11030_v25 = vld [vmem:[%s14260_s1 + $0x528] sm:$0xff]  }
  0x79   :  { %9945 = vmatpush3.bf16.msra.mxu1 %v10979_v24  ;;  %v11029_v24 = vld [vmem:[%s14260_s1 + $0x568] sm:$0xff]  }
  0x7a   :  { %9946 = vmatprep.subr.bf16.mxu1 %v10982_v27  ;;  %v11032_v27 = vld [vmem:[%s14260_s1 + $0x5a8] sm:$0xff]  }
  0x7b   :  { %9925 = vmatpush3.bf16.msra.mxu0 %v10981_v26  ;;  %v11031_v26 = vld [vmem:[%s14260_s1 + $0x5e8] sm:$0xff]  }
  0x7c   :  { %9926 = vmatprep.subr.bf16.mxu0 %v10984_v29  ;;  %v11034_v29 = vld [vmem:[%s14260_s1 + $0x520] sm:$0xff]  }
  0x7d   :  { %9947 = vmatpush3.bf16.msra.mxu1 %v10983_v28  ;;  %v11033_v28 = vld [vmem:[%s14260_s1 + $0x560] sm:$0xff]  }
  0x7e   :  { %9948 = vmatprep.subr.bf16.mxu1 %v10986_v31  ;;  %v11036_v31 = vld [vmem:[%s14260_s1 + $0x5a0] sm:$0xff]  }
  0x7f   :  { %9927 = vmatpush3.bf16.msra.mxu0 %v10985_v30  ;;  %v11035_v30 = vld [vmem:[%s14260_s1 + $0x5e0] sm:$0xff]  }
  0x80   :  { %9956 = vmatprep.subr.bf16.mxu0 %v10989_v35  ;;  %v11039_v35 = vld [vmem:[%s14260_s1 + $0x5d8] sm:$0xff]  }
  0x81   :  { %9949 = vmatpush3.bf16.msra.mxu1 %v10988_v32  ;;  %v11037_v32 = vld [vmem:[%s14260_s1 + $0x558] sm:$0xff]  }
  0x82   :  { %7301 = vmatmul.mubr.bf16.vlgmr.msra.gmra.mxu0 %v1695_v33  ;;  %9978 = vmatprep.subr.bf16.mxu1 %v10991_v37  ;;  %v11038_v33 = vld [vmem:[%s14260_s1 + $0x518] sm:$0xff]   ;;  %v11041_v37 = vld [vmem:[%s14260_s1 + $0x550] sm:$0xff]  }
  0x83   :  { %9957 = vmatpush3.bf16.msra.mxu0 %v10990_v36  ;;  %7380 = vmatprep.mubr.bf16.mxu0 %v1751_v13  ;;  %v11040_v36 = vld [vmem:[%s14260_s1 + $0x598] sm:$0xff]   ;;  %v11080_v13 = vld [vmem:[%s14260_s1 + $0x6c8] sm:$0xff]  }
  0x84   :  { %7341 = vmatmul.mubr.bf16.vlgmr.msra.gmra.mxu1 %v1711_v39  ;;  %9958 = vmatprep.subr.bf16.mxu0 %v10993_v40  ;;  %v11043_v39 = vld [vmem:[%s14260_s1 + $0x5d0] sm:$0xff]  }
  0x85   :  { %9979 = vmatpush3.bf16.msra.mxu1 %v10992_v38  ;;  %7420 = vmatprep.mubr.bf16.mxu1 %v1761_v18  ;;  %v11042_v38 = vld [vmem:[%s14260_s1 + $0x510] sm:$0xff]   ;;  %v18_v18 = vld [vmem:[%s14261_s0 + $0x18] sm:$0xff] }
  0x86   :  { %9980 = vmatprep.subr.bf16.mxu1 %v10995_v42  ;;  %v11044_v40 = vld [vmem:[%s14260_s1 + $0x590] sm:$0xff]   ;;  %v11046_v42 = vld [vmem:[%s14260_s1 + $0x508] sm:$0xff]  }
  0x87   :  { %9959 = vmatpush3.bf16.msra.mxu0 %v10994_v41  ;;  %v11045_v41 = vld [vmem:[%s14260_s1 + $0x548] sm:$0xff]  }
  0x88   :  { %9960 = vmatprep.subr.bf16.mxu0 %v10997_v44  ;;  %v11048_v44 = vld [vmem:[%s14260_s1 + $0x588] sm:$0xff]  }
  0x89   :  { %9981 = vmatpush3.bf16.msra.mxu1 %v10996_v43  ;;  %v11047_v43 = vld [vmem:[%s14260_s1 + $0x5c8] sm:$0xff]  }
  0x8a   :  { %9982 = vmatprep.subr.bf16.mxu1 %v10999_v46  ;;  %v11050_v46 = vld [vmem:[%s14260_s1 + $0x500] sm:$0xff]  }
  0x8b   :  { %9961 = vmatpush3.bf16.msra.mxu0 %v10998_v45  ;;  %v11049_v45 = vld [vmem:[%s14260_s1 + $0x540] sm:$0xff]  }
  0x8c   :  { %9962 = vmatprep.subr.bf16.mxu0 %v11001_v48  ;;  %v11053_v48 = vld [vmem:[%s14260_s1 + $0x580] sm:$0xff]  }
  0x8d   :  { %9983 = vmatpush3.bf16.msra.mxu1 %v11000_v47  ;;  %v11051_v47 = vld [vmem:[%s14260_s1 + $0x5c0] sm:$0xff]  }
  0x8e   :  { %9984 = vmatprep.subr.bf16.mxu1 %v11003_v50  ;;  %v11054_v50 = vld [vmem:[%s14260_s1 + $0x678] sm:$0xff]  }
  0x8f   :  { %9963 = vmatpush3.bf16.msra.mxu0 %v11002_v49  ;;  %v1744_v49 = vrot.slane %v12198_v11, %v11763_v34  ;;  %v11078_v11 = vld [vmem:[%s14260_s1 + $0x648] sm:$0xff]  }
  0x90   :  { %9964 = vmatprep.subr.bf16.mxu0 %v11005_v52  ;;  %v11056_v52 = vld [vmem:[%s14260_s1 + $0x6f8] sm:$0xff]  }
  0x91   :  { %9985 = vmatpush3.bf16.msra.mxu1 %v11004_v51  ;;  %v11055_v51 = vld [vmem:[%s14260_s1 + $0x638] sm:$0xff]  }
  0x92   :  { %9986 = vmatprep.subr.bf16.mxu1 %v11007_v54  ;;  %v1760_v54 = vcombine.high %v1744_v49, %v1744_v49 }
  0x93   :  { %9965 = vmatpush3.bf16.msra.mxu0 %v11006_v53  ;;  %v11057_v53 = vld [vmem:[%s14260_s1 + $0x6b8] sm:$0xff]  }
  0x94   :  { %9966 = vmatprep.subr.bf16.mxu0 %v11009_v56  ;;  %v11059_v56 = vld [vmem:[%s14260_s1 + $0x630] sm:$0xff]  }
  0x95   :  { %9987 = vmatpush3.bf16.msra.mxu1 %v11008_v55  ;;  %v11058_v55 = vld [vmem:[%s14260_s1 + $0x670] sm:$0xff]  }
  0x96   :  { %9988 = vmatprep.subr.bf16.mxu1 %v11011_v58  ;;  %v11061_v58 = vld [vmem:[%s14260_s1 + $0x6b0] sm:$0xff]  }
  0x97   :  { %9967 = vmatpush3.bf16.msra.mxu0 %v11010_v57  ;;  %v11060_v57 = vld [vmem:[%s14260_s1 + $0x6f0] sm:$0xff]  }
  0x98   :  { %9968 = vmatprep.subr.bf16.mxu0 %v11013_v60  ;;  %v11063_v60 = vld [vmem:[%s14260_s1 + $0x628] sm:$0xff]  }
  0x99   :  { %9989 = vmatpush3.bf16.msra.mxu1 %v11012_v59  ;;  %v11062_v59 = vld [vmem:[%s14260_s1 + $0x668] sm:$0xff]  }
  0x9a   :  { %9990 = vmatprep.subr.bf16.mxu1 %v11015_v62  ;;  %v11065_v62 = vld [vmem:[%s14260_s1 + $0x6a8] sm:$0xff]  }
  0x9b   :  { %9969 = vmatpush3.bf16.msra.mxu0 %v11014_v61  ;;  %v11064_v61 = vld [vmem:[%s14260_s1 + $0x6e8] sm:$0xff]  }
  0x9c   :  { %9970 = vmatprep.subr.bf16.mxu0 %v11017_v0  ;;  %v11067_v0 = vld [vmem:[%s14260_s1 + $0x620] sm:$0xff]  }
  0x9d   :  { %9991 = vmatpush3.bf16.msra.mxu1 %v11016_v63  ;;  %v11066_v63 = vld [vmem:[%s14260_s1 + $0x660] sm:$0xff]  }
  0x9e   :  { %9992 = vmatprep.subr.bf16.mxu1 %v11019_v2  ;;  %v11069_v2 = vld [vmem:[%s14260_s1 + $0x6a0] sm:$0xff]  }
  0x9f   :  { %9971 = vmatpush3.bf16.msra.mxu0 %v11018_v1  ;;  %v11068_v1 = vld [vmem:[%s14260_s1 + $0x6e0] sm:$0xff]  }
  0xa0   :  { %10000 = vmatprep.subr.bf16.mxu0 %v11021_v7  ;;  %v11074_v7 = vld [vmem:[%s14260_s1 + $0x650] sm:$0xff]  }
  0xa1   :  { %9993 = vmatpush3.bf16.msra.mxu1 %v11020_v5  ;;  %v11072_v5 = vld [vmem:[%s14260_s1 + $0x6d8] sm:$0xff]  }
  0xa2   :  { %7381 = vmatmul.mubr.bf16.vlgmr.msra.gmra.mxu0 %v1737_v9  ;;  %10022 = vmatprep.subr.bf16.mxu1 %v11023_v12  ;;  %v11076_v9 = vld [vmem:[%s14260_s1 + $0x6d0] sm:$0xff]   ;;  %v11079_v12 = vld [vmem:[%s14260_s1 + $0x608] sm:$0xff]  }
  0xa3   :  { %10001 = vmatpush3.bf16.msra.mxu0 %v11022_v10  ;;  %7460 = vmatprep.mubr.bf16.mxu0 %v1758_v20  ;;  %v11077_v10 = vld [vmem:[%s14260_s1 + $0x690] sm:$0xff]   ;;  %v11085_v20 = vld [vmem:[%s14260_s1 + $0x680] sm:$0xff]  }
  0xa4   :  { %7421 = vmatmul.mubr.bf16.vlgmr.msra.gmra.mxu1 %v1759_v16  ;;  %10002 = vmatprep.subr.bf16.mxu0 %v11025_v17  ;;  %v11083_v16 = vld [vmem:[%s14260_s1 + $0x600] sm:$0xff]  }
  0xa5   :  { %10023 = vmatpush3.bf16.msra.mxu1 %v11024_v14  ;;  %7500 = vmatprep.mubr.bf16.mxu1 %v1762_v23  ;;  %v11081_v14 = vld [vmem:[%s14260_s1 + $0x688] sm:$0xff]   ;;  %v11084_v17 = vld [vmem:[%s14260_s1 + $0x6c0] sm:$0xff]  }
  0xa6   :  { %10024 = vmatprep.subr.bf16.mxu1 %v11027_v21  ;;  %v1763_v21 = vcombine.high %v18_v18, %v18_v18 }
  0xa7   :  { %10003 = vmatpush3.bf16.msra.mxu0 %v11026_v19  ;;  %v1770_v19 = vrot.slane %v18_v18, %v11763_v34 }
  0xa8   :  { %10004 = vmatprep.subr.bf16.mxu0 %v11029_v24 }
  0xa9   :  { %10025 = vmatpush3.bf16.msra.mxu1 %v11028_v22  ;;  %v11086_v22 = vld [vmem:[%s14260_s1 + $0x778] sm:$0xff]   ;;  %v1778_v23 = vcombine.high %v1770_v19, %v1770_v19  ;;  %v1786_v24 = vrot.slane %v1770_v19, %v11763_v34  ;;  %v11123_v19 = vld [vmem:[%s14260_s1 + $0x870] sm:$0xff]  }
  0xaa   :  { %10026 = vmatprep.subr.bf16.mxu1 %v11031_v26  ;;  %v12404_v26 = vrot.slane %v1763_v21, %v11763_v34  ;;  %v11124_v21 = vld [vmem:[%s14260_s1 + $0x830] sm:$0xff]  }
  0xab   :  { %10005 = vmatpush3.bf16.msra.mxu0 %v11030_v25  ;;  %v11087_v25 = vld [vmem:[%s14260_s1 + $0x738] sm:$0xff]  }
  0xac   :  { %10006 = vmatprep.subr.bf16.mxu0 %v11033_v28  ;;  %v1800_v28 = vrot.slane %v1778_v23, %v11763_v34 }
  0xad   :  { %10027 = vmatpush3.bf16.msra.mxu1 %v11032_v27  ;;  %v11088_v27 = vld [vmem:[%s14260_s1 + $0x7f8] sm:$0xff]  }
  0xae   :  { %10028 = vmatprep.subr.bf16.mxu1 %v11035_v30  ;;  %v1779_v30 = vcombine.high %v12404_v26, %v12404_v26 }
  0xaf   :  { %10007 = vmatpush3.bf16.msra.mxu0 %v11034_v29  ;;  %v11089_v29 = vld [vmem:[%s14260_s1 + $0x7b8] sm:$0xff]  }
  0xb0   :  { %10008 = vmatprep.subr.bf16.mxu0 %v11037_v32  ;;  %v11090_v32 = vld [vmem:[%s14260_s1 + $0x770] sm:$0xff]  }
  0xb1   :  { %10029 = vmatpush3.bf16.msra.mxu1 %v11036_v31  ;;  %v1808_v31 = vcombine.high %v1786_v24, %v1786_v24 }
  0xb2   :  { %10030 = vmatprep.subr.bf16.mxu1 %v11039_v35  ;;  %v1810_v35 = vcombine.high %v1800_v28, %v1800_v28 }
  0xb3   :  { %10009 = vmatpush3.bf16.msra.mxu0 %v11038_v33 }
  0xb4   :  { %10010 = vmatprep.subr.bf16.mxu0 %v11041_v37  ;;  %v11091_v37 = vld [vmem:[%s14260_s1 + $0x730] sm:$0xff]  }
  0xb5   :  { %10031 = vmatpush3.bf16.msra.mxu1 %v11040_v36  ;;  %v8994_v36 = vld [vmem:[%s14262_s2] ss:$0 sm:$0xff] }
  0xb6   :  { %10032 = vmatprep.subr.bf16.mxu1 %v11043_v39  ;;  %v11092_v39 = vld [vmem:[%s14260_s1 + $0x7f0] sm:$0xff]  }
  0xb7   :  { %10011 = vmatpush3.bf16.msra.mxu0 %v11042_v38  ;;  %v1807_v38 = vrot.slane %v1779_v30, %v11763_v34  ;;  %v11128_v30 = vld [vmem:[%s14260_s1 + $0x828] sm:$0xff]  }
  0xb8   :  { %10012 = vmatprep.subr.bf16.mxu0 %v11045_v41 }
  0xb9   :  { %10033 = vmatpush3.bf16.msra.mxu1 %v11044_v40 }
  0xba   :  { %10034 = vmatprep.subr.bf16.mxu1 %v11047_v43  ;;  %v1811_v43 = vcombine.high %v1807_v38, %v1807_v38 }
  0xbb   :  { %10013 = vmatpush3.bf16.msra.mxu0 %v11046_v42  ;;  %v11093_v42 = vld [vmem:[%s14260_s1 + $0x7b0] sm:$0xff]  }
  0xbc   :  { %10014 = vmatprep.subr.bf16.mxu0 %v11049_v45  ;;  %v11094_v45 = vld [vmem:[%s14260_s1 + $0x768] sm:$0xff]  }
  0xbd   :  { %10035 = vmatpush3.bf16.msra.mxu1 %v11048_v44 }
  0xbe   :  { %10036 = vmatprep.subr.bf16.mxu1 %v11051_v47 }
  0xbf   :  { %10015 = vmatpush3.bf16.msra.mxu0 %v11050_v46 }
  0xc0   :  { %10044 = vmatprep.subr.bf16.mxu0 %v11054_v50 }
  0xc1   :  { %10037 = vmatpush3.bf16.msra.mxu1 %v11053_v48  ;;  %v11095_v48 = vld [vmem:[%s14260_s1 + $0x728] sm:$0xff]  }
  0xc2   :  { %7461 = vmatmul.mubr.bf16.vlgmr.msra.gmra.mxu0 %v1744_v49  ;;  %10066 = vmatprep.subr.bf16.mxu1 %v11056_v52 }
  0xc3   :  { %10045 = vmatpush3.bf16.msra.mxu0 %v11055_v51  ;;  %7540 = vmatprep.mubr.bf16.mxu0 %v1800_v28  ;;  %v11096_v51 = vld [vmem:[%s14260_s1 + $0x7e8] sm:$0xff]  }
  0xc4   :  { %7501 = vmatmul.mubr.bf16.vlgmr.msra.gmra.mxu1 %v1760_v54  ;;  %10046 = vmatprep.subr.bf16.mxu0 %v11058_v55 }
  0xc5   :  { %10067 = vmatpush3.bf16.msra.mxu1 %v11057_v53  ;;  %7580 = vmatprep.mubr.bf16.mxu1 %v1810_v35  ;;  %v11097_v53 = vld [vmem:[%s14260_s1 + $0x7a8] sm:$0xff]  }
  0xc6   :  { %10068 = vmatprep.subr.bf16.mxu1 %v11060_v57  ;;  %v11099_v57 = vld [vmem:[%s14260_s1 + $0x720] sm:$0xff]  }
  0xc7   :  { %10047 = vmatpush3.bf16.msra.mxu0 %v11059_v56  ;;  %v11098_v56 = vld [vmem:[%s14260_s1 + $0x760] sm:$0xff]  }
  0xc8   :  { %10048 = vmatprep.subr.bf16.mxu0 %v11062_v59  ;;  %v11100_v59 = vld [vmem:[%s14260_s1 + $0x7e0] sm:$0xff]  }
  0xc9   :  { %10069 = vmatpush3.bf16.msra.mxu1 %v11061_v58 }
  0xca   :  { %10070 = vmatprep.subr.bf16.mxu1 %v11064_v61  ;;  %v11102_v61 = vld [vmem:[%s14260_s1 + $0x758] sm:$0xff]  }
  0xcb   :  { %10049 = vmatpush3.bf16.msra.mxu0 %v11063_v60  ;;  %v11101_v60 = vld [vmem:[%s14260_s1 + $0x7a0] sm:$0xff]  }
  0xcc   :  { %10050 = vmatprep.subr.bf16.mxu0 %v11066_v63  ;;  %v11104_v63 = vld [vmem:[%s14260_s1 + $0x7d8] sm:$0xff]  }
  0xcd   :  { %10071 = vmatpush3.bf16.msra.mxu1 %v11065_v62  ;;  %v11103_v62 = vld [vmem:[%s14260_s1 + $0x718] sm:$0xff]  }
  0xce   :  { %10072 = vmatprep.subr.bf16.mxu1 %v11068_v1  ;;  %v11106_v1 = vld [vmem:[%s14260_s1 + $0x750] sm:$0xff]  }
  0xcf   :  { %10051 = vmatpush3.bf16.msra.mxu0 %v11067_v0  ;;  %v11105_v0 = vld [vmem:[%s14260_s1 + $0x798] sm:$0xff]  }
  0xd0   :  { %10052 = vmatprep.subr.bf16.mxu0 %v11070_v3  ;;  %v11108_v3 = vld [vmem:[%s14260_s1 + $0x7d0] sm:$0xff]  }
  0xd1   :  { %10073 = vmatpush3.bf16.msra.mxu1 %v11069_v2  ;;  %v11107_v2 = vld [vmem:[%s14260_s1 + $0x710] sm:$0xff]  }
  0xd2   :  { %10074 = vmatprep.subr.bf16.mxu1 %v11072_v5  ;;  %v11110_v5 = vld [vmem:[%s14260_s1 + $0x748] sm:$0xff]  }
  0xd3   :  { %10053 = vmatpush3.bf16.msra.mxu0 %v11071_v4  ;;  %v11109_v4 = vld [vmem:[%s14260_s1 + $0x790] sm:$0xff]  }
  0xd4   :  { %10054 = vmatprep.subr.bf16.mxu0 %v11074_v7  ;;  %v11112_v7 = vld [vmem:[%s14260_s1 + $0x7c8] sm:$0xff]  }
  0xd5   :  { %10075 = vmatpush3.bf16.msra.mxu1 %v11073_v6  ;;  %v11111_v6 = vld [vmem:[%s14260_s1 + $0x708] sm:$0xff]  }
  0xd6   :  { %10076 = vmatprep.subr.bf16.mxu1 %v11076_v9  ;;  %v11114_v9 = vld [vmem:[%s14260_s1 + $0x740] sm:$0xff]  }
  0xd7   :  { %10055 = vmatpush3.bf16.msra.mxu0 %v11075_v8  ;;  %v11113_v8 = vld [vmem:[%s14260_s1 + $0x788] sm:$0xff]  }
  0xd8   :  { %10056 = vmatprep.subr.bf16.mxu0 %v11078_v11  ;;  %v11116_v11 = vld [vmem:[%s14260_s1 + $0x7c0] sm:$0xff]  }
  0xd9   :  { %10077 = vmatpush3.bf16.msra.mxu1 %v11077_v10  ;;  %v11115_v10 = vld [vmem:[%s14260_s1 + $0x700] sm:$0xff]  }
  0xda   :  { %10078 = vmatprep.subr.bf16.mxu1 %v11080_v13  ;;  %v1793_v13 = vrot.slane %v12404_v26, %v11763_v34 }
  0xdb   :  { %10057 = vmatpush3.bf16.msra.mxu0 %v11079_v12  ;;  %v11118_v12 = vld [vmem:[%s14260_s1 + $0x780] sm:$0xff]  }
  0xdc   :  { %10058 = vmatprep.subr.bf16.mxu0 %v11082_v15  ;;  %v11120_v15 = vld [vmem:[%s14260_s1 + $0x838] sm:$0xff]   ;;  %v1809_v18 = vcombine.high %v1793_v13, %v1793_v13 }
  0xdd   :  { %10079 = vmatpush3.bf16.msra.mxu1 %v11081_v14  ;;  %v11119_v14 = vld [vmem:[%s14260_s1 + $0x878] sm:$0xff]  }
  0xde   :  { %10080 = vmatprep.subr.bf16.mxu1 %v11084_v17  ;;  %v11122_v17 = vld [vmem:[%s14260_s1 + $0x8b8] sm:$0xff]  }
  0xdf   :  { %10059 = vmatpush3.bf16.msra.mxu0 %v11083_v16  ;;  %v11121_v16 = vld [vmem:[%s14260_s1 + $0x8f8] sm:$0xff]  }
  0xe0   :  { %10088 = vmatprep.subr.bf16.mxu0 %v11086_v22  ;;  %v11125_v22 = vld [vmem:[%s14260_s1 + $0x8f0] sm:$0xff]  }
  0xe1   :  { %10081 = vmatpush3.bf16.msra.mxu1 %v11085_v20 }
  0xe2   :  { %v9796_v33 = vpop.f32.mrf.mxu0  ;;  %10110 = vmatprep.subr.bf16.mxu1 %v11088_v27  ;;  %7541 = vmatmul.mubr.bf16.vlgmr.msra.gmra.mxu0 %v1786_v24  ;;  %v11127_v27 = vld [vmem:[%s14260_s1 + $0x868] sm:$0xff]  }
  0xe3   :  { %10089 = vmatpush3.bf16.msra.mxu0 %v11087_v25  ;;  %7620 = vmatprep.mubr.bf16.mxu0 %v1807_v38  ;;  %v11126_v25 = vld [vmem:[%s14260_s1 + $0x8b0] sm:$0xff]  }
  0xe4   :  { %v9797_v40 = vpop.f32.mrf.mxu0  ;;  %v9818_v41 = vpop.f32.mrf.mxu1  ;;  %7581 = vmatmul.mubr.bf16.vlgmr.msra.gmra.mxu1 %v1808_v31  ;;  %10090 = vmatprep.subr.bf16.mxu0 %v11090_v32 }
  0xe5   :  { %v9798_v44 = vadd.f32 %v9797_v40, %v9796_v33  ;;  %10111 = vmatpush3.bf16.msra.mxu1 %v11089_v29  ;;  %7660 = vmatprep.mubr.bf16.mxu1 %v1811_v43  ;;  %v11129_v33 = vld [vmem:[%s14260_s1 + $0x8e8] sm:$0xff]   ;;  %v11132_v40 = vld [vmem:[%s14260_s1 + $0x820] sm:$0xff]  }
  0xe6   :  { %v9799_v46 = vpop.f32.mrf.mxu0  ;;  %v9819_v47 = vpop.f32.mrf.mxu1  ;;  %10112 = vmatprep.subr.bf16.mxu1 %v11092_v39  ;;  %v11131_v39 = vld [vmem:[%s14260_s1 + $0x860] sm:$0xff]  }
  0xe7   :  { %v7063_v49 = vadd.f32 %v9798_v44, %v8994_v36  ;;  %v9820_v50 = vadd.f32 %v9819_v47, %v9818_v41  ;;  %10091 = vmatpush3.bf16.msra.mxu0 %v11091_v37  ;;  %v11130_v36 = vld [vmem:[%s14260_s1 + $0x8a8] sm:$0xff]   ;;  %v11134_v43 = vld [vmem:[%s14260_s1 + $0x8a0] sm:$0xff]   ;;  %v11135_v44 = vld [vmem:[%s14260_s1 + $0x858] sm:$0xff]  }
  0xe8   :  { %v9800_v52 = vpop.f32.mrf.mxu0  ;;  %v9821_v54 = vpop.f32.mrf.mxu1  ;;  %10092 = vmatprep.subr.bf16.mxu0 %v11094_v45  ;;  %v11136_v45 = vld [vmem:[%s14260_s1 + $0x818] sm:$0xff]  }
  0xe9   :  { %v12443_v55 = vadd.f32 %v9820_v50, %v7063_v49  ;;  %10113 = vmatpush3.bf16.msra.mxu1 %v11093_v42  ;;  %v11133_v42 = vld [vmem:[%s14260_s1 + $0x8e0] sm:$0xff]   ;;  %v11137_v46 = vld [vmem:[%s14260_s1 + $0x8d8] sm:$0xff]   ;;  %v11140_v49 = vld [vmem:[%s14260_s1 + $0x810] sm:$0xff]  }
  0xea   :  { %v9822_v58 = vpop.f32.mrf.mxu1  ;;  %10114 = vmatprep.subr.bf16.mxu1 %v11096_v51  ;;  %v11138_v47 = vld [vmem:[%s14260_s1 + $0x898] sm:$0xff]   ;;  %v11141_v50 = vld [vmem:[%s14260_s1 + $0x8d0] sm:$0xff]   ;;  %v11143_v52 = vld [vmem:[%s14260_s1 + $0x848] sm:$0xff]  }
  0xeb   :  { %10093 = vmatpush3.bf16.msra.mxu0 %v11095_v48  ;;  %v11139_v48 = vld [vmem:[%s14260_s1 + $0x850] sm:$0xff]   ;;  %v11145_v54 = vld [vmem:[%s14260_s1 + $0x8c8] sm:$0xff]   ;;  %v11149_v58 = vld [vmem:[%s14260_s1 + $0x8c0] sm:$0xff]  }
  0xec   :  { %10094 = vmatprep.subr.bf16.mxu0 %v11098_v56  ;;  %v11142_v51 = vld [vmem:[%s14260_s1 + $0x890] sm:$0xff]   ;;  %v11147_v56 = vld [vmem:[%s14260_s1 + $0x840] sm:$0xff]  }
  0xed   :  { %10115 = vmatpush3.bf16.msra.mxu1 %v11097_v53  ;;  %v11144_v53 = vld [vmem:[%s14260_s1 + $0x808] sm:$0xff]  }
  0xee   :  { %10116 = vmatprep.subr.bf16.mxu1 %v11100_v59  ;;  %v19_v59 = vld [vmem:[%s14261_s0 + $0x20] sm:$0xff] }
  0xef   :  { %10095 = vmatpush3.bf16.msra.mxu0 %v11099_v57  ;;  %v11148_v57 = vld [vmem:[%s14260_s1 + $0x800] sm:$0xff]  }
  0xf0   :  { %10096 = vmatprep.subr.bf16.mxu0 %v11102_v61  ;;  %v11150_v61 = vld [vmem:[%s14260_s1 + $0x880] sm:$0xff]  }
  0xf1   :  { %10117 = vmatpush3.bf16.msra.mxu1 %v11101_v60  ;;  %v1819_v60 = vrot.slane %v19_v59, %v11763_v34 }
  0xf2   :  { %10118 = vmatprep.subr.bf16.mxu1 %v11104_v63  ;;  %v11151_v63 = vld [vmem:[%s14260_s1 + $0x978] sm:$0xff]  }
  0xf3   :  { %10097 = vmatpush3.bf16.msra.mxu0 %v11103_v62  ;;  %v1812_v62 = vcombine.high %v19_v59, %v19_v59  ;;  %v11188_v59 = vld [vmem:[%s14260_s1 + $0xa70] sm:$0xff]  }
  0xf4   :  { %10098 = vmatprep.subr.bf16.mxu0 %v11106_v1  ;;  %v1835_v1 = vrot.slane %v1819_v60, %v11763_v34 }
  0xf5   :  { %10119 = vmatpush3.bf16.msra.mxu1 %v11105_v0  ;;  %v1827_v0 = vcombine.high %v1819_v60, %v1819_v60 }
  0xf6   :  { %10120 = vmatprep.subr.bf16.mxu1 %v11108_v3  ;;  %v12618_v3 = vrot.slane %v1812_v62, %v11763_v34  ;;  %v11190_v62 = vld [vmem:[%s14260_s1 + $0xaf0] sm:$0xff]  }
  0xf7   :  { %10099 = vmatpush3.bf16.msra.mxu0 %v11107_v2  ;;  %v11152_v2 = vld [vmem:[%s14260_s1 + $0x938] sm:$0xff]  }
  0xf8   :  { %10100 = vmatprep.subr.bf16.mxu0 %v11110_v5  ;;  %v1849_v5 = vrot.slane %v1827_v0, %v11763_v34 }
  0xf9   :  { %10121 = vmatpush3.bf16.msra.mxu1 %v11109_v4  ;;  %v11153_v4 = vld [vmem:[%s14260_s1 + $0x9f8] sm:$0xff]  }
  0xfa   :  { %10122 = vmatprep.subr.bf16.mxu1 %v11112_v7  ;;  %v1828_v7 = vcombine.high %v12618_v3, %v12618_v3 }
  0xfb   :  { %10101 = vmatpush3.bf16.msra.mxu0 %v11111_v6  ;;  %v11154_v6 = vld [vmem:[%s14260_s1 + $0x9b8] sm:$0xff]  }
  0xfc   :  { %10102 = vmatprep.subr.bf16.mxu0 %v11114_v9  ;;  %v11155_v9 = vld [vmem:[%s14260_s1 + $0x970] sm:$0xff]  }
  0xfd   :  { %10123 = vmatpush3.bf16.msra.mxu1 %v11113_v8  ;;  %v1857_v8 = vcombine.high %v1835_v1, %v1835_v1 }
  0xfe   :  { %10124 = vmatprep.subr.bf16.mxu1 %v11116_v11  ;;  %v1859_v11 = vcombine.high %v1849_v5, %v1849_v5 }
  0xff   :  { %10103 = vmatpush3.bf16.msra.mxu0 %v11115_v10 }
 0x100   :  { %10132 = vmatprep.subr.bf16.mxu0 %v11119_v14  ;;  %v11157_v14 = vld [vmem:[%s14260_s1 + $0x9f0] sm:$0xff]  }
 0x101   :  { %10125 = vmatpush3.bf16.msra.mxu1 %v11118_v12  ;;  %v11156_v12 = vld [vmem:[%s14260_s1 + $0x930] sm:$0xff]  }
 0x102   :  { %v9840_v20 = vpop.f32.mrf.mxu0  ;;  %7621 = vmatmul.mubr.bf16.vlgmr.msra.gmra.mxu0 %v1793_v13  ;;  %10154 = vmatprep.subr.bf16.mxu1 %v11121_v16  ;;  %v1856_v13 = vrot.slane %v1828_v7, %v11763_v34 }
 0x103   :  { %10133 = vmatpush3.bf16.msra.mxu0 %v11120_v15  ;;  %7700 = vmatprep.mubr.bf16.mxu0 %v1849_v5 }
 0x104   :  { %v9841_v23 = vpop.f32.mrf.mxu0  ;;  %v9862_v24 = vpop.f32.mrf.mxu1  ;;  %7661 = vmatmul.mubr.bf16.vlgmr.msra.gmra.mxu1 %v1809_v18  ;;  %10134 = vmatprep.subr.bf16.mxu0 %v11123_v19  ;;  %v1860_v18 = vcombine.high %v1856_v13, %v1856_v13 }
 0x105   :  { %v9842_v26 = vadd.f32 %v9841_v23, %v9840_v20  ;;  %10155 = vmatpush3.bf16.msra.mxu1 %v11122_v17  ;;  %7740 = vmatprep.mubr.bf16.mxu1 %v1859_v11  ;;  %v11158_v17 = vld [vmem:[%s14260_s1 + $0x9b0] sm:$0xff]   ;;  %v11159_v20 = vld [vmem:[%s14260_s1 + $0x968] sm:$0xff]  }
 0x106   :  { %v9843_v28 = vpop.f32.mrf.mxu0  ;;  %v9863_v29 = vpop.f32.mrf.mxu1  ;;  %10156 = vmatprep.subr.bf16.mxu1 %v11125_v22  ;;  %v11160_v23 = vld [vmem:[%s14260_s1 + $0x928] sm:$0xff]  }
 0x107   :  { %v7143_v31 = vadd.f32 %v9842_v26, %v12443_v55  ;;  %v9864_v32 = vadd.f32 %v9863_v29, %v9862_v24  ;;  %10135 = vmatpush3.bf16.msra.mxu0 %v11124_v21  ;;  %v11146_v55 = vld [vmem:[%s14260_s1 + $0x888] sm:$0xff]  }
 0x108   :  { %v9844_v35 = vpop.f32.mrf.mxu0  ;;  %v9865_v37 = vpop.f32.mrf.mxu1  ;;  %10136 = vmatprep.subr.bf16.mxu0 %v11127_v27  ;;  %v11161_v26 = vld [vmem:[%s14260_s1 + $0x9e8] sm:$0xff]  }
 0x109   :  { %v12544_v38 = vadd.f32 %v9864_v32, %v7143_v31  ;;  %10157 = vmatpush3.bf16.msra.mxu1 %v11126_v25  ;;  %v11162_v28 = vld [vmem:[%s14260_s1 + $0x9a8] sm:$0xff]   ;;  %v11163_v31 = vld [vmem:[%s14260_s1 + $0x960] sm:$0xff]   ;;  %v11167_v37 = vld [vmem:[%s14260_s1 + $0x958] sm:$0xff]  }
 0x10a   :  { %v9866_v41 = vpop.f32.mrf.mxu1  ;;  %10158 = vmatprep.subr.bf16.mxu1 %v11129_v33  ;;  %v11164_v32 = vld [vmem:[%s14260_s1 + $0x920] sm:$0xff]   ;;  %v11195_v11 = vld [vmem:[%s14260_s1 + $0xaa8] sm:$0xff]  }
 0x10b   :  { %10137 = vmatpush3.bf16.msra.mxu0 %v11128_v30  ;;  %v11165_v35 = vld [vmem:[%s14260_s1 + $0x9e0] sm:$0xff]   ;;  %v11171_v41 = vld [vmem:[%s14260_s1 + $0x950] sm:$0xff]  }
 0x10c   :  { %10138 = vmatprep.subr.bf16.mxu0 %v11131_v39  ;;  %v11169_v39 = vld [vmem:[%s14260_s1 + $0x9d8] sm:$0xff]  }
 0x10d   :  { %10159 = vmatpush3.bf16.msra.mxu1 %v11130_v36  ;;  %v11166_v36 = vld [vmem:[%s14260_s1 + $0x9a0] sm:$0xff]  }
 0x10e   :  { %10160 = vmatprep.subr.bf16.mxu1 %v11133_v42  ;;  %v11172_v42 = vld [vmem:[%s14260_s1 + $0x910] sm:$0xff]  }
 0x10f   :  { %10139 = vmatpush3.bf16.msra.mxu0 %v11132_v40  ;;  %v11170_v40 = vld [vmem:[%s14260_s1 + $0x998] sm:$0xff]  }
 0x110   :  { %10140 = vmatprep.subr.bf16.mxu0 %v11135_v44  ;;  %v11174_v44 = vld [vmem:[%s14260_s1 + $0x990] sm:$0xff]  }
 0x111   :  { %10161 = vmatpush3.bf16.msra.mxu1 %v11134_v43  ;;  %v11173_v43 = vld [vmem:[%s14260_s1 + $0x9d0] sm:$0xff]  }
 0x112   :  { %10162 = vmatprep.subr.bf16.mxu1 %v11137_v46  ;;  %v11176_v46 = vld [vmem:[%s14260_s1 + $0x908] sm:$0xff]  }
 0x113   :  { %10141 = vmatpush3.bf16.msra.mxu0 %v11136_v45  ;;  %v11175_v45 = vld [vmem:[%s14260_s1 + $0x948] sm:$0xff]  }
 0x114   :  { %10142 = vmatprep.subr.bf16.mxu0 %v11139_v48  ;;  %v11178_v48 = vld [vmem:[%s14260_s1 + $0x988] sm:$0xff]  }
 0x115   :  { %10163 = vmatpush3.bf16.msra.mxu1 %v11138_v47  ;;  %v11177_v47 = vld [vmem:[%s14260_s1 + $0x9c8] sm:$0xff]  }
 0x116   :  { %10164 = vmatprep.subr.bf16.mxu1 %v11141_v50  ;;  %v11180_v50 = vld [vmem:[%s14260_s1 + $0x900] sm:$0xff]  }
 0x117   :  { %10143 = vmatpush3.bf16.msra.mxu0 %v11140_v49  ;;  %v11179_v49 = vld [vmem:[%s14260_s1 + $0x940] sm:$0xff]  }
 0x118   :  { %10144 = vmatprep.subr.bf16.mxu0 %v11143_v52  ;;  %v11183_v52 = vld [vmem:[%s14260_s1 + $0x980] sm:$0xff]  }
 0x119   :  { %10165 = vmatpush3.bf16.msra.mxu1 %v11142_v51  ;;  %v11181_v51 = vld [vmem:[%s14260_s1 + $0x9c0] sm:$0xff]  }
 0x11a   :  { %10166 = vmatprep.subr.bf16.mxu1 %v11145_v54  ;;  %v11184_v54 = vld [vmem:[%s14260_s1 + $0xa78] sm:$0xff]  }
 0x11b   :  { %10145 = vmatpush3.bf16.msra.mxu0 %v11144_v53  ;;  %v1842_v53 = vrot.slane %v12618_v3, %v11763_v34  ;;  %v11192_v3 = vld [vmem:[%s14260_s1 + $0xa68] sm:$0xff]  }
 0x11c   :  { %10146 = vmatprep.subr.bf16.mxu0 %v11147_v56  ;;  %v11186_v56 = vld [vmem:[%s14260_s1 + $0xaf8] sm:$0xff]  }
 0x11d   :  { %10167 = vmatpush3.bf16.msra.mxu1 %v11146_v55  ;;  %v11185_v55 = vld [vmem:[%s14260_s1 + $0xa38] sm:$0xff]  }
 0x11e   :  { %10168 = vmatprep.subr.bf16.mxu1 %v11149_v58  ;;  %v1858_v58 = vcombine.high %v1842_v53, %v1842_v53 }
 0x11f   :  { %10147 = vmatpush3.bf16.msra.mxu0 %v11148_v57  ;;  %v11187_v57 = vld [vmem:[%s14260_s1 + $0xab8] sm:$0xff]  }
 0x120   :  { %10176 = vmatprep.subr.bf16.mxu0 %v11151_v63 }
 0x121   :  { %10169 = vmatpush3.bf16.msra.mxu1 %v11150_v61  ;;  %v11189_v61 = vld [vmem:[%s14260_s1 + $0xa30] sm:$0xff]  }
 0x122   :  { %v9884_v10 = vpop.f32.mrf.mxu0  ;;  %7701 = vmatmul.mubr.bf16.vlgmr.msra.gmra.mxu0 %v1835_v1  ;;  %10198 = vmatprep.subr.bf16.mxu1 %v11153_v4  ;;  %v11191_v1 = vld [vmem:[%s14260_s1 + $0xab0] sm:$0xff]  }
 0x123   :  { %10177 = vmatpush3.bf16.msra.mxu0 %v11152_v2  ;;  %7780 = vmatprep.mubr.bf16.mxu0 %v1856_v13 }
 0x124   :  { %v9885_v15 = vpop.f32.mrf.mxu0  ;;  %v9906_v16 = vpop.f32.mrf.mxu1  ;;  %7741 = vmatmul.mubr.bf16.vlgmr.msra.gmra.mxu1 %v1857_v8  ;;  %10178 = vmatprep.subr.bf16.mxu0 %v11155_v9  ;;  %v11194_v9 = vld [vmem:[%s14260_s1 + $0xae8] sm:$0xff]  }
 0x125   :  { %v9886_v19 = vadd.f32 %v9885_v15, %v9884_v10  ;;  %10199 = vmatpush3.bf16.msra.mxu1 %v11154_v6  ;;  %7820 = vmatprep.mubr.bf16.mxu1 %v1860_v18  ;;  %v11193_v6 = vld [vmem:[%s14260_s1 + $0xa28] sm:$0xff]   ;;  %v11197_v15 = vld [vmem:[%s14260_s1 + $0xa20] sm:$0xff]  }
 0x126   :  { %v9887_v21 = vpop.f32.mrf.mxu0  ;;  %v9907_v22 = vpop.f32.mrf.mxu1  ;;  %10200 = vmatprep.subr.bf16.mxu1 %v11157_v14  ;;  %v11196_v14 = vld [vmem:[%s14260_s1 + $0xa60] sm:$0xff]  }
 0x127   :  { %v7223_v24 = vadd.f32 %v9886_v19, %v12544_v38  ;;  %v9908_v25 = vadd.f32 %v9907_v22, %v9906_v16  ;;  %10179 = vmatpush3.bf16.msra.mxu0 %v11156_v12  ;;  %v11168_v38 = vld [vmem:[%s14260_s1 + $0x918] sm:$0xff]   ;;  %v11199_v18 = vld [vmem:[%s14260_s1 + $0xaa0] sm:$0xff]  }
 0x128   :  { %v9888_v27 = vpop.f32.mrf.mxu0  ;;  %v9909_v29 = vpop.f32.mrf.mxu1  ;;  %10180 = vmatprep.subr.bf16.mxu0 %v11159_v20  ;;  %v11200_v19 = vld [vmem:[%s14260_s1 + $0xa58] sm:$0xff]  }
 0x129   :  { %v12655_v30 = vadd.f32 %v9908_v25, %v7223_v24  ;;  %10201 = vmatpush3.bf16.msra.mxu1 %v11158_v17  ;;  %v11198_v17 = vld [vmem:[%s14260_s1 + $0xae0] sm:$0xff]   ;;  %v11201_v20 = vld [vmem:[%s14260_s1 + $0xa18] sm:$0xff]   ;;  %v11205_v24 = vld [vmem:[%s14260_s1 + $0xa10] sm:$0xff]  }
 0x12a   :  { %v9910_v33 = vpop.f32.mrf.mxu1  ;;  %10202 = vmatprep.subr.bf16.mxu1 %v11161_v26  ;;  %v11202_v21 = vld [vmem:[%s14260_s1 + $0xad8] sm:$0xff]   ;;  %v11206_v25 = vld [vmem:[%s14260_s1 + $0xad0] sm:$0xff]   ;;  %v11208_v27 = vld [vmem:[%s14260_s1 + $0xa48] sm:$0xff]  }
 0x12b   :  { %10181 = vmatpush3.bf16.msra.mxu0 %v11160_v23  ;;  %v11203_v22 = vld [vmem:[%s14260_s1 + $0xa98] sm:$0xff]   ;;  %v11204_v23 = vld [vmem:[%s14260_s1 + $0xa50] sm:$0xff]   ;;  %v11210_v29 = vld [vmem:[%s14260_s1 + $0xac8] sm:$0xff]  }
 0x12c   :  { %10182 = vmatprep.subr.bf16.mxu0 %v11163_v31  ;;  %v11207_v26 = vld [vmem:[%s14260_s1 + $0xa90] sm:$0xff]   ;;  %v11212_v31 = vld [vmem:[%s14260_s1 + $0xa40] sm:$0xff]  }
 0x12d   :  { %10203 = vmatpush3.bf16.msra.mxu1 %v11162_v28  ;;  %v11209_v28 = vld [vmem:[%s14260_s1 + $0xa08] sm:$0xff]   ;;  %v11214_v33 = vld [vmem:[%s14260_s1 + $0xac0] sm:$0xff]  }
 0x12e   :  { %10204 = vmatprep.subr.bf16.mxu1 %v11165_v35  ;;  %v20_v35 = vld [vmem:[%s14261_s0 + $0x28] sm:$0xff] }
 0x12f   :  { %10183 = vmatpush3.bf16.msra.mxu0 %v11164_v32  ;;  %v11213_v32 = vld [vmem:[%s14260_s1 + $0xa00] sm:$0xff]  }
 0x130   :  { %10184 = vmatprep.subr.bf16.mxu0 %v11167_v37  ;;  %v11215_v37 = vld [vmem:[%s14260_s1 + $0xa80] sm:$0xff]  }
 0x131   :  { %10205 = vmatpush3.bf16.msra.mxu1 %v11166_v36  ;;  %v1868_v36 = vrot.slane %v20_v35, %v11763_v34 }
 0x132   :  { %10206 = vmatprep.subr.bf16.mxu1 %v11169_v39  ;;  %v11216_v39 = vld [vmem:[%s14260_s1 + $0xb78] sm:$0xff]  }
 0x133   :  { %10185 = vmatpush3.bf16.msra.mxu0 %v11168_v38  ;;  %v1861_v38 = vcombine.high %v20_v35, %v20_v35 }
 0x134   :  { %10186 = vmatprep.subr.bf16.mxu0 %v11171_v41  ;;  %v1884_v41 = vrot.slane %v1868_v36, %v11763_v34 }
 0x135   :  { %10207 = vmatpush3.bf16.msra.mxu1 %v11170_v40  ;;  %v1876_v40 = vcombine.high %v1868_v36, %v1868_v36  ;;  %v11253_v36 = vld [vmem:[%s14260_s1 + $0xc70] sm:$0xff]  }
 0x136   :  { %10208 = vmatprep.subr.bf16.mxu1 %v11173_v43  ;;  %v12830_v43 = vrot.slane %v1861_v38, %v11763_v34 }
 0x137   :  { %10187 = vmatpush3.bf16.msra.mxu0 %v11172_v42  ;;  %v11217_v42 = vld [vmem:[%s14260_s1 + $0xb38] sm:$0xff]  }
 0x138   :  { %10188 = vmatprep.subr.bf16.mxu0 %v11175_v45  ;;  %v1898_v45 = vrot.slane %v1876_v40, %v11763_v34  ;;  %v11255_v40 = vld [vmem:[%s14260_s1 + $0xcf0] sm:$0xff]  }
 0x139   :  { %10209 = vmatpush3.bf16.msra.mxu1 %v11174_v44  ;;  %v11218_v44 = vld [vmem:[%s14260_s1 + $0xbf8] sm:$0xff]  }
 0x13a   :  { %10210 = vmatprep.subr.bf16.mxu1 %v11177_v47  ;;  %v1877_v47 = vcombine.high %v12830_v43, %v12830_v43 }
 0x13b   :  { %10189 = vmatpush3.bf16.msra.mxu0 %v11176_v46  ;;  %v11219_v46 = vld [vmem:[%s14260_s1 + $0xbb8] sm:$0xff]  }
 0x13c   :  { %10190 = vmatprep.subr.bf16.mxu0 %v11179_v49  ;;  %v1906_v49 = vcombine.high %v1884_v41, %v1884_v41 }
 0x13d   :  { %10211 = vmatpush3.bf16.msra.mxu1 %v11178_v48 }
 0x13e   :  { %10212 = vmatprep.subr.bf16.mxu1 %v11181_v51  ;;  %v1908_v51 = vcombine.high %v1898_v45, %v1898_v45 }
 0x13f   :  { %10191 = vmatpush3.bf16.msra.mxu0 %v11180_v50  ;;  %v11220_v50 = vld [vmem:[%s14260_s1 + $0xb70] sm:$0xff]  }
 0x140   :  { %10220 = vmatprep.subr.bf16.mxu0 %v11184_v54 }
 0x141   :  { %10213 = vmatpush3.bf16.msra.mxu1 %v11183_v52  ;;  %v11221_v52 = vld [vmem:[%s14260_s1 + $0xb30] sm:$0xff]  }
 0x142   :  { %v9928_v60 = vpop.f32.mrf.mxu0  ;;  %7781 = vmatmul.mubr.bf16.vlgmr.msra.gmra.mxu0 %v1842_v53  ;;  %10242 = vmatprep.subr.bf16.mxu1 %v11186_v56  ;;  %v1905_v53 = vrot.slane %v1877_v47, %v11763_v34  ;;  %v11222_v56 = vld [vmem:[%s14260_s1 + $0xbf0] sm:$0xff]  }
 0x143   :  { %10221 = vmatpush3.bf16.msra.mxu0 %v11185_v55  ;;  %7860 = vmatprep.mubr.bf16.mxu0 %v1898_v45  ;;  %v11257_v45 = vld [vmem:[%s14260_s1 + $0xc68] sm:$0xff]  }
 0x144   :  { %v9929_v63 = vpop.f32.mrf.mxu0  ;;  %v9950_v0 = vpop.f32.mrf.mxu1  ;;  %7821 = vmatmul.mubr.bf16.vlgmr.msra.gmra.mxu1 %v1858_v58  ;;  %10222 = vmatprep.subr.bf16.mxu0 %v11188_v59  ;;  %v11223_v58 = vld [vmem:[%s14260_s1 + $0xbb0] sm:$0xff]   ;;  %v1909_v59 = vcombine.high %v1905_v53, %v1905_v53 }
 0x145   :  { %v9930_v2 = vadd.f32 %v9929_v63, %v9928_v60  ;;  %10243 = vmatpush3.bf16.msra.mxu1 %v11187_v57  ;;  %7900 = vmatprep.mubr.bf16.mxu1 %v1908_v51 }
 0x146   :  { %v9931_v4 = vpop.f32.mrf.mxu0  ;;  %v9951_v5 = vpop.f32.mrf.mxu1  ;;  %10244 = vmatprep.subr.bf16.mxu1 %v11190_v62  ;;  %v11224_v62 = vld [vmem:[%s14260_s1 + $0xb68] sm:$0xff]  }
 0x147   :  { %v7303_v7 = vadd.f32 %v9930_v2, %v12655_v30  ;;  %v9952_v8 = vadd.f32 %v9951_v5, %v9950_v0  ;;  %10223 = vmatpush3.bf16.msra.mxu0 %v11189_v61  ;;  %v11211_v30 = vld [vmem:[%s14260_s1 + $0xa88] sm:$0xff]  }
 0x148   :  { %v9932_v10 = vpop.f32.mrf.mxu0  ;;  %v9953_v12 = vpop.f32.mrf.mxu1  ;;  %10224 = vmatprep.subr.bf16.mxu0 %v11192_v3  ;;  %v11226_v3 = vld [vmem:[%s14260_s1 + $0xbe8] sm:$0xff]  }
 0x149   :  { %v12756_v13 = vadd.f32 %v9952_v8, %v7303_v7  ;;  %10245 = vmatpush3.bf16.msra.mxu1 %v11191_v1  ;;  %v11225_v1 = vld [vmem:[%s14260_s1 + $0xb28] sm:$0xff]   ;;  %v11228_v7 = vld [vmem:[%s14260_s1 + $0xb60] sm:$0xff]   ;;  %v11232_v12 = vld [vmem:[%s14260_s1 + $0xb58] sm:$0xff]  }
 0x14a   :  { %v9954_v16 = vpop.f32.mrf.mxu1  ;;  %10246 = vmatprep.subr.bf16.mxu1 %v11194_v9  ;;  %v11229_v9 = vld [vmem:[%s14260_s1 + $0xb20] sm:$0xff]  }
 0x14b   :  { %10225 = vmatpush3.bf16.msra.mxu0 %v11193_v6  ;;  %v11227_v6 = vld [vmem:[%s14260_s1 + $0xba8] sm:$0xff]   ;;  %v11230_v10 = vld [vmem:[%s14260_s1 + $0xbe0] sm:$0xff]   ;;  %v11236_v16 = vld [vmem:[%s14260_s1 + $0xb50] sm:$0xff]  }
 0x14c   :  { %10226 = vmatprep.subr.bf16.mxu0 %v11196_v14  ;;  %v11234_v14 = vld [vmem:[%s14260_s1 + $0xbd8] sm:$0xff]  }
 0x14d   :  { %10247 = vmatpush3.bf16.msra.mxu1 %v11195_v11  ;;  %v11231_v11 = vld [vmem:[%s14260_s1 + $0xba0] sm:$0xff]  }
 0x14e   :  { %10248 = vmatprep.subr.bf16.mxu1 %v11198_v17  ;;  %v11237_v17 = vld [vmem:[%s14260_s1 + $0xb10] sm:$0xff]  }
 0x14f   :  { %10227 = vmatpush3.bf16.msra.mxu0 %v11197_v15  ;;  %v11235_v15 = vld [vmem:[%s14260_s1 + $0xb98] sm:$0xff]  }
 0x150   :  { %10228 = vmatprep.subr.bf16.mxu0 %v11200_v19  ;;  %v11239_v19 = vld [vmem:[%s14260_s1 + $0xb90] sm:$0xff]  }
 0x151   :  { %10249 = vmatpush3.bf16.msra.mxu1 %v11199_v18  ;;  %v11238_v18 = vld [vmem:[%s14260_s1 + $0xbd0] sm:$0xff]  }
 0x152   :  { %10250 = vmatprep.subr.bf16.mxu1 %v11202_v21  ;;  %v11241_v21 = vld [vmem:[%s14260_s1 + $0xb08] sm:$0xff]  }
 0x153   :  { %10229 = vmatpush3.bf16.msra.mxu0 %v11201_v20  ;;  %v11240_v20 = vld [vmem:[%s14260_s1 + $0xb48] sm:$0xff]  }
 0x154   :  { %10230 = vmatprep.subr.bf16.mxu0 %v11204_v23  ;;  %v11243_v23 = vld [vmem:[%s14260_s1 + $0xb88] sm:$0xff]  }
 0x155   :  { %10251 = vmatpush3.bf16.msra.mxu1 %v11203_v22  ;;  %v11242_v22 = vld [vmem:[%s14260_s1 + $0xbc8] sm:$0xff]  }
 0x156   :  { %10252 = vmatprep.subr.bf16.mxu1 %v11206_v25  ;;  %v11245_v25 = vld [vmem:[%s14260_s1 + $0xb00] sm:$0xff]  }
 0x157   :  { %10231 = vmatpush3.bf16.msra.mxu0 %v11205_v24  ;;  %v11244_v24 = vld [vmem:[%s14260_s1 + $0xb40] sm:$0xff]  }
 0x158   :  { %10232 = vmatprep.subr.bf16.mxu0 %v11208_v27  ;;  %v11248_v27 = vld [vmem:[%s14260_s1 + $0xb80] sm:$0xff]  }
 0x159   :  { %10253 = vmatpush3.bf16.msra.mxu1 %v11207_v26  ;;  %v11246_v26 = vld [vmem:[%s14260_s1 + $0xbc0] sm:$0xff]  }
 0x15a   :  { %10254 = vmatprep.subr.bf16.mxu1 %v11210_v29  ;;  %v11249_v29 = vld [vmem:[%s14260_s1 + $0xc78] sm:$0xff]  }
 0x15b   :  { %10233 = vmatpush3.bf16.msra.mxu0 %v11209_v28  ;;  %v1891_v28 = vrot.slane %v12830_v43, %v11763_v34 }
 0x15c   :  { %10234 = vmatprep.subr.bf16.mxu0 %v11212_v31  ;;  %v11251_v31 = vld [vmem:[%s14260_s1 + $0xcf8] sm:$0xff]  }
 0x15d   :  { %10255 = vmatpush3.bf16.msra.mxu1 %v11211_v30  ;;  %v11250_v30 = vld [vmem:[%s14260_s1 + $0xc38] sm:$0xff]   ;;  %v1907_v35 = vcombine.high %v1891_v28, %v1891_v28 }
 0x15e   :  { %10256 = vmatprep.subr.bf16.mxu1 %v11214_v33 }
 0x15f   :  { %10235 = vmatpush3.bf16.msra.mxu0 %v11213_v32  ;;  %v11252_v32 = vld [vmem:[%s14260_s1 + $0xcb8] sm:$0xff]  }
 0x160   :  { %10264 = vmatprep.subr.bf16.mxu0 %v11216_v39 }
 0x161   :  { %10257 = vmatpush3.bf16.msra.mxu1 %v11215_v37  ;;  %v11254_v37 = vld [vmem:[%s14260_s1 + $0xc30] sm:$0xff]  }
 0x162   :  { %v9972_v48 = vpop.f32.mrf.mxu0  ;;  %10286 = vmatprep.subr.bf16.mxu1 %v11218_v44  ;;  %7861 = vmatmul.mubr.bf16.vlgmr.msra.gmra.mxu0 %v1884_v41 }
 0x163   :  { %10265 = vmatpush3.bf16.msra.mxu0 %v11217_v42  ;;  %7940 = vmatprep.mubr.bf16.mxu0 %v1905_v53  ;;  %v11256_v42 = vld [vmem:[%s14260_s1 + $0xcb0] sm:$0xff]   ;;  %v11260_v53 = vld [vmem:[%s14260_s1 + $0xca8] sm:$0xff]  }
 0x164   :  { %v9973_v54 = vpop.f32.mrf.mxu0  ;;  %v9994_v55 = vpop.f32.mrf.mxu1  ;;  %7901 = vmatmul.mubr.bf16.vlgmr.msra.gmra.mxu1 %v1906_v49  ;;  %10266 = vmatprep.subr.bf16.mxu0 %v11220_v50  ;;  %v11259_v50 = vld [vmem:[%s14260_s1 + $0xce8] sm:$0xff]  }
 0x165   :  { %v9974_v57 = vadd.f32 %v9973_v54, %v9972_v48  ;;  %10287 = vmatpush3.bf16.msra.mxu1 %v11219_v46  ;;  %7980 = vmatprep.mubr.bf16.mxu1 %v1909_v59  ;;  %v11258_v48 = vld [vmem:[%s14260_s1 + $0xc28] sm:$0xff]   ;;  %v11261_v54 = vld [vmem:[%s14260_s1 + $0xc60] sm:$0xff]   ;;  %v11265_v59 = vld [vmem:[%s14260_s1 + $0xc58] sm:$0xff]  }
 0x166   :  { %v9975_v60 = vpop.f32.mrf.mxu0  ;;  %v9995_v61 = vpop.f32.mrf.mxu1  ;;  %10288 = vmatprep.subr.bf16.mxu1 %v11222_v56  ;;  %v11262_v56 = vld [vmem:[%s14260_s1 + $0xc20] sm:$0xff]  }
 0x167   :  { %v7383_v63 = vadd.f32 %v9974_v57, %v12756_v13  ;;  %v9996_v0 = vadd.f32 %v9995_v61, %v9994_v55  ;;  %10267 = vmatpush3.bf16.msra.mxu0 %v11221_v52  ;;  %v11233_v13 = vld [vmem:[%s14260_s1 + $0xb18] sm:$0xff]   ;;  %v11263_v57 = vld [vmem:[%s14260_s1 + $0xce0] sm:$0xff]  }
 0x168   :  { %v9976_v2 = vpop.f32.mrf.mxu0  ;;  %v9997_v4 = vpop.f32.mrf.mxu1  ;;  %10268 = vmatprep.subr.bf16.mxu0 %v11224_v62  ;;  %v11266_v60 = vld [vmem:[%s14260_s1 + $0xc18] sm:$0xff]  }
 0x169   :  { %v12864_v5 = vadd.f32 %v9996_v0, %v7383_v63  ;;  %10289 = vmatpush3.bf16.msra.mxu1 %v11223_v58  ;;  %v11264_v58 = vld [vmem:[%s14260_s1 + $0xca0] sm:$0xff]   ;;  %v11267_v61 = vld [vmem:[%s14260_s1 + $0xcd8] sm:$0xff]   ;;  %v11269_v63 = vld [vmem:[%s14260_s1 + $0xc50] sm:$0xff]  }
 0x16a   :  { %v9998_v8 = vpop.f32.mrf.mxu1  ;;  %10290 = vmatprep.subr.bf16.mxu1 %v11226_v3  ;;  %v11268_v62 = vld [vmem:[%s14260_s1 + $0xc98] sm:$0xff]   ;;  %v11270_v0 = vld [vmem:[%s14260_s1 + $0xc10] sm:$0xff]   ;;  %v11273_v3 = vld [vmem:[%s14260_s1 + $0xc48] sm:$0xff]  }
 0x16b   :  { %10269 = vmatpush3.bf16.msra.mxu0 %v11225_v1  ;;  %v11271_v1 = vld [vmem:[%s14260_s1 + $0xcd0] sm:$0xff]   ;;  %v11274_v4 = vld [vmem:[%s14260_s1 + $0xc08] sm:$0xff]   ;;  %v11278_v8 = vld [vmem:[%s14260_s1 + $0xc00] sm:$0xff]  }
 0x16c   :  { %10270 = vmatprep.subr.bf16.mxu0 %v11228_v7  ;;  %v11272_v2 = vld [vmem:[%s14260_s1 + $0xc90] sm:$0xff]   ;;  %v11277_v7 = vld [vmem:[%s14260_s1 + $0xc40] sm:$0xff]  }
 0x16d   :  { %10291 = vmatpush3.bf16.msra.mxu1 %v11227_v6  ;;  %v11276_v6 = vld [vmem:[%s14260_s1 + $0xc88] sm:$0xff]  }
 0x16e   :  { %10292 = vmatprep.subr.bf16.mxu1 %v11230_v10  ;;  %v21_v10 = vld [vmem:[%s14261_s0 + $0x30] sm:$0xff] }
 0x16f   :  { %10271 = vmatpush3.bf16.msra.mxu0 %v11229_v9  ;;  %v11279_v9 = vld [vmem:[%s14260_s1 + $0xcc0] sm:$0xff]  }
 0x170   :  { %10272 = vmatprep.subr.bf16.mxu0 %v11232_v12  ;;  %v11280_v12 = vld [vmem:[%s14260_s1 + $0xc80] sm:$0xff]  }
 0x171   :  { %10293 = vmatpush3.bf16.msra.mxu1 %v11231_v11  ;;  %v1917_v11 = vrot.slane %v21_v10, %v11763_v34 }
 0x172   :  { %10294 = vmatprep.subr.bf16.mxu1 %v11234_v14  ;;  %v11281_v14 = vld [vmem:[%s14260_s1 + $0xd78] sm:$0xff]  }
 0x173   :  { %10273 = vmatpush3.bf16.msra.mxu0 %v11233_v13  ;;  %v1910_v13 = vcombine.high %v21_v10, %v21_v10  ;;  %v11318_v10 = vld [vmem:[%s14260_s1 + $0xe70] sm:$0xff]  }
 0x174   :  { %10274 = vmatprep.subr.bf16.mxu0 %v11236_v16  ;;  %v1933_v16 = vrot.slane %v1917_v11, %v11763_v34 }
 0x175   :  { %10295 = vmatpush3.bf16.msra.mxu1 %v11235_v15  ;;  %v1925_v15 = vcombine.high %v1917_v11, %v1917_v11 }
 0x176   :  { %10296 = vmatprep.subr.bf16.mxu1 %v11238_v18  ;;  %v13042_v18 = vrot.slane %v1910_v13, %v11763_v34  ;;  %v11320_v13 = vld [vmem:[%s14260_s1 + $0xef0] sm:$0xff]  }
 0x177   :  { %10275 = vmatpush3.bf16.msra.mxu0 %v11237_v17  ;;  %v11282_v17 = vld [vmem:[%s14260_s1 + $0xd38] sm:$0xff]  }
 0x178   :  { %10276 = vmatprep.subr.bf16.mxu0 %v11240_v20  ;;  %v1947_v20 = vrot.slane %v1925_v15, %v11763_v34 }
 0x179   :  { %10297 = vmatpush3.bf16.msra.mxu1 %v11239_v19  ;;  %v11283_v19 = vld [vmem:[%s14260_s1 + $0xdf8] sm:$0xff]  }
 0x17a   :  { %10298 = vmatprep.subr.bf16.mxu1 %v11242_v22  ;;  %v1926_v22 = vcombine.high %v13042_v18, %v13042_v18 }
 0x17b   :  { %10277 = vmatpush3.bf16.msra.mxu0 %v11241_v21  ;;  %v11284_v21 = vld [vmem:[%s14260_s1 + $0xdb8] sm:$0xff]  }
 0x17c   :  { %10278 = vmatprep.subr.bf16.mxu0 %v11244_v24  ;;  %v11285_v24 = vld [vmem:[%s14260_s1 + $0xd70] sm:$0xff]  }
 0x17d   :  { %10299 = vmatpush3.bf16.msra.mxu1 %v11243_v23  ;;  %v1955_v23 = vcombine.high %v1933_v16, %v1933_v16 }
 0x17e   :  { %10300 = vmatprep.subr.bf16.mxu1 %v11246_v26  ;;  %v1957_v26 = vcombine.high %v1947_v20, %v1947_v20 }
 0x17f   :  { %10279 = vmatpush3.bf16.msra.mxu0 %v11245_v25 }
 0x180   :  { %10308 = vmatprep.subr.bf16.mxu0 %v11249_v29  ;;  %v11287_v29 = vld [vmem:[%s14260_s1 + $0xdf0] sm:$0xff]  }
 0x181   :  { %10301 = vmatpush3.bf16.msra.mxu1 %v11248_v27  ;;  %v11286_v27 = vld [vmem:[%s14260_s1 + $0xd30] sm:$0xff]  }
 0x182   :  { %v10016_v33 = vpop.f32.mrf.mxu0  ;;  %7941 = vmatmul.mubr.bf16.vlgmr.msra.gmra.mxu0 %v1891_v28  ;;  %10330 = vmatprep.subr.bf16.mxu1 %v11251_v31  ;;  %v1954_v28 = vrot.slane %v1926_v22, %v11763_v34 }
 0x183   :  { %10309 = vmatpush3.bf16.msra.mxu0 %v11250_v30  ;;  %8020 = vmatprep.mubr.bf16.mxu0 %v1947_v20 }
 0x184   :  { %v10017_v38 = vpop.f32.mrf.mxu0  ;;  %v10038_v39 = vpop.f32.mrf.mxu1  ;;  %7981 = vmatmul.mubr.bf16.vlgmr.msra.gmra.mxu1 %v1907_v35  ;;  %10310 = vmatprep.subr.bf16.mxu0 %v11253_v36  ;;  %v11289_v36 = vld [vmem:[%s14260_s1 + $0xd68] sm:$0xff]  }
 0x185   :  { %v10018_v41 = vadd.f32 %v10017_v38, %v10016_v33  ;;  %10331 = vmatpush3.bf16.msra.mxu1 %v11252_v32  ;;  %8060 = vmatprep.mubr.bf16.mxu1 %v1957_v26  ;;  %v11288_v32 = vld [vmem:[%s14260_s1 + $0xdb0] sm:$0xff]   ;;  %v1958_v33 = vcombine.high %v1954_v28, %v1954_v28  ;;  %v11325_v26 = vld [vmem:[%s14260_s1 + $0xea8] sm:$0xff]  }
 0x186   :  { %v10019_v43 = vpop.f32.mrf.mxu0  ;;  %v10039_v44 = vpop.f32.mrf.mxu1  ;;  %10332 = vmatprep.subr.bf16.mxu1 %v11255_v40 }
 0x187   :  { %v7463_v46 = vadd.f32 %v10018_v41, %v12864_v5  ;;  %v10040_v47 = vadd.f32 %v10039_v44, %v10038_v39  ;;  %10311 = vmatpush3.bf16.msra.mxu0 %v11254_v37  ;;  %v11275_v5 = vld [vmem:[%s14260_s1 + $0xcc8] sm:$0xff]  }
 0x188   :  { %v10020_v49 = vpop.f32.mrf.mxu0  ;;  %v10041_v51 = vpop.f32.mrf.mxu1  ;;  %10312 = vmatprep.subr.bf16.mxu0 %v11257_v45  ;;  %v11290_v39 = vld [vmem:[%s14260_s1 + $0xd28] sm:$0xff]  }
 0x189   :  { %v12965_v52 = vadd.f32 %v10040_v47, %v7463_v46  ;;  %10333 = vmatpush3.bf16.msra.mxu1 %v11256_v42  ;;  %v11291_v42 = vld [vmem:[%s14260_s1 + $0xde8] sm:$0xff]   ;;  %v11293_v47 = vld [vmem:[%s14260_s1 + $0xd60] sm:$0xff]  }
 0x18a   :  { %v10042_v55 = vpop.f32.mrf.mxu1  ;;  %10334 = vmatprep.subr.bf16.mxu1 %v11259_v50  ;;  %v11292_v44 = vld [vmem:[%s14260_s1 + $0xda8] sm:$0xff]   ;;  %v11295_v50 = vld [vmem:[%s14260_s1 + $0xde0] sm:$0xff]  }
 0x18b   :  { %10313 = vmatpush3.bf16.msra.mxu0 %v11258_v48  ;;  %v11294_v48 = vld [vmem:[%s14260_s1 + $0xd20] sm:$0xff]   ;;  %v11300_v55 = vld [vmem:[%s14260_s1 + $0xd98] sm:$0xff]  }
 0x18c   :  { %10314 = vmatprep.subr.bf16.mxu0 %v11261_v54  ;;  %v11296_v51 = vld [vmem:[%s14260_s1 + $0xda0] sm:$0xff]   ;;  %v11299_v54 = vld [vmem:[%s14260_s1 + $0xdd8] sm:$0xff]  }
 0x18d   :  { %10335 = vmatpush3.bf16.msra.mxu1 %v11260_v53  ;;  %v11298_v53 = vld [vmem:[%s14260_s1 + $0xd18] sm:$0xff]  }
 0x18e   :  { %10336 = vmatprep.subr.bf16.mxu1 %v11263_v57  ;;  %v11302_v57 = vld [vmem:[%s14260_s1 + $0xd10] sm:$0xff]  }
 0x18f   :  { %10315 = vmatpush3.bf16.msra.mxu0 %v11262_v56  ;;  %v11301_v56 = vld [vmem:[%s14260_s1 + $0xd50] sm:$0xff]  }
 0x190   :  { %10316 = vmatprep.subr.bf16.mxu0 %v11265_v59  ;;  %v11304_v59 = vld [vmem:[%s14260_s1 + $0xd90] sm:$0xff]  }
 0x191   :  { %10337 = vmatpush3.bf16.msra.mxu1 %v11264_v58  ;;  %v11303_v58 = vld [vmem:[%s14260_s1 + $0xdd0] sm:$0xff]  }
 0x192   :  { %10338 = vmatprep.subr.bf16.mxu1 %v11267_v61  ;;  %v11306_v61 = vld [vmem:[%s14260_s1 + $0xd08] sm:$0xff]  }
 0x193   :  { %10317 = vmatpush3.bf16.msra.mxu0 %v11266_v60  ;;  %v11305_v60 = vld [vmem:[%s14260_s1 + $0xd48] sm:$0xff]  }
 0x194   :  { %10318 = vmatprep.subr.bf16.mxu0 %v11269_v63  ;;  %v11308_v63 = vld [vmem:[%s14260_s1 + $0xd88] sm:$0xff]  }
 0x195   :  { %10339 = vmatpush3.bf16.msra.mxu1 %v11268_v62  ;;  %v11307_v62 = vld [vmem:[%s14260_s1 + $0xdc8] sm:$0xff]  }
 0x196   :  { %10340 = vmatprep.subr.bf16.mxu1 %v11271_v1  ;;  %v11310_v1 = vld [vmem:[%s14260_s1 + $0xd00] sm:$0xff]  }
 0x197   :  { %10319 = vmatpush3.bf16.msra.mxu0 %v11270_v0  ;;  %v11309_v0 = vld [vmem:[%s14260_s1 + $0xd40] sm:$0xff]  }
 0x198   :  { %10320 = vmatprep.subr.bf16.mxu0 %v11273_v3  ;;  %v11313_v3 = vld [vmem:[%s14260_s1 + $0xd80] sm:$0xff]  }
 0x199   :  { %10341 = vmatpush3.bf16.msra.mxu1 %v11272_v2  ;;  %v11311_v2 = vld [vmem:[%s14260_s1 + $0xdc0] sm:$0xff]  }
 0x19a   :  { %10342 = vmatprep.subr.bf16.mxu1 %v11275_v5  ;;  %v11314_v5 = vld [vmem:[%s14260_s1 + $0xe78] sm:$0xff]  }
 0x19b   :  { %10321 = vmatpush3.bf16.msra.mxu0 %v11274_v4  ;;  %v1940_v4 = vrot.slane %v13042_v18, %v11763_v34  ;;  %v11322_v18 = vld [vmem:[%s14260_s1 + $0xe68] sm:$0xff]  }
 0x19c   :  { %10322 = vmatprep.subr.bf16.mxu0 %v11277_v7  ;;  %v11316_v7 = vld [vmem:[%s14260_s1 + $0xef8] sm:$0xff]  }
 0x19d   :  { %10343 = vmatpush3.bf16.msra.mxu1 %v11276_v6  ;;  %v11315_v6 = vld [vmem:[%s14260_s1 + $0xe38] sm:$0xff]  }
 0x19e   :  { %10344 = vmatprep.subr.bf16.mxu1 %v11279_v9  ;;  %v1956_v9 = vcombine.high %v1940_v4, %v1940_v4 }
 0x19f   :  { %10323 = vmatpush3.bf16.msra.mxu0 %v11278_v8  ;;  %v11317_v8 = vld [vmem:[%s14260_s1 + $0xeb8] sm:$0xff]  }
 0x1a0   :  { %10352 = vmatprep.subr.bf16.mxu0 %v11281_v14 }
 0x1a1   :  { %10345 = vmatpush3.bf16.msra.mxu1 %v11280_v12  ;;  %v11319_v12 = vld [vmem:[%s14260_s1 + $0xe30] sm:$0xff]  }
 0x1a2   :  { %v10060_v25 = vpop.f32.mrf.mxu0  ;;  %8021 = vmatmul.mubr.bf16.vlgmr.msra.gmra.mxu0 %v1933_v16  ;;  %10374 = vmatprep.subr.bf16.mxu1 %v11283_v19  ;;  %v11321_v16 = vld [vmem:[%s14260_s1 + $0xeb0] sm:$0xff]  }
 0x1a3   :  { %10353 = vmatpush3.bf16.msra.mxu0 %v11282_v17  ;;  %8100 = vmatprep.mubr.bf16.mxu0 %v1954_v28 }
 0x1a4   :  { %v10061_v30 = vpop.f32.mrf.mxu0  ;;  %v10082_v31 = vpop.f32.mrf.mxu1  ;;  %8061 = vmatmul.mubr.bf16.vlgmr.msra.gmra.mxu1 %v1955_v23  ;;  %10354 = vmatprep.subr.bf16.mxu0 %v11285_v24  ;;  %v11324_v24 = vld [vmem:[%s14260_s1 + $0xee8] sm:$0xff]  }
 0x1a5   :  { %v10062_v35 = vadd.f32 %v10061_v30, %v10060_v25  ;;  %10375 = vmatpush3.bf16.msra.mxu1 %v11284_v21  ;;  %8140 = vmatprep.mubr.bf16.mxu1 %v1958_v33  ;;  %v11323_v21 = vld [vmem:[%s14260_s1 + $0xe28] sm:$0xff]   ;;  %v11327_v30 = vld [vmem:[%s14260_s1 + $0xe20] sm:$0xff]  }
 0x1a6   :  { %v10063_v37 = vpop.f32.mrf.mxu0  ;;  %v10083_v38 = vpop.f32.mrf.mxu1  ;;  %10376 = vmatprep.subr.bf16.mxu1 %v11287_v29  ;;  %v11326_v29 = vld [vmem:[%s14260_s1 + $0xe60] sm:$0xff]  }
 0x1a7   :  { %v7543_v40 = vadd.f32 %v10062_v35, %v12965_v52  ;;  %v10084_v41 = vadd.f32 %v10083_v38, %v10082_v31  ;;  %10355 = vmatpush3.bf16.msra.mxu0 %v11286_v27  ;;  %v11297_v52 = vld [vmem:[%s14260_s1 + $0xd58] sm:$0xff]   ;;  %v11329_v33 = vld [vmem:[%s14260_s1 + $0xea0] sm:$0xff]  }
 0x1a8   :  { %v10064_v43 = vpop.f32.mrf.mxu0  ;;  %v10085_v45 = vpop.f32.mrf.mxu1  ;;  %10356 = vmatprep.subr.bf16.mxu0 %v11289_v36  ;;  %v11330_v35 = vld [vmem:[%s14260_s1 + $0xe58] sm:$0xff]  }
 0x1a9   :  { %v13079_v46 = vadd.f32 %v10084_v41, %v7543_v40  ;;  %10377 = vmatpush3.bf16.msra.mxu1 %v11288_v32  ;;  %v11328_v32 = vld [vmem:[%s14260_s1 + $0xee0] sm:$0xff]   ;;  %v11331_v36 = vld [vmem:[%s14260_s1 + $0xe18] sm:$0xff]   ;;  %v11335_v40 = vld [vmem:[%s14260_s1 + $0xe10] sm:$0xff]  }
 0x1aa   :  { %v10086_v49 = vpop.f32.mrf.mxu1  ;;  %10378 = vmatprep.subr.bf16.mxu1 %v11291_v42  ;;  %v11332_v37 = vld [vmem:[%s14260_s1 + $0xed8] sm:$0xff]   ;;  %v11336_v41 = vld [vmem:[%s14260_s1 + $0xed0] sm:$0xff]   ;;  %v11338_v43 = vld [vmem:[%s14260_s1 + $0xe48] sm:$0xff]  }
 0x1ab   :  { %10357 = vmatpush3.bf16.msra.mxu0 %v11290_v39  ;;  %v11333_v38 = vld [vmem:[%s14260_s1 + $0xe98] sm:$0xff]   ;;  %v11334_v39 = vld [vmem:[%s14260_s1 + $0xe50] sm:$0xff]   ;;  %v11340_v45 = vld [vmem:[%s14260_s1 + $0xec8] sm:$0xff]  }
 0x1ac   :  { %10358 = vmatprep.subr.bf16.mxu0 %v11293_v47  ;;  %v11337_v42 = vld [vmem:[%s14260_s1 + $0xe90] sm:$0xff]   ;;  %v11342_v47 = vld [vmem:[%s14260_s1 + $0xe40] sm:$0xff]  }
 0x1ad   :  { %10379 = vmatpush3.bf16.msra.mxu1 %v11292_v44  ;;  %v11339_v44 = vld [vmem:[%s14260_s1 + $0xe08] sm:$0xff]   ;;  %v11344_v49 = vld [vmem:[%s14260_s1 + $0xec0] sm:$0xff]  }
 0x1ae   :  { %10380 = vmatprep.subr.bf16.mxu1 %v11295_v50  ;;  %v22_v50 = vld [vmem:[%s14261_s0 + $0x38] sm:$0xff] }
 0x1af   :  { %10359 = vmatpush3.bf16.msra.mxu0 %v11294_v48  ;;  %v11343_v48 = vld [vmem:[%s14260_s1 + $0xe00] sm:$0xff]  }
 0x1b0   :  { %10360 = vmatprep.subr.bf16.mxu0 %v11297_v52  ;;  %v11345_v52 = vld [vmem:[%s14260_s1 + $0xe80] sm:$0xff]  }
 0x1b1   :  { %10381 = vmatpush3.bf16.msra.mxu1 %v11296_v51  ;;  %v1966_v51 = vrot.slane %v22_v50, %v11763_v34 }
 0x1b2   :  { %10382 = vmatprep.subr.bf16.mxu1 %v11299_v54  ;;  %v11346_v54 = vld [vmem:[%s14260_s1 + $0xf78] sm:$0xff]  }
 0x1b3   :  { %10361 = vmatpush3.bf16.msra.mxu0 %v11298_v53  ;;  %v1959_v53 = vcombine.high %v22_v50, %v22_v50  ;;  %v11383_v50 = vld [vmem:[%s14260_s1 + $0x1070] sm:$0xff]  }
 0x1b4   :  { %10362 = vmatprep.subr.bf16.mxu0 %v11301_v56  ;;  %v1982_v56 = vrot.slane %v1966_v51, %v11763_v34 }
 0x1b5   :  { %10383 = vmatpush3.bf16.msra.mxu1 %v11300_v55  ;;  %v1974_v55 = vcombine.high %v1966_v51, %v1966_v51 }
 0x1b6   :  { %10384 = vmatprep.subr.bf16.mxu1 %v11303_v58  ;;  %v13254_v58 = vrot.slane %v1959_v53, %v11763_v34  ;;  %v11385_v53 = vld [vmem:[%s14260_s1 + $0x10f0] sm:$0xff]  }
 0x1b7   :  { %10363 = vmatpush3.bf16.msra.mxu0 %v11302_v57  ;;  %v11347_v57 = vld [vmem:[%s14260_s1 + $0xf38] sm:$0xff]  }
 0x1b8   :  { %10364 = vmatprep.subr.bf16.mxu0 %v11305_v60  ;;  %v1996_v60 = vrot.slane %v1974_v55, %v11763_v34 }
 0x1b9   :  { %10385 = vmatpush3.bf16.msra.mxu1 %v11304_v59  ;;  %v11348_v59 = vld [vmem:[%s14260_s1 + $0xff8] sm:$0xff]  }
 0x1ba   :  { %10386 = vmatprep.subr.bf16.mxu1 %v11307_v62  ;;  %v1975_v62 = vcombine.high %v13254_v58, %v13254_v58 }
 0x1bb   :  { %10365 = vmatpush3.bf16.msra.mxu0 %v11306_v61  ;;  %v11349_v61 = vld [vmem:[%s14260_s1 + $0xfb8] sm:$0xff]  }
 0x1bc   :  { %10366 = vmatprep.subr.bf16.mxu0 %v11309_v0  ;;  %v11350_v0 = vld [vmem:[%s14260_s1 + $0xf70] sm:$0xff]  }
 0x1bd   :  { %10387 = vmatpush3.bf16.msra.mxu1 %v11308_v63  ;;  %v2004_v63 = vcombine.high %v1982_v56, %v1982_v56 }
 0x1be   :  { %10388 = vmatprep.subr.bf16.mxu1 %v11311_v2  ;;  %v2006_v2 = vcombine.high %v1996_v60, %v1996_v60 }
 0x1bf   :  { %10367 = vmatpush3.bf16.msra.mxu0 %v11310_v1 }
 0x1c0   :  { %10396 = vmatprep.subr.bf16.mxu0 %v11314_v5  ;;  %v11352_v5 = vld [vmem:[%s14260_s1 + $0xff0] sm:$0xff]  }
 0x1c1   :  { %10389 = vmatpush3.bf16.msra.mxu1 %v11313_v3  ;;  %v11351_v3 = vld [vmem:[%s14260_s1 + $0xf30] sm:$0xff]  }
 0x1c2   :  { %v10104_v11 = vpop.f32.mrf.mxu0  ;;  %8101 = vmatmul.mubr.bf16.vlgmr.msra.gmra.mxu0 %v1940_v4  ;;  %10418 = vmatprep.subr.bf16.mxu1 %v11316_v7  ;;  %v2003_v4 = vrot.slane %v1975_v62, %v11763_v34 }
 0x1c3   :  { %10397 = vmatpush3.bf16.msra.mxu0 %v11315_v6  ;;  %8180 = vmatprep.mubr.bf16.mxu0 %v1996_v60 }
 0x1c4   :  { %v10105_v14 = vpop.f32.mrf.mxu0  ;;  %v10126_v15 = vpop.f32.mrf.mxu1  ;;  %8141 = vmatmul.mubr.bf16.vlgmr.msra.gmra.mxu1 %v1956_v9  ;;  %10398 = vmatprep.subr.bf16.mxu0 %v11318_v10  ;;  %v2007_v9 = vcombine.high %v2003_v4, %v2003_v4 }
 0x1c5   :  { %v10106_v17 = vadd.f32 %v10105_v14, %v10104_v11  ;;  %10419 = vmatpush3.bf16.msra.mxu1 %v11317_v8  ;;  %8220 = vmatprep.mubr.bf16.mxu1 %v2006_v2  ;;  %v11353_v8 = vld [vmem:[%s14260_s1 + $0xfb0] sm:$0xff]   ;;  %v11354_v11 = vld [vmem:[%s14260_s1 + $0xf68] sm:$0xff]  }
 0x1c6   :  { %v10107_v19 = vpop.f32.mrf.mxu0  ;;  %v10127_v20 = vpop.f32.mrf.mxu1  ;;  %10420 = vmatprep.subr.bf16.mxu1 %v11320_v13  ;;  %v11355_v14 = vld [vmem:[%s14260_s1 + $0xf28] sm:$0xff]  }
 0x1c7   :  { %v7623_v22 = vadd.f32 %v10106_v17, %v13079_v46  ;;  %v10128_v23 = vadd.f32 %v10127_v20, %v10126_v15  ;;  %10399 = vmatpush3.bf16.msra.mxu0 %v11319_v12  ;;  %v11341_v46 = vld [vmem:[%s14260_s1 + $0xe88] sm:$0xff]  }
 0x1c8   :  { %v10108_v25 = vpop.f32.mrf.mxu0  ;;  %v10129_v27 = vpop.f32.mrf.mxu1  ;;  %10400 = vmatprep.subr.bf16.mxu0 %v11322_v18  ;;  %v11356_v17 = vld [vmem:[%s14260_s1 + $0xfe8] sm:$0xff]  }
 0x1c9   :  { %v13180_v28 = vadd.f32 %v10128_v23, %v7623_v22  ;;  %10421 = vmatpush3.bf16.msra.mxu1 %v11321_v16  ;;  %v11357_v19 = vld [vmem:[%s14260_s1 + $0xfa8] sm:$0xff]   ;;  %v11358_v22 = vld [vmem:[%s14260_s1 + $0xf60] sm:$0xff]   ;;  %v11362_v27 = vld [vmem:[%s14260_s1 + $0xf58] sm:$0xff]  }
 0x1ca   :  { %v10130_v31 = vpop.f32.mrf.mxu1  ;;  %10422 = vmatprep.subr.bf16.mxu1 %v11324_v24  ;;  %v11359_v23 = vld [vmem:[%s14260_s1 + $0xf20] sm:$0xff]   ;;  %v11390_v2 = vld [vmem:[%s14260_s1 + $0x10a8] sm:$0xff]  }
 0x1cb   :  { %10401 = vmatpush3.bf16.msra.mxu0 %v11323_v21  ;;  %v11360_v25 = vld [vmem:[%s14260_s1 + $0xfe0] sm:$0xff]   ;;  %v11366_v31 = vld [vmem:[%s14260_s1 + $0xf50] sm:$0xff]  }
 0x1cc   :  { %10402 = vmatprep.subr.bf16.mxu0 %v11326_v29  ;;  %v11364_v29 = vld [vmem:[%s14260_s1 + $0xfd8] sm:$0xff]  }
 0x1cd   :  { %10423 = vmatpush3.bf16.msra.mxu1 %v11325_v26  ;;  %v11361_v26 = vld [vmem:[%s14260_s1 + $0xfa0] sm:$0xff]  }
 0x1ce   :  { %10424 = vmatprep.subr.bf16.mxu1 %v11328_v32  ;;  %v11367_v32 = vld [vmem:[%s14260_s1 + $0xf10] sm:$0xff]  }
 0x1cf   :  { %10403 = vmatpush3.bf16.msra.mxu0 %v11327_v30  ;;  %v11365_v30 = vld [vmem:[%s14260_s1 + $0xf98] sm:$0xff]  }
 0x1d0   :  { %10404 = vmatprep.subr.bf16.mxu0 %v11330_v35  ;;  %v11369_v35 = vld [vmem:[%s14260_s1 + $0xf90] sm:$0xff]  }
 0x1d1   :  { %10425 = vmatpush3.bf16.msra.mxu1 %v11329_v33  ;;  %v11368_v33 = vld [vmem:[%s14260_s1 + $0xfd0] sm:$0xff]  }
 0x1d2   :  { %10426 = vmatprep.subr.bf16.mxu1 %v11332_v37  ;;  %v11371_v37 = vld [vmem:[%s14260_s1 + $0xf08] sm:$0xff]  }
 0x1d3   :  { %10405 = vmatpush3.bf16.msra.mxu0 %v11331_v36  ;;  %v11370_v36 = vld [vmem:[%s14260_s1 + $0xf48] sm:$0xff]  }
 0x1d4   :  { %10406 = vmatprep.subr.bf16.mxu0 %v11334_v39  ;;  %v11373_v39 = vld [vmem:[%s14260_s1 + $0xf88] sm:$0xff]  }
 0x1d5   :  { %10427 = vmatpush3.bf16.msra.mxu1 %v11333_v38  ;;  %v11372_v38 = vld [vmem:[%s14260_s1 + $0xfc8] sm:$0xff]  }
 0x1d6   :  { %10428 = vmatprep.subr.bf16.mxu1 %v11336_v41  ;;  %v11375_v41 = vld [vmem:[%s14260_s1 + $0xf00] sm:$0xff]  }
 0x1d7   :  { %10407 = vmatpush3.bf16.msra.mxu0 %v11335_v40  ;;  %v11374_v40 = vld [vmem:[%s14260_s1 + $0xf40] sm:$0xff]  }
 0x1d8   :  { %10408 = vmatprep.subr.bf16.mxu0 %v11338_v43  ;;  %v11378_v43 = vld [vmem:[%s14260_s1 + $0xf80] sm:$0xff]  }
 0x1d9   :  { %10429 = vmatpush3.bf16.msra.mxu1 %v11337_v42  ;;  %v11376_v42 = vld [vmem:[%s14260_s1 + $0xfc0] sm:$0xff]  }
 0x1da   :  { %10430 = vmatprep.subr.bf16.mxu1 %v11340_v45  ;;  %v11379_v45 = vld [vmem:[%s14260_s1 + $0x1078] sm:$0xff]  }
 0x1db   :  { %10409 = vmatpush3.bf16.msra.mxu0 %v11339_v44  ;;  %v1989_v44 = vrot.slane %v13254_v58, %v11763_v34  ;;  %v11387_v58 = vld [vmem:[%s14260_s1 + $0x1068] sm:$0xff]  }
 0x1dc   :  { %10410 = vmatprep.subr.bf16.mxu0 %v11342_v47  ;;  %v11381_v47 = vld [vmem:[%s14260_s1 + $0x10f8] sm:$0xff]  }
 0x1dd   :  { %10431 = vmatpush3.bf16.msra.mxu1 %v11341_v46  ;;  %v11380_v46 = vld [vmem:[%s14260_s1 + $0x1038] sm:$0xff]  }
 0x1de   :  { %10432 = vmatprep.subr.bf16.mxu1 %v11344_v49  ;;  %v2005_v49 = vcombine.high %v1989_v44, %v1989_v44 }
 0x1df   :  { %10411 = vmatpush3.bf16.msra.mxu0 %v11343_v48  ;;  %v11382_v48 = vld [vmem:[%s14260_s1 + $0x10b8] sm:$0xff]  }
 0x1e0   :  { %10440 = vmatprep.subr.bf16.mxu0 %v11346_v54 }
 0x1e1   :  { %10433 = vmatpush3.bf16.msra.mxu1 %v11345_v52  ;;  %v11384_v52 = vld [vmem:[%s14260_s1 + $0x1030] sm:$0xff]  }
 0x1e2   :  { %v10148_v1 = vpop.f32.mrf.mxu0  ;;  %8181 = vmatmul.mubr.bf16.vlgmr.msra.gmra.mxu0 %v1982_v56  ;;  %10462 = vmatprep.subr.bf16.mxu1 %v11348_v59  ;;  %v11386_v56 = vld [vmem:[%s14260_s1 + $0x10b0] sm:$0xff]  }
 0x1e3   :  { %10441 = vmatpush3.bf16.msra.mxu0 %v11347_v57  ;;  %8260 = vmatprep.mubr.bf16.mxu0 %v2003_v4 }
 0x1e4   :  { %v10149_v6 = vpop.f32.mrf.mxu0  ;;  %v10170_v7 = vpop.f32.mrf.mxu1  ;;  %8221 = vmatmul.mubr.bf16.vlgmr.msra.gmra.mxu1 %v2004_v63  ;;  %10442 = vmatprep.subr.bf16.mxu0 %v11350_v0  ;;  %v11389_v0 = vld [vmem:[%s14260_s1 + $0x10e8] sm:$0xff]  }
 0x1e5   :  { %v10150_v10 = vadd.f32 %v10149_v6, %v10148_v1  ;;  %10463 = vmatpush3.bf16.msra.mxu1 %v11349_v61  ;;  %8300 = vmatprep.mubr.bf16.mxu1 %v2007_v9  ;;  %v11388_v61 = vld [vmem:[%s14260_s1 + $0x1028] sm:$0xff]   ;;  %v11392_v6 = vld [vmem:[%s14260_s1 + $0x1020] sm:$0xff]  }
 0x1e6   :  { %v10151_v12 = vpop.f32.mrf.mxu0  ;;  %v10171_v13 = vpop.f32.mrf.mxu1  ;;  %10464 = vmatprep.subr.bf16.mxu1 %v11352_v5  ;;  %v11391_v5 = vld [vmem:[%s14260_s1 + $0x1060] sm:$0xff]  }
 0x1e7   :  { %v7703_v15 = vadd.f32 %v10150_v10, %v13180_v28  ;;  %v10172_v16 = vadd.f32 %v10171_v13, %v10170_v7  ;;  %10443 = vmatpush3.bf16.msra.mxu0 %v11351_v3  ;;  %v11363_v28 = vld [vmem:[%s14260_s1 + $0xf18] sm:$0xff]   ;;  %v11394_v9 = vld [vmem:[%s14260_s1 + $0x10a0] sm:$0xff]  }
 0x1e8   :  { %v10152_v18 = vpop.f32.mrf.mxu0  ;;  %v10173_v20 = vpop.f32.mrf.mxu1  ;;  %10444 = vmatprep.subr.bf16.mxu0 %v11354_v11  ;;  %v11395_v10 = vld [vmem:[%s14260_s1 + $0x1058] sm:$0xff]  }
 0x1e9   :  { %v13291_v21 = vadd.f32 %v10172_v16, %v7703_v15  ;;  %10465 = vmatpush3.bf16.msra.mxu1 %v11353_v8  ;;  %v11393_v8 = vld [vmem:[%s14260_s1 + $0x10e0] sm:$0xff]   ;;  %v11396_v11 = vld [vmem:[%s14260_s1 + $0x1018] sm:$0xff]   ;;  %v11400_v15 = vld [vmem:[%s14260_s1 + $0x1010] sm:$0xff]  }
 0x1ea   :  { %v10174_v24 = vpop.f32.mrf.mxu1  ;;  %10466 = vmatprep.subr.bf16.mxu1 %v11356_v17  ;;  %v11397_v12 = vld [vmem:[%s14260_s1 + $0x10d8] sm:$0xff]   ;;  %v11401_v16 = vld [vmem:[%s14260_s1 + $0x10d0] sm:$0xff]   ;;  %v11403_v18 = vld [vmem:[%s14260_s1 + $0x1048] sm:$0xff]  }
 0x1eb   :  { %10445 = vmatpush3.bf16.msra.mxu0 %v11355_v14  ;;  %v11398_v13 = vld [vmem:[%s14260_s1 + $0x1098] sm:$0xff]   ;;  %v11399_v14 = vld [vmem:[%s14260_s1 + $0x1050] sm:$0xff]   ;;  %v11405_v20 = vld [vmem:[%s14260_s1 + $0x10c8] sm:$0xff]  }
 0x1ec   :  { %10446 = vmatprep.subr.bf16.mxu0 %v11358_v22  ;;  %v11402_v17 = vld [vmem:[%s14260_s1 + $0x1090] sm:$0xff]   ;;  %v11407_v22 = vld [vmem:[%s14260_s1 + $0x1040] sm:$0xff]  }
 0x1ed   :  { %10467 = vmatpush3.bf16.msra.mxu1 %v11357_v19  ;;  %v11404_v19 = vld [vmem:[%s14260_s1 + $0x1008] sm:$0xff]   ;;  %v11409_v24 = vld [vmem:[%s14260_s1 + $0x10c0] sm:$0xff]  }
 0x1ee   :  { %10468 = vmatprep.subr.bf16.mxu1 %v11360_v25  ;;  %v23_v25 = vld [vmem:[%s14261_s0 + $0x40] sm:$0xff] }
 0x1ef   :  { %10447 = vmatpush3.bf16.msra.mxu0 %v11359_v23  ;;  %v11408_v23 = vld [vmem:[%s14260_s1 + $0x1000] sm:$0xff]  }
 0x1f0   :  { %10448 = vmatprep.subr.bf16.mxu0 %v11362_v27  ;;  %v11410_v27 = vld [vmem:[%s14260_s1 + $0x1080] sm:$0xff]  }
 0x1f1   :  { %10469 = vmatpush3.bf16.msra.mxu1 %v11361_v26  ;;  %v2015_v26 = vrot.slane %v23_v25, %v11763_v34 }
 0x1f2   :  { %10470 = vmatprep.subr.bf16.mxu1 %v11364_v29  ;;  %v11411_v29 = vld [vmem:[%s14260_s1 + $0x1178] sm:$0xff]  }
 0x1f3   :  { %10449 = vmatpush3.bf16.msra.mxu0 %v11363_v28  ;;  %v2008_v28 = vcombine.high %v23_v25, %v23_v25  ;;  %v11448_v25 = vld [vmem:[%s14260_s1 + $0x1270] sm:$0xff]  }
 0x1f4   :  { %10450 = vmatprep.subr.bf16.mxu0 %v11366_v31  ;;  %v2031_v31 = vrot.slane %v2015_v26, %v11763_v34 }
 0x1f5   :  { %10471 = vmatpush3.bf16.msra.mxu1 %v11365_v30  ;;  %v2023_v30 = vcombine.high %v2015_v26, %v2015_v26 }
 0x1f6   :  { %10472 = vmatprep.subr.bf16.mxu1 %v11368_v33  ;;  %v13466_v33 = vrot.slane %v2008_v28, %v11763_v34  ;;  %v11450_v28 = vld [vmem:[%s14260_s1 + $0x12f0] sm:$0xff]  }
 0x1f7   :  { %10451 = vmatpush3.bf16.msra.mxu0 %v11367_v32  ;;  %v11412_v32 = vld [vmem:[%s14260_s1 + $0x1138] sm:$0xff]  }
 0x1f8   :  { %10452 = vmatprep.subr.bf16.mxu0 %v11370_v36  ;;  %v2045_v36 = vrot.slane %v2023_v30, %v11763_v34 }
 0x1f9   :  { %10473 = vmatpush3.bf16.msra.mxu1 %v11369_v35  ;;  %v11413_v35 = vld [vmem:[%s14260_s1 + $0x11f8] sm:$0xff]  }
 0x1fa   :  { %10474 = vmatprep.subr.bf16.mxu1 %v11372_v38  ;;  %v2024_v38 = vcombine.high %v13466_v33, %v13466_v33 }
 0x1fb   :  { %10453 = vmatpush3.bf16.msra.mxu0 %v11371_v37  ;;  %v11414_v37 = vld [vmem:[%s14260_s1 + $0x11b8] sm:$0xff]  }
 0x1fc   :  { %10454 = vmatprep.subr.bf16.mxu0 %v11374_v40  ;;  %v11415_v40 = vld [vmem:[%s14260_s1 + $0x1170] sm:$0xff]  }
 0x1fd   :  { %10475 = vmatpush3.bf16.msra.mxu1 %v11373_v39  ;;  %v2053_v39 = vcombine.high %v2031_v31, %v2031_v31 }
 0x1fe   :  { %10476 = vmatprep.subr.bf16.mxu1 %v11376_v42  ;;  %v2055_v42 = vcombine.high %v2045_v36, %v2045_v36 }
 0x1ff   :  { %10455 = vmatpush3.bf16.msra.mxu0 %v11375_v41 }
 0x200   :  { %10484 = vmatprep.subr.bf16.mxu0 %v11379_v45  ;;  %v11417_v45 = vld [vmem:[%s14260_s1 + $0x11f0] sm:$0xff]  }
 0x201   :  { %10477 = vmatpush3.bf16.msra.mxu1 %v11378_v43  ;;  %v11416_v43 = vld [vmem:[%s14260_s1 + $0x1130] sm:$0xff]  }
 0x202   :  { %v10192_v51 = vpop.f32.mrf.mxu0  ;;  %8261 = vmatmul.mubr.bf16.vlgmr.msra.gmra.mxu0 %v1989_v44  ;;  %10506 = vmatprep.subr.bf16.mxu1 %v11381_v47  ;;  %v2052_v44 = vrot.slane %v2024_v38, %v11763_v34 }
 0x203   :  { %10485 = vmatpush3.bf16.msra.mxu0 %v11380_v46  ;;  %8340 = vmatprep.mubr.bf16.mxu0 %v2045_v36 }
 0x204   :  { %v10193_v54 = vpop.f32.mrf.mxu0  ;;  %v10214_v55 = vpop.f32.mrf.mxu1  ;;  %8301 = vmatmul.mubr.bf16.vlgmr.msra.gmra.mxu1 %v2005_v49  ;;  %10486 = vmatprep.subr.bf16.mxu0 %v11383_v50  ;;  %v2056_v49 = vcombine.high %v2052_v44, %v2052_v44 }
 0x205   :  { %v10194_v57 = vadd.f32 %v10193_v54, %v10192_v51  ;;  %10507 = vmatpush3.bf16.msra.mxu1 %v11382_v48  ;;  %8380 = vmatprep.mubr.bf16.mxu1 %v2055_v42  ;;  %v11418_v48 = vld [vmem:[%s14260_s1 + $0x11b0] sm:$0xff]   ;;  %v11419_v51 = vld [vmem:[%s14260_s1 + $0x1168] sm:$0xff]  }
 0x206   :  { %v10195_v59 = vpop.f32.mrf.mxu0  ;;  %v10215_v60 = vpop.f32.mrf.mxu1  ;;  %10508 = vmatprep.subr.bf16.mxu1 %v11385_v53  ;;  %v11420_v54 = vld [vmem:[%s14260_s1 + $0x1128] sm:$0xff]  }
 0x207   :  { %v7783_v62 = vadd.f32 %v10194_v57, %v13291_v21  ;;  %v10216_v63 = vadd.f32 %v10215_v60, %v10214_v55  ;;  %10487 = vmatpush3.bf16.msra.mxu0 %v11384_v52  ;;  %v11406_v21 = vld [vmem:[%s14260_s1 + $0x1088] sm:$0xff]  }
 0x208   :  { %v10196_v1 = vpop.f32.mrf.mxu0  ;;  %v10217_v3 = vpop.f32.mrf.mxu1  ;;  %10488 = vmatprep.subr.bf16.mxu0 %v11387_v58  ;;  %v11421_v57 = vld [vmem:[%s14260_s1 + $0x11e8] sm:$0xff]  }
 0x209   :  { %v13392_v4 = vadd.f32 %v10216_v63, %v7783_v62  ;;  %10509 = vmatpush3.bf16.msra.mxu1 %v11386_v56  ;;  %v11422_v59 = vld [vmem:[%s14260_s1 + $0x11a8] sm:$0xff]   ;;  %v11423_v62 = vld [vmem:[%s14260_s1 + $0x1160] sm:$0xff]   ;;  %v11427_v3 = vld [vmem:[%s14260_s1 + $0x1158] sm:$0xff]  }
 0x20a   :  { %v10218_v7 = vpop.f32.mrf.mxu1  ;;  %10510 = vmatprep.subr.bf16.mxu1 %v11389_v0  ;;  %v11424_v63 = vld [vmem:[%s14260_s1 + $0x1120] sm:$0xff]   ;;  %v11455_v42 = vld [vmem:[%s14260_s1 + $0x12a8] sm:$0xff]  }
 0x20b   :  { %10489 = vmatpush3.bf16.msra.mxu0 %v11388_v61  ;;  %v11425_v1 = vld [vmem:[%s14260_s1 + $0x11e0] sm:$0xff]   ;;  %v11431_v7 = vld [vmem:[%s14260_s1 + $0x1150] sm:$0xff]  }
 0x20c   :  { %10490 = vmatprep.subr.bf16.mxu0 %v11391_v5  ;;  %v11429_v5 = vld [vmem:[%s14260_s1 + $0x11d8] sm:$0xff]  }
 0x20d   :  { %10511 = vmatpush3.bf16.msra.mxu1 %v11390_v2  ;;  %v11426_v2 = vld [vmem:[%s14260_s1 + $0x11a0] sm:$0xff]  }
 0x20e   :  { %10512 = vmatprep.subr.bf16.mxu1 %v11393_v8  ;;  %v11432_v8 = vld [vmem:[%s14260_s1 + $0x1110] sm:$0xff]  }
 0x20f   :  { %10491 = vmatpush3.bf16.msra.mxu0 %v11392_v6  ;;  %v11430_v6 = vld [vmem:[%s14260_s1 + $0x1198] sm:$0xff]  }
 0x210   :  { %10492 = vmatprep.subr.bf16.mxu0 %v11395_v10  ;;  %v11434_v10 = vld [vmem:[%s14260_s1 + $0x1190] sm:$0xff]  }
 0x211   :  { %10513 = vmatpush3.bf16.msra.mxu1 %v11394_v9  ;;  %v11433_v9 = vld [vmem:[%s14260_s1 + $0x11d0] sm:$0xff]  }
 0x212   :  { %10514 = vmatprep.subr.bf16.mxu1 %v11397_v12  ;;  %v11436_v12 = vld [vmem:[%s14260_s1 + $0x1108] sm:$0xff]  }
 0x213   :  { %10493 = vmatpush3.bf16.msra.mxu0 %v11396_v11  ;;  %v11435_v11 = vld [vmem:[%s14260_s1 + $0x1148] sm:$0xff]  }
 0x214   :  { %10494 = vmatprep.subr.bf16.mxu0 %v11399_v14  ;;  %v11438_v14 = vld [vmem:[%s14260_s1 + $0x1188] sm:$0xff]  }
 0x215   :  { %10515 = vmatpush3.bf16.msra.mxu1 %v11398_v13  ;;  %v11437_v13 = vld [vmem:[%s14260_s1 + $0x11c8] sm:$0xff]  }
 0x216   :  { %10516 = vmatprep.subr.bf16.mxu1 %v11401_v16  ;;  %v11440_v16 = vld [vmem:[%s14260_s1 + $0x1100] sm:$0xff]  }
 0x217   :  { %10495 = vmatpush3.bf16.msra.mxu0 %v11400_v15  ;;  %v11439_v15 = vld [vmem:[%s14260_s1 + $0x1140] sm:$0xff]  }
 0x218   :  { %10496 = vmatprep.subr.bf16.mxu0 %v11403_v18  ;;  %v11443_v18 = vld [vmem:[%s14260_s1 + $0x1180] sm:$0xff]  }
 0x219   :  { %10517 = vmatpush3.bf16.msra.mxu1 %v11402_v17  ;;  %v11441_v17 = vld [vmem:[%s14260_s1 + $0x11c0] sm:$0xff]  }
 0x21a   :  { %10518 = vmatprep.subr.bf16.mxu1 %v11405_v20  ;;  %v11444_v20 = vld [vmem:[%s14260_s1 + $0x1278] sm:$0xff]  }
 0x21b   :  { %10497 = vmatpush3.bf16.msra.mxu0 %v11404_v19  ;;  %v2038_v19 = vrot.slane %v13466_v33, %v11763_v34  ;;  %v11452_v33 = vld [vmem:[%s14260_s1 + $0x1268] sm:$0xff]  }
 0x21c   :  { %10498 = vmatprep.subr.bf16.mxu0 %v11407_v22  ;;  %v11446_v22 = vld [vmem:[%s14260_s1 + $0x12f8] sm:$0xff]  }
 0x21d   :  { %10519 = vmatpush3.bf16.msra.mxu1 %v11406_v21  ;;  %v11445_v21 = vld [vmem:[%s14260_s1 + $0x1238] sm:$0xff]  }
 0x21e   :  { %10520 = vmatprep.subr.bf16.mxu1 %v11409_v24  ;;  %v2054_v24 = vcombine.high %v2038_v19, %v2038_v19 }
 0x21f   :  { %10499 = vmatpush3.bf16.msra.mxu0 %v11408_v23  ;;  %v11447_v23 = vld [vmem:[%s14260_s1 + $0x12b8] sm:$0xff]  }
 0x220   :  { %10528 = vmatprep.subr.bf16.mxu0 %v11411_v29 }
 0x221   :  { %10521 = vmatpush3.bf16.msra.mxu1 %v11410_v27  ;;  %v11449_v27 = vld [vmem:[%s14260_s1 + $0x1230] sm:$0xff]  }
 0x222   :  { %v10236_v41 = vpop.f32.mrf.mxu0  ;;  %10550 = vmatprep.subr.bf16.mxu1 %v11413_v35  ;;  %8341 = vmatmul.mubr.bf16.vlgmr.msra.gmra.mxu0 %v2031_v31  ;;  %v11451_v31 = vld [vmem:[%s14260_s1 + $0x12b0] sm:$0xff]  }
 0x223   :  { %10529 = vmatpush3.bf16.msra.mxu0 %v11412_v32  ;;  %8420 = vmatprep.mubr.bf16.mxu0 %v2052_v44 }
 0x224   :  { %v10237_v46 = vpop.f32.mrf.mxu0  ;;  %v10258_v47 = vpop.f32.mrf.mxu1  ;;  %8381 = vmatmul.mubr.bf16.vlgmr.msra.gmra.mxu1 %v2053_v39  ;;  %10530 = vmatprep.subr.bf16.mxu0 %v11415_v40  ;;  %v11454_v40 = vld [vmem:[%s14260_s1 + $0x12e8] sm:$0xff]  }
 0x225   :  { %v10238_v50 = vadd.f32 %v10237_v46, %v10236_v41  ;;  %10551 = vmatpush3.bf16.msra.mxu1 %v11414_v37  ;;  %8460 = vmatprep.mubr.bf16.mxu1 %v2056_v49  ;;  %v11453_v37 = vld [vmem:[%s14260_s1 + $0x1228] sm:$0xff]   ;;  %v11457_v46 = vld [vmem:[%s14260_s1 + $0x1220] sm:$0xff]  }
 0x226   :  { %v10239_v52 = vpop.f32.mrf.mxu0  ;;  %v10259_v53 = vpop.f32.mrf.mxu1  ;;  %10552 = vmatprep.subr.bf16.mxu1 %v11417_v45  ;;  %v11456_v45 = vld [vmem:[%s14260_s1 + $0x1260] sm:$0xff]  }
 0x227   :  { %v7863_v55 = vadd.f32 %v10238_v50, %v13392_v4  ;;  %v10260_v56 = vadd.f32 %v10259_v53, %v10258_v47  ;;  %10531 = vmatpush3.bf16.msra.mxu0 %v11416_v43  ;;  %v11428_v4 = vld [vmem:[%s14260_s1 + $0x1118] sm:$0xff]   ;;  %v11459_v49 = vld [vmem:[%s14260_s1 + $0x12a0] sm:$0xff]  }
 0x228   :  { %v10240_v58 = vpop.f32.mrf.mxu0  ;;  %v10261_v60 = vpop.f32.mrf.mxu1  ;;  %10532 = vmatprep.subr.bf16.mxu0 %v11419_v51  ;;  %v11460_v50 = vld [vmem:[%s14260_s1 + $0x1258] sm:$0xff]  }
 0x229   :  { %v13503_v61 = vadd.f32 %v10260_v56, %v7863_v55  ;;  %10553 = vmatpush3.bf16.msra.mxu1 %v11418_v48  ;;  %v11458_v48 = vld [vmem:[%s14260_s1 + $0x12e0] sm:$0xff]   ;;  %v11461_v51 = vld [vmem:[%s14260_s1 + $0x1218] sm:$0xff]   ;;  %v11465_v55 = vld [vmem:[%s14260_s1 + $0x1210] sm:$0xff]  }
 0x22a   :  { %v10262_v0 = vpop.f32.mrf.mxu1  ;;  %10554 = vmatprep.subr.bf16.mxu1 %v11421_v57  ;;  %v11462_v52 = vld [vmem:[%s14260_s1 + $0x12d8] sm:$0xff]   ;;  %v11466_v56 = vld [vmem:[%s14260_s1 + $0x12d0] sm:$0xff]   ;;  %v11468_v58 = vld [vmem:[%s14260_s1 + $0x1248] sm:$0xff]  }
 0x22b   :  { %10533 = vmatpush3.bf16.msra.mxu0 %v11420_v54  ;;  %v11463_v53 = vld [vmem:[%s14260_s1 + $0x1298] sm:$0xff]   ;;  %v11464_v54 = vld [vmem:[%s14260_s1 + $0x1250] sm:$0xff]   ;;  %v11470_v60 = vld [vmem:[%s14260_s1 + $0x12c8] sm:$0xff]  }
 0x22c   :  { %10534 = vmatprep.subr.bf16.mxu0 %v11423_v62  ;;  %v11467_v57 = vld [vmem:[%s14260_s1 + $0x1290] sm:$0xff]   ;;  %v11472_v62 = vld [vmem:[%s14260_s1 + $0x1240] sm:$0xff]  }
 0x22d   :  { %10555 = vmatpush3.bf16.msra.mxu1 %v11422_v59  ;;  %v11469_v59 = vld [vmem:[%s14260_s1 + $0x1208] sm:$0xff]   ;;  %v11474_v0 = vld [vmem:[%s14260_s1 + $0x12c0] sm:$0xff]  }
 0x22e   :  { %10556 = vmatprep.subr.bf16.mxu1 %v11425_v1  ;;  %v24_v1 = vld [vmem:[%s14261_s0 + $0x48] sm:$0xff] }
 0x22f   :  { %10535 = vmatpush3.bf16.msra.mxu0 %v11424_v63  ;;  %v11473_v63 = vld [vmem:[%s14260_s1 + $0x1200] sm:$0xff]  }
 0x230   :  { %10536 = vmatprep.subr.bf16.mxu0 %v11427_v3  ;;  %v11475_v3 = vld [vmem:[%s14260_s1 + $0x1280] sm:$0xff]  }
 0x231   :  { %10557 = vmatpush3.bf16.msra.mxu1 %v11426_v2  ;;  %v2064_v2 = vrot.slane %v24_v1, %v11763_v34 }
 0x232   :  { %10558 = vmatprep.subr.bf16.mxu1 %v11429_v5  ;;  %v11476_v5 = vld [vmem:[%s14260_s1 + $0x1378] sm:$0xff]  }
 0x233   :  { %10537 = vmatpush3.bf16.msra.mxu0 %v11428_v4  ;;  %v2057_v4 = vcombine.high %v24_v1, %v24_v1  ;;  %v11513_v1 = vld [vmem:[%s14260_s1 + $0x1470] sm:$0xff]  }
 0x234   :  { %10538 = vmatprep.subr.bf16.mxu0 %v11431_v7  ;;  %v2080_v7 = vrot.slane %v2064_v2, %v11763_v34 }
 0x235   :  { %10559 = vmatpush3.bf16.msra.mxu1 %v11430_v6  ;;  %v2072_v6 = vcombine.high %v2064_v2, %v2064_v2 }
 0x236   :  { %10560 = vmatprep.subr.bf16.mxu1 %v11433_v9  ;;  %v13678_v9 = vrot.slane %v2057_v4, %v11763_v34  ;;  %v11515_v4 = vld [vmem:[%s14260_s1 + $0x14f0] sm:$0xff]  }
 0x237   :  { %10539 = vmatpush3.bf16.msra.mxu0 %v11432_v8  ;;  %v11477_v8 = vld [vmem:[%s14260_s1 + $0x1338] sm:$0xff]  }
 0x238   :  { %10540 = vmatprep.subr.bf16.mxu0 %v11435_v11  ;;  %v2094_v11 = vrot.slane %v2072_v6, %v11763_v34 }
 0x239   :  { %10561 = vmatpush3.bf16.msra.mxu1 %v11434_v10  ;;  %v11478_v10 = vld [vmem:[%s14260_s1 + $0x13f8] sm:$0xff]  }
 0x23a   :  { %10562 = vmatprep.subr.bf16.mxu1 %v11437_v13  ;;  %v2073_v13 = vcombine.high %v13678_v9, %v13678_v9 }
 0x23b   :  { %10541 = vmatpush3.bf16.msra.mxu0 %v11436_v12  ;;  %v11479_v12 = vld [vmem:[%s14260_s1 + $0x13b8] sm:$0xff]  }
 0x23c   :  { %10542 = vmatprep.subr.bf16.mxu0 %v11439_v15  ;;  %v11480_v15 = vld [vmem:[%s14260_s1 + $0x1370] sm:$0xff]  }
 0x23d   :  { %10563 = vmatpush3.bf16.msra.mxu1 %v11438_v14  ;;  %v2102_v14 = vcombine.high %v2080_v7, %v2080_v7 }
 0x23e   :  { %10564 = vmatprep.subr.bf16.mxu1 %v11441_v17  ;;  %v2104_v17 = vcombine.high %v2094_v11, %v2094_v11 }
 0x23f   :  { %10543 = vmatpush3.bf16.msra.mxu0 %v11440_v16 }
 0x240   :  { %10572 = vmatprep.subr.bf16.mxu0 %v11444_v20  ;;  %v11482_v20 = vld [vmem:[%s14260_s1 + $0x13f0] sm:$0xff]  }
 0x241   :  { %10565 = vmatpush3.bf16.msra.mxu1 %v11443_v18  ;;  %v11481_v18 = vld [vmem:[%s14260_s1 + $0x1330] sm:$0xff]  }
 0x242   :  { %v10280_v26 = vpop.f32.mrf.mxu0  ;;  %8421 = vmatmul.mubr.bf16.vlgmr.msra.gmra.mxu0 %v2038_v19  ;;  %10594 = vmatprep.subr.bf16.mxu1 %v11446_v22  ;;  %v2101_v19 = vrot.slane %v2073_v13, %v11763_v34 }
 0x243   :  { %10573 = vmatpush3.bf16.msra.mxu0 %v11445_v21  ;;  %8500 = vmatprep.mubr.bf16.mxu0 %v2094_v11 }
 0x244   :  { %v10281_v29 = vpop.f32.mrf.mxu0  ;;  %v10302_v30 = vpop.f32.mrf.mxu1  ;;  %8461 = vmatmul.mubr.bf16.vlgmr.msra.gmra.mxu1 %v2054_v24  ;;  %10574 = vmatprep.subr.bf16.mxu0 %v11448_v25  ;;  %v2105_v24 = vcombine.high %v2101_v19, %v2101_v19 }
 0x245   :  { %v10282_v32 = vadd.f32 %v10281_v29, %v10280_v26  ;;  %10595 = vmatpush3.bf16.msra.mxu1 %v11447_v23  ;;  %8540 = vmatprep.mubr.bf16.mxu1 %v2104_v17  ;;  %v11483_v23 = vld [vmem:[%s14260_s1 + $0x13b0] sm:$0xff]   ;;  %v11484_v26 = vld [vmem:[%s14260_s1 + $0x1368] sm:$0xff]  }
 0x246   :  { %v10283_v35 = vpop.f32.mrf.mxu0  ;;  %v10303_v36 = vpop.f32.mrf.mxu1  ;;  %10596 = vmatprep.subr.bf16.mxu1 %v11450_v28  ;;  %v11485_v29 = vld [vmem:[%s14260_s1 + $0x1328] sm:$0xff]  }
 0x247   :  { %v7943_v38 = vadd.f32 %v10282_v32, %v13503_v61  ;;  %v10304_v39 = vadd.f32 %v10303_v36, %v10302_v30  ;;  %10575 = vmatpush3.bf16.msra.mxu0 %v11449_v27  ;;  %v11471_v61 = vld [vmem:[%s14260_s1 + $0x1288] sm:$0xff]  }
 0x248   :  { %v10284_v41 = vpop.f32.mrf.mxu0  ;;  %v10305_v43 = vpop.f32.mrf.mxu1  ;;  %10576 = vmatprep.subr.bf16.mxu0 %v11452_v33  ;;  %v11486_v32 = vld [vmem:[%s14260_s1 + $0x13e8] sm:$0xff]  }
 0x249   :  { %v13604_v44 = vadd.f32 %v10304_v39, %v7943_v38  ;;  %10597 = vmatpush3.bf16.msra.mxu1 %v11451_v31  ;;  %v11487_v35 = vld [vmem:[%s14260_s1 + $0x13a8] sm:$0xff]   ;;  %v11488_v38 = vld [vmem:[%s14260_s1 + $0x1360] sm:$0xff]   ;;  %v11492_v43 = vld [vmem:[%s14260_s1 + $0x1358] sm:$0xff]  }
 0x24a   :  { %v10306_v47 = vpop.f32.mrf.mxu1  ;;  %10598 = vmatprep.subr.bf16.mxu1 %v11454_v40  ;;  %v11489_v39 = vld [vmem:[%s14260_s1 + $0x1320] sm:$0xff]   ;;  %v11520_v17 = vld [vmem:[%s14260_s1 + $0x14a8] sm:$0xff]  }
 0x24b   :  { %10577 = vmatpush3.bf16.msra.mxu0 %v11453_v37  ;;  %v11490_v41 = vld [vmem:[%s14260_s1 + $0x13e0] sm:$0xff]   ;;  %v11496_v47 = vld [vmem:[%s14260_s1 + $0x1350] sm:$0xff]  }
 0x24c   :  { %10578 = vmatprep.subr.bf16.mxu0 %v11456_v45  ;;  %v11494_v45 = vld [vmem:[%s14260_s1 + $0x13d8] sm:$0xff]  }
 0x24d   :  { %10599 = vmatpush3.bf16.msra.mxu1 %v11455_v42  ;;  %v11491_v42 = vld [vmem:[%s14260_s1 + $0x13a0] sm:$0xff]  }
 0x24e   :  { %10600 = vmatprep.subr.bf16.mxu1 %v11458_v48  ;;  %v11497_v48 = vld [vmem:[%s14260_s1 + $0x1310] sm:$0xff]  }
 0x24f   :  { %10579 = vmatpush3.bf16.msra.mxu0 %v11457_v46  ;;  %v11495_v46 = vld [vmem:[%s14260_s1 + $0x1398] sm:$0xff]  }
 0x250   :  { %10580 = vmatprep.subr.bf16.mxu0 %v11460_v50  ;;  %v11499_v50 = vld [vmem:[%s14260_s1 + $0x1390] sm:$0xff]  }
 0x251   :  { %10601 = vmatpush3.bf16.msra.mxu1 %v11459_v49  ;;  %v11498_v49 = vld [vmem:[%s14260_s1 + $0x13d0] sm:$0xff]  }
 0x252   :  { %10602 = vmatprep.subr.bf16.mxu1 %v11462_v52  ;;  %v11501_v52 = vld [vmem:[%s14260_s1 + $0x1308] sm:$0xff]  }
 0x253   :  { %10581 = vmatpush3.bf16.msra.mxu0 %v11461_v51  ;;  %v11500_v51 = vld [vmem:[%s14260_s1 + $0x1348] sm:$0xff]  }
 0x254   :  { %10582 = vmatprep.subr.bf16.mxu0 %v11464_v54  ;;  %v11503_v54 = vld [vmem:[%s14260_s1 + $0x1388] sm:$0xff]  }
 0x255   :  { %10603 = vmatpush3.bf16.msra.mxu1 %v11463_v53  ;;  %v11502_v53 = vld [vmem:[%s14260_s1 + $0x13c8] sm:$0xff]  }
 0x256   :  { %10604 = vmatprep.subr.bf16.mxu1 %v11466_v56  ;;  %v11505_v56 = vld [vmem:[%s14260_s1 + $0x1300] sm:$0xff]  }
 0x257   :  { %10583 = vmatpush3.bf16.msra.mxu0 %v11465_v55  ;;  %v11504_v55 = vld [vmem:[%s14260_s1 + $0x1340] sm:$0xff]  }
 0x258   :  { %10584 = vmatprep.subr.bf16.mxu0 %v11468_v58  ;;  %v11508_v58 = vld [vmem:[%s14260_s1 + $0x1380] sm:$0xff]  }
 0x259   :  { %10605 = vmatpush3.bf16.msra.mxu1 %v11467_v57  ;;  %v11506_v57 = vld [vmem:[%s14260_s1 + $0x13c0] sm:$0xff]  }
 0x25a   :  { %10606 = vmatprep.subr.bf16.mxu1 %v11470_v60  ;;  %v11509_v60 = vld [vmem:[%s14260_s1 + $0x1478] sm:$0xff]  }
 0x25b   :  { %10585 = vmatpush3.bf16.msra.mxu0 %v11469_v59  ;;  %v2087_v59 = vrot.slane %v13678_v9, %v11763_v34  ;;  %v11517_v9 = vld [vmem:[%s14260_s1 + $0x1468] sm:$0xff]  }
 0x25c   :  { %10586 = vmatprep.subr.bf16.mxu0 %v11472_v62  ;;  %v11511_v62 = vld [vmem:[%s14260_s1 + $0x14f8] sm:$0xff]  }
 0x25d   :  { %10607 = vmatpush3.bf16.msra.mxu1 %v11471_v61  ;;  %v11510_v61 = vld [vmem:[%s14260_s1 + $0x1438] sm:$0xff]  }
 0x25e   :  { %10608 = vmatprep.subr.bf16.mxu1 %v11474_v0  ;;  %v2103_v0 = vcombine.high %v2087_v59, %v2087_v59 }
 0x25f   :  { %10587 = vmatpush3.bf16.msra.mxu0 %v11473_v63  ;;  %v11512_v63 = vld [vmem:[%s14260_s1 + $0x14b8] sm:$0xff]  }
 0x260   :  { %10616 = vmatprep.subr.bf16.mxu0 %v11476_v5 }
 0x261   :  { %10609 = vmatpush3.bf16.msra.mxu1 %v11475_v3  ;;  %v11514_v3 = vld [vmem:[%s14260_s1 + $0x1430] sm:$0xff]  }
 0x262   :  { %v10324_v16 = vpop.f32.mrf.mxu0  ;;  %8501 = vmatmul.mubr.bf16.vlgmr.msra.gmra.mxu0 %v2080_v7  ;;  %10638 = vmatprep.subr.bf16.mxu1 %v11478_v10  ;;  %v11516_v7 = vld [vmem:[%s14260_s1 + $0x14b0] sm:$0xff]  }
 0x263   :  { %10617 = vmatpush3.bf16.msra.mxu0 %v11477_v8  ;;  %8580 = vmatprep.mubr.bf16.mxu0 %v2101_v19 }
 0x264   :  { %v10325_v21 = vpop.f32.mrf.mxu0  ;;  %v10346_v22 = vpop.f32.mrf.mxu1  ;;  %8541 = vmatmul.mubr.bf16.vlgmr.msra.gmra.mxu1 %v2102_v14  ;;  %10618 = vmatprep.subr.bf16.mxu0 %v11480_v15  ;;  %v11519_v15 = vld [vmem:[%s14260_s1 + $0x14e8] sm:$0xff]  }
 0x265   :  { %v10326_v25 = vadd.f32 %v10325_v21, %v10324_v16  ;;  %10639 = vmatpush3.bf16.msra.mxu1 %v11479_v12  ;;  %8620 = vmatprep.mubr.bf16.mxu1 %v2105_v24  ;;  %v11518_v12 = vld [vmem:[%s14260_s1 + $0x1428] sm:$0xff]   ;;  %v11522_v21 = vld [vmem:[%s14260_s1 + $0x1420] sm:$0xff]  }
 0x266   :  { %v10327_v27 = vpop.f32.mrf.mxu0  ;;  %v10347_v28 = vpop.f32.mrf.mxu1  ;;  %10640 = vmatprep.subr.bf16.mxu1 %v11482_v20  ;;  %v11521_v20 = vld [vmem:[%s14260_s1 + $0x1460] sm:$0xff]  }
 0x267   :  { %v8023_v30 = vadd.f32 %v10326_v25, %v13604_v44  ;;  %v10348_v31 = vadd.f32 %v10347_v28, %v10346_v22  ;;  %10619 = vmatpush3.bf16.msra.mxu0 %v11481_v18  ;;  %v11493_v44 = vld [vmem:[%s14260_s1 + $0x1318] sm:$0xff]   ;;  %v11524_v24 = vld [vmem:[%s14260_s1 + $0x14a0] sm:$0xff]  }
 0x268   :  { %v10328_v33 = vpop.f32.mrf.mxu0  ;;  %v10349_v36 = vpop.f32.mrf.mxu1  ;;  %10620 = vmatprep.subr.bf16.mxu0 %v11484_v26  ;;  %v11525_v25 = vld [vmem:[%s14260_s1 + $0x1458] sm:$0xff]  }
 0x269   :  { %v13715_v37 = vadd.f32 %v10348_v31, %v8023_v30  ;;  %10641 = vmatpush3.bf16.msra.mxu1 %v11483_v23  ;;  %v11523_v23 = vld [vmem:[%s14260_s1 + $0x14e0] sm:$0xff]   ;;  %v11526_v26 = vld [vmem:[%s14260_s1 + $0x1418] sm:$0xff]   ;;  %v11530_v30 = vld [vmem:[%s14260_s1 + $0x1410] sm:$0xff]  }
 0x26a   :  { %v10350_v40 = vpop.f32.mrf.mxu1  ;;  %10642 = vmatprep.subr.bf16.mxu1 %v11486_v32  ;;  %v11527_v27 = vld [vmem:[%s14260_s1 + $0x14d8] sm:$0xff]   ;;  %v11531_v31 = vld [vmem:[%s14260_s1 + $0x14d0] sm:$0xff]   ;;  %v11533_v33 = vld [vmem:[%s14260_s1 + $0x1448] sm:$0xff]  }
 0x26b   :  { %10621 = vmatpush3.bf16.msra.mxu0 %v11485_v29  ;;  %v11528_v28 = vld [vmem:[%s14260_s1 + $0x1498] sm:$0xff]   ;;  %v11529_v29 = vld [vmem:[%s14260_s1 + $0x1450] sm:$0xff]   ;;  %v11535_v36 = vld [vmem:[%s14260_s1 + $0x14c8] sm:$0xff]  }
 0x26c   :  { %10622 = vmatprep.subr.bf16.mxu0 %v11488_v38  ;;  %v11532_v32 = vld [vmem:[%s14260_s1 + $0x1490] sm:$0xff]   ;;  %v11537_v38 = vld [vmem:[%s14260_s1 + $0x1440] sm:$0xff]  }
 0x26d   :  { %10643 = vmatpush3.bf16.msra.mxu1 %v11487_v35  ;;  %v11534_v35 = vld [vmem:[%s14260_s1 + $0x1408] sm:$0xff]   ;;  %v11539_v40 = vld [vmem:[%s14260_s1 + $0x14c0] sm:$0xff]  }
 0x26e   :  { %10644 = vmatprep.subr.bf16.mxu1 %v11490_v41  ;;  %v25_v41 = vld [vmem:[%s14261_s0 + $0x50] sm:$0xff] }
 0x26f   :  { %10623 = vmatpush3.bf16.msra.mxu0 %v11489_v39  ;;  %v11538_v39 = vld [vmem:[%s14260_s1 + $0x1400] sm:$0xff]  }
 0x270   :  { %10624 = vmatprep.subr.bf16.mxu0 %v11492_v43  ;;  %v11540_v43 = vld [vmem:[%s14260_s1 + $0x1480] sm:$0xff]  }
 0x271   :  { %10645 = vmatpush3.bf16.msra.mxu1 %v11491_v42  ;;  %v2113_v42 = vrot.slane %v25_v41, %v11763_v34 }
 0x272   :  { %10646 = vmatprep.subr.bf16.mxu1 %v11494_v45  ;;  %v11541_v45 = vld [vmem:[%s14260_s1 + $0x1578] sm:$0xff]  }
 0x273   :  { %10625 = vmatpush3.bf16.msra.mxu0 %v11493_v44  ;;  %v2106_v44 = vcombine.high %v25_v41, %v25_v41  ;;  %v11578_v41 = vld [vmem:[%s14260_s1 + $0x1670] sm:$0xff]  }
 0x274   :  { %10626 = vmatprep.subr.bf16.mxu0 %v11496_v47  ;;  %v2129_v47 = vrot.slane %v2113_v42, %v11763_v34 }
 0x275   :  { %10647 = vmatpush3.bf16.msra.mxu1 %v11495_v46  ;;  %v2121_v46 = vcombine.high %v2113_v42, %v2113_v42 }
 0x276   :  { %10648 = vmatprep.subr.bf16.mxu1 %v11498_v49  ;;  %v13890_v49 = vrot.slane %v2106_v44, %v11763_v34  ;;  %v11580_v44 = vld [vmem:[%s14260_s1 + $0x16f0] sm:$0xff]  }
 0x277   :  { %10627 = vmatpush3.bf16.msra.mxu0 %v11497_v48  ;;  %v11542_v48 = vld [vmem:[%s14260_s1 + $0x1538] sm:$0xff]  }
 0x278   :  { %10628 = vmatprep.subr.bf16.mxu0 %v11500_v51  ;;  %v2143_v51 = vrot.slane %v2121_v46, %v11763_v34 }
 0x279   :  { %10649 = vmatpush3.bf16.msra.mxu1 %v11499_v50  ;;  %v11543_v50 = vld [vmem:[%s14260_s1 + $0x15f8] sm:$0xff]  }
 0x27a   :  { %10650 = vmatprep.subr.bf16.mxu1 %v11502_v53  ;;  %v2122_v53 = vcombine.high %v13890_v49, %v13890_v49 }
 0x27b   :  { %10629 = vmatpush3.bf16.msra.mxu0 %v11501_v52  ;;  %v11544_v52 = vld [vmem:[%s14260_s1 + $0x15b8] sm:$0xff]  }
 0x27c   :  { %10630 = vmatprep.subr.bf16.mxu0 %v11504_v55  ;;  %v11545_v55 = vld [vmem:[%s14260_s1 + $0x1570] sm:$0xff]  }
 0x27d   :  { %10651 = vmatpush3.bf16.msra.mxu1 %v11503_v54  ;;  %v2151_v54 = vcombine.high %v2129_v47, %v2129_v47 }
 0x27e   :  { %10652 = vmatprep.subr.bf16.mxu1 %v11506_v57  ;;  %v2153_v57 = vcombine.high %v2143_v51, %v2143_v51 }
 0x27f   :  { %10631 = vmatpush3.bf16.msra.mxu0 %v11505_v56 }
 0x280   :  { %10660 = vmatprep.subr.bf16.mxu0 %v11509_v60  ;;  %v11547_v60 = vld [vmem:[%s14260_s1 + $0x15f0] sm:$0xff]  }
 0x281   :  { %10653 = vmatpush3.bf16.msra.mxu1 %v11508_v58  ;;  %v11546_v58 = vld [vmem:[%s14260_s1 + $0x1530] sm:$0xff]  }
 0x282   :  { %v10368_v2 = vpop.f32.mrf.mxu0  ;;  %8581 = vmatmul.mubr.bf16.vlgmr.msra.gmra.mxu0 %v2087_v59  ;;  %10682 = vmatprep.subr.bf16.mxu1 %v11511_v62  ;;  %v2150_v59 = vrot.slane %v2122_v53, %v11763_v34 }
 0x283   :  { %10661 = vmatpush3.bf16.msra.mxu0 %v11510_v61  ;;  %8660 = vmatprep.mubr.bf16.mxu0 %v2143_v51 }
 0x284   :  { %v10369_v5 = vpop.f32.mrf.mxu0  ;;  %v10390_v6 = vpop.f32.mrf.mxu1  ;;  %8621 = vmatmul.mubr.bf16.vlgmr.msra.gmra.mxu1 %v2103_v0  ;;  %10662 = vmatprep.subr.bf16.mxu0 %v11513_v1  ;;  %v2154_v0 = vcombine.high %v2150_v59, %v2150_v59 }
 0x285   :  { %v10370_v8 = vadd.f32 %v10369_v5, %v10368_v2  ;;  %10683 = vmatpush3.bf16.msra.mxu1 %v11512_v63  ;;  %8700 = vmatprep.mubr.bf16.mxu1 %v2153_v57  ;;  %v11548_v63 = vld [vmem:[%s14260_s1 + $0x15b0] sm:$0xff]   ;;  %v11549_v2 = vld [vmem:[%s14260_s1 + $0x1568] sm:$0xff]  }
 0x286   :  { %v10371_v10 = vpop.f32.mrf.mxu0  ;;  %v10391_v11 = vpop.f32.mrf.mxu1  ;;  %10684 = vmatprep.subr.bf16.mxu1 %v11515_v4  ;;  %v11550_v5 = vld [vmem:[%s14260_s1 + $0x1528] sm:$0xff]  }
 0x287   :  { %v8103_v13 = vadd.f32 %v10370_v8, %v13715_v37  ;;  %v10392_v14 = vadd.f32 %v10391_v11, %v10390_v6  ;;  %10663 = vmatpush3.bf16.msra.mxu0 %v11514_v3  ;;  %v11536_v37 = vld [vmem:[%s14260_s1 + $0x1488] sm:$0xff]  }
 0x288   :  { %v10372_v16 = vpop.f32.mrf.mxu0  ;;  %v10393_v18 = vpop.f32.mrf.mxu1  ;;  %10664 = vmatprep.subr.bf16.mxu0 %v11517_v9  ;;  %v11551_v8 = vld [vmem:[%s14260_s1 + $0x15e8] sm:$0xff]  }
 0x289   :  { %v13816_v19 = vadd.f32 %v10392_v14, %v8103_v13  ;;  %10685 = vmatpush3.bf16.msra.mxu1 %v11516_v7  ;;  %v11552_v10 = vld [vmem:[%s14260_s1 + $0x15a8] sm:$0xff]   ;;  %v11553_v13 = vld [vmem:[%s14260_s1 + $0x1560] sm:$0xff]   ;;  %v11557_v18 = vld [vmem:[%s14260_s1 + $0x1558] sm:$0xff]  }
 0x28a   :  { %v10394_v22 = vpop.f32.mrf.mxu1  ;;  %10686 = vmatprep.subr.bf16.mxu1 %v11519_v15  ;;  %v11554_v14 = vld [vmem:[%s14260_s1 + $0x1520] sm:$0xff]   ;;  %v11585_v57 = vld [vmem:[%s14260_s1 + $0x16a8] sm:$0xff]  }
 0x28b   :  { %10665 = vmatpush3.bf16.msra.mxu0 %v11518_v12  ;;  %v11555_v16 = vld [vmem:[%s14260_s1 + $0x15e0] sm:$0xff]   ;;  %v11561_v22 = vld [vmem:[%s14260_s1 + $0x1550] sm:$0xff]  }
 0x28c   :  { %10666 = vmatprep.subr.bf16.mxu0 %v11521_v20  ;;  %v11559_v20 = vld [vmem:[%s14260_s1 + $0x15d8] sm:$0xff]  }
 0x28d   :  { %10687 = vmatpush3.bf16.msra.mxu1 %v11520_v17  ;;  %v11556_v17 = vld [vmem:[%s14260_s1 + $0x15a0] sm:$0xff]  }
 0x28e   :  { %10688 = vmatprep.subr.bf16.mxu1 %v11523_v23  ;;  %v11562_v23 = vld [vmem:[%s14260_s1 + $0x1510] sm:$0xff]  }
 0x28f   :  { %10667 = vmatpush3.bf16.msra.mxu0 %v11522_v21  ;;  %v11560_v21 = vld [vmem:[%s14260_s1 + $0x1598] sm:$0xff]  }
 0x290   :  { %10668 = vmatprep.subr.bf16.mxu0 %v11525_v25  ;;  %v11564_v25 = vld [vmem:[%s14260_s1 + $0x1590] sm:$0xff]  }
 0x291   :  { %10689 = vmatpush3.bf16.msra.mxu1 %v11524_v24  ;;  %v11563_v24 = vld [vmem:[%s14260_s1 + $0x15d0] sm:$0xff]  }
 0x292   :  { %10690 = vmatprep.subr.bf16.mxu1 %v11527_v27  ;;  %v11566_v27 = vld [vmem:[%s14260_s1 + $0x1508] sm:$0xff]  }
 0x293   :  { %10669 = vmatpush3.bf16.msra.mxu0 %v11526_v26  ;;  %v11565_v26 = vld [vmem:[%s14260_s1 + $0x1548] sm:$0xff]  }
 0x294   :  { %10670 = vmatprep.subr.bf16.mxu0 %v11529_v29  ;;  %v11568_v29 = vld [vmem:[%s14260_s1 + $0x1588] sm:$0xff]  }
 0x295   :  { %10691 = vmatpush3.bf16.msra.mxu1 %v11528_v28  ;;  %v11567_v28 = vld [vmem:[%s14260_s1 + $0x15c8] sm:$0xff]  }
 0x296   :  { %10692 = vmatprep.subr.bf16.mxu1 %v11531_v31  ;;  %v11570_v31 = vld [vmem:[%s14260_s1 + $0x1500] sm:$0xff]  }
 0x297   :  { %10671 = vmatpush3.bf16.msra.mxu0 %v11530_v30  ;;  %v11569_v30 = vld [vmem:[%s14260_s1 + $0x1540] sm:$0xff]  }
 0x298   :  { %10672 = vmatprep.subr.bf16.mxu0 %v11533_v33  ;;  %v11573_v33 = vld [vmem:[%s14260_s1 + $0x1580] sm:$0xff]  }
 0x299   :  { %10693 = vmatpush3.bf16.msra.mxu1 %v11532_v32  ;;  %v11571_v32 = vld [vmem:[%s14260_s1 + $0x15c0] sm:$0xff]  }
 0x29a   :  { %10694 = vmatprep.subr.bf16.mxu1 %v11535_v36  ;;  %v11574_v36 = vld [vmem:[%s14260_s1 + $0x1678] sm:$0xff]  }
 0x29b   :  { %10673 = vmatpush3.bf16.msra.mxu0 %v11534_v35  ;;  %v2136_v35 = vrot.slane %v13890_v49, %v11763_v34  ;;  %v11582_v49 = vld [vmem:[%s14260_s1 + $0x1668] sm:$0xff]  }
 0x29c   :  { %10674 = vmatprep.subr.bf16.mxu0 %v11537_v38  ;;  %v11576_v38 = vld [vmem:[%s14260_s1 + $0x16f8] sm:$0xff]  }
 0x29d   :  { %10695 = vmatpush3.bf16.msra.mxu1 %v11536_v37  ;;  %v11575_v37 = vld [vmem:[%s14260_s1 + $0x1638] sm:$0xff]  }
 0x29e   :  { %10696 = vmatprep.subr.bf16.mxu1 %v11539_v40  ;;  %v2152_v40 = vcombine.high %v2136_v35, %v2136_v35 }
 0x29f   :  { %10675 = vmatpush3.bf16.msra.mxu0 %v11538_v39  ;;  %v11577_v39 = vld [vmem:[%s14260_s1 + $0x16b8] sm:$0xff]  }
 0x2a0   :  { %10704 = vmatprep.subr.bf16.mxu0 %v11541_v45 }
 0x2a1   :  { %10697 = vmatpush3.bf16.msra.mxu1 %v11540_v43  ;;  %v11579_v43 = vld [vmem:[%s14260_s1 + $0x1630] sm:$0xff]  }
 0x2a2   :  { %v10412_v56 = vpop.f32.mrf.mxu0  ;;  %8661 = vmatmul.mubr.bf16.vlgmr.msra.gmra.mxu0 %v2129_v47  ;;  %10726 = vmatprep.subr.bf16.mxu1 %v11543_v50  ;;  %v11581_v47 = vld [vmem:[%s14260_s1 + $0x16b0] sm:$0xff]  }
 0x2a3   :  { %10705 = vmatpush3.bf16.msra.mxu0 %v11542_v48  ;;  %8740 = vmatprep.mubr.bf16.mxu0 %v2150_v59 }
 0x2a4   :  { %v10413_v61 = vpop.f32.mrf.mxu0  ;;  %v10434_v62 = vpop.f32.mrf.mxu1  ;;  %8701 = vmatmul.mubr.bf16.vlgmr.msra.gmra.mxu1 %v2151_v54  ;;  %10706 = vmatprep.subr.bf16.mxu0 %v11545_v55  ;;  %v11584_v55 = vld [vmem:[%s14260_s1 + $0x16e8] sm:$0xff]  }
 0x2a5   :  { %v10414_v1 = vadd.f32 %v10413_v61, %v10412_v56  ;;  %10727 = vmatpush3.bf16.msra.mxu1 %v11544_v52  ;;  %8780 = vmatprep.mubr.bf16.mxu1 %v2154_v0  ;;  %v11583_v52 = vld [vmem:[%s14260_s1 + $0x1628] sm:$0xff]   ;;  %v11587_v61 = vld [vmem:[%s14260_s1 + $0x1620] sm:$0xff]  }
 0x2a6   :  { %v10415_v3 = vpop.f32.mrf.mxu0  ;;  %v10435_v4 = vpop.f32.mrf.mxu1  ;;  %10728 = vmatprep.subr.bf16.mxu1 %v11547_v60  ;;  %v11586_v60 = vld [vmem:[%s14260_s1 + $0x1660] sm:$0xff]  }
 0x2a7   :  { %v8183_v6 = vadd.f32 %v10414_v1, %v13816_v19  ;;  %v10436_v7 = vadd.f32 %v10435_v4, %v10434_v62  ;;  %10707 = vmatpush3.bf16.msra.mxu0 %v11546_v58  ;;  %v11558_v19 = vld [vmem:[%s14260_s1 + $0x1518] sm:$0xff]   ;;  %v11589_v0 = vld [vmem:[%s14260_s1 + $0x16a0] sm:$0xff]  }
 0x2a8   :  { %v10416_v9 = vpop.f32.mrf.mxu0  ;;  %v10437_v11 = vpop.f32.mrf.mxu1  ;;  %10708 = vmatprep.subr.bf16.mxu0 %v11549_v2  ;;  %v11590_v1 = vld [vmem:[%s14260_s1 + $0x1658] sm:$0xff]  }
 0x2a9   :  { %v13927_v12 = vadd.f32 %v10436_v7, %v8183_v6  ;;  %10729 = vmatpush3.bf16.msra.mxu1 %v11548_v63  ;;  %v11588_v63 = vld [vmem:[%s14260_s1 + $0x16e0] sm:$0xff]   ;;  %v11591_v2 = vld [vmem:[%s14260_s1 + $0x1618] sm:$0xff]   ;;  %v11595_v6 = vld [vmem:[%s14260_s1 + $0x1610] sm:$0xff]  }
 0x2aa   :  { %v10438_v15 = vpop.f32.mrf.mxu1  ;;  %10730 = vmatprep.subr.bf16.mxu1 %v11551_v8  ;;  %v11592_v3 = vld [vmem:[%s14260_s1 + $0x16d8] sm:$0xff]   ;;  %v11596_v7 = vld [vmem:[%s14260_s1 + $0x16d0] sm:$0xff]   ;;  %v11598_v9 = vld [vmem:[%s14260_s1 + $0x1648] sm:$0xff]  }
 0x2ab   :  { %10709 = vmatpush3.bf16.msra.mxu0 %v11550_v5  ;;  %v11593_v4 = vld [vmem:[%s14260_s1 + $0x1698] sm:$0xff]   ;;  %v11594_v5 = vld [vmem:[%s14260_s1 + $0x1650] sm:$0xff]   ;;  %v11600_v11 = vld [vmem:[%s14260_s1 + $0x16c8] sm:$0xff]  }
 0x2ac   :  { %10710 = vmatprep.subr.bf16.mxu0 %v11553_v13  ;;  %v11597_v8 = vld [vmem:[%s14260_s1 + $0x1690] sm:$0xff]   ;;  %v11602_v13 = vld [vmem:[%s14260_s1 + $0x1640] sm:$0xff]  }
 0x2ad   :  { %10731 = vmatpush3.bf16.msra.mxu1 %v11552_v10  ;;  %v11599_v10 = vld [vmem:[%s14260_s1 + $0x1608] sm:$0xff]   ;;  %v11604_v15 = vld [vmem:[%s14260_s1 + $0x16c0] sm:$0xff]  }
 0x2ae   :  { %10732 = vmatprep.subr.bf16.mxu1 %v11555_v16  ;;  %v26_v16 = vld [vmem:[%s14261_s0 + $0x58] sm:$0xff] }
 0x2af   :  { %10711 = vmatpush3.bf16.msra.mxu0 %v11554_v14  ;;  %v11603_v14 = vld [vmem:[%s14260_s1 + $0x1600] sm:$0xff]  }
 0x2b0   :  { %10712 = vmatprep.subr.bf16.mxu0 %v11557_v18  ;;  %v11605_v18 = vld [vmem:[%s14260_s1 + $0x1680] sm:$0xff]  }
 0x2b1   :  { %10733 = vmatpush3.bf16.msra.mxu1 %v11556_v17  ;;  %v2162_v17 = vrot.slane %v26_v16, %v11763_v34 }
 0x2b2   :  { %10734 = vmatprep.subr.bf16.mxu1 %v11559_v20  ;;  %v11606_v20 = vld [vmem:[%s14260_s1 + $0x1778] sm:$0xff]  }
 0x2b3   :  { %10713 = vmatpush3.bf16.msra.mxu0 %v11558_v19  ;;  %v2155_v19 = vcombine.high %v26_v16, %v26_v16 }
 0x2b4   :  { %10714 = vmatprep.subr.bf16.mxu0 %v11561_v22  ;;  %v2178_v22 = vrot.slane %v2162_v17, %v11763_v34 }
 0x2b5   :  { %10735 = vmatpush3.bf16.msra.mxu1 %v11560_v21  ;;  %v2170_v21 = vcombine.high %v2162_v17, %v2162_v17 }
 0x2b6   :  { %10736 = vmatprep.subr.bf16.mxu1 %v11563_v24  ;;  %v11608_v24 = vld [vmem:[%s14260_s1 + $0x17f8] sm:$0xff]  }
 0x2b7   :  { %10715 = vmatpush3.bf16.msra.mxu0 %v11562_v23  ;;  %v14099_v23 = vrot.slane %v2155_v19, %v11763_v34 }
 0x2b8   :  { %10716 = vmatprep.subr.bf16.mxu0 %v11565_v26  ;;  %v11607_v26 = vld [vmem:[%s14260_s1 + $0x1738] sm:$0xff]  }
 0x2b9   :  { %10737 = vmatpush3.bf16.msra.mxu1 %v11564_v25  ;;  %v2192_v25 = vrot.slane %v2170_v21, %v11763_v34 }
 0x2ba   :  { %10738 = vmatprep.subr.bf16.mxu1 %v11567_v28  ;;  %v2200_v28 = vcombine.high %v2178_v22, %v2178_v22 }
 0x2bb   :  { %10717 = vmatpush3.bf16.msra.mxu0 %v11566_v27  ;;  %v2171_v27 = vcombine.high %v14099_v23, %v14099_v23 }
 0x2bc   :  { %10718 = vmatprep.subr.bf16.mxu0 %v11569_v30 }
 0x2bd   :  { %10739 = vmatpush3.bf16.msra.mxu1 %v11568_v29  ;;  %v11610_v29 = vld [vmem:[%s14260_s1 + $0x1770] sm:$0xff]  }
 0x2be   :  { %10740 = vmatprep.subr.bf16.mxu1 %v11571_v32  ;;  %v11609_v32 = vld [vmem:[%s14260_s1 + $0x17b8] sm:$0xff]  }
 0x2bf   :  { %10719 = vmatpush3.bf16.msra.mxu0 %v11570_v31  ;;  %v2202_v31 = vcombine.high %v2192_v25, %v2192_v25 }
 0x2c0   :  { %10748 = vmatprep.subr.bf16.mxu0 %v11574_v36 }
 0x2c1   :  { %10741 = vmatpush3.bf16.msra.mxu1 %v11573_v33  ;;  %v2199_v33 = vrot.slane %v2171_v27, %v11763_v34 }
 0x2c2   :  { %v10456_v42 = vpop.f32.mrf.mxu0  ;;  %8741 = vmatmul.mubr.bf16.vlgmr.msra.gmra.mxu0 %v2136_v35  ;;  %10770 = vmatprep.subr.bf16.mxu1 %v11576_v38  ;;  %v11612_v35 = vld [vmem:[%s14260_s1 + $0x17f0] sm:$0xff]  }
 0x2c3   :  { %10749 = vmatpush3.bf16.msra.mxu0 %v11575_v37  ;;  %8820 = vmatprep.mubr.bf16.mxu0 %v2192_v25  ;;  %v11611_v38 = vld [vmem:[%s14260_s1 + $0x1730] sm:$0xff]  }
 0x2c4   :  { %v10457_v45 = vpop.f32.mrf.mxu0  ;;  %v10478_v46 = vpop.f32.mrf.mxu1  ;;  %8781 = vmatmul.mubr.bf16.vlgmr.msra.gmra.mxu1 %v2152_v40  ;;  %10750 = vmatprep.subr.bf16.mxu0 %v11578_v41  ;;  %v11614_v41 = vld [vmem:[%s14260_s1 + $0x1768] sm:$0xff]  }
 0x2c5   :  { %v10458_v48 = vadd.f32 %v10457_v45, %v10456_v42  ;;  %10771 = vmatpush3.bf16.msra.mxu1 %v11577_v39  ;;  %8860 = vmatprep.mubr.bf16.mxu1 %v2202_v31  ;;  %v2203_v39 = vcombine.high %v2199_v33, %v2199_v33  ;;  %v11646_v31 = vld [vmem:[%s14260_s1 + $0x1820] sm:$0xff]  }
 0x2c6   :  { %v10459_v50 = vpop.f32.mrf.mxu0  ;;  %v10479_v51 = vpop.f32.mrf.mxu1  ;;  %10772 = vmatprep.subr.bf16.mxu1 %v11580_v44  ;;  %v11613_v44 = vld [vmem:[%s14260_s1 + $0x17b0] sm:$0xff]  }
 0x2c7   :  { %v8263_v53 = vadd.f32 %v10458_v48, %v13927_v12  ;;  %v10480_v54 = vadd.f32 %v10479_v51, %v10478_v46  ;;  %10751 = vmatpush3.bf16.msra.mxu0 %v11579_v43  ;;  %v11601_v12 = vld [vmem:[%s14260_s1 + $0x1688] sm:$0xff]  }
 0x2c8   :  { %v10460_v56 = vpop.f32.mrf.mxu0  ;;  %v10481_v58 = vpop.f32.mrf.mxu1  ;;  %10752 = vmatprep.subr.bf16.mxu0 %v11582_v49  ;;  %v11615_v49 = vld [vmem:[%s14260_s1 + $0x1728] sm:$0xff]  }
 0x2c9   :  { %v14028_v59 = vadd.f32 %v10480_v54, %v8263_v53  ;;  %10773 = vmatpush3.bf16.msra.mxu1 %v11581_v47  ;;  %v11616_v47 = vld [vmem:[%s14260_s1 + $0x17e8] sm:$0xff]   ;;  %v11619_v56 = vld [vmem:[%s14260_s1 + $0x1720] sm:$0xff]  }
 0x2ca   :  { %v10482_v62 = vpop.f32.mrf.mxu1  ;;  %10774 = vmatprep.subr.bf16.mxu1 %v11584_v55  ;;  %v11617_v53 = vld [vmem:[%s14260_s1 + $0x17a8] sm:$0xff]   ;;  %v11620_v55 = vld [vmem:[%s14260_s1 + $0x17e0] sm:$0xff]  }
 0x2cb   :  { %10753 = vmatpush3.bf16.msra.mxu0 %v11583_v52  ;;  %v11618_v52 = vld [vmem:[%s14260_s1 + $0x1760] sm:$0xff]   ;;  %v11625_v62 = vld [vmem:[%s14260_s1 + $0x1798] sm:$0xff]  }
 0x2cc   :  { %10754 = vmatprep.subr.bf16.mxu0 %v11586_v60  ;;  %v11621_v58 = vld [vmem:[%s14260_s1 + $0x17a0] sm:$0xff]   ;;  %v11623_v60 = vld [vmem:[%s14260_s1 + $0x1718] sm:$0xff]  }
 0x2cd   :  { %10775 = vmatpush3.bf16.msra.mxu1 %v11585_v57  ;;  %v11622_v57 = vld [vmem:[%s14260_s1 + $0x1758] sm:$0xff]  }
 0x2ce   :  { %10776 = vmatprep.subr.bf16.mxu1 %v11588_v63  ;;  %v11628_v63 = vld [vmem:[%s14260_s1 + $0x17d0] sm:$0xff]  }
 0x2cf   :  { %10755 = vmatpush3.bf16.msra.mxu0 %v11587_v61  ;;  %v11626_v61 = vld [vmem:[%s14260_s1 + $0x1750] sm:$0xff]  }
 0x2d0   :  { %10756 = vmatprep.subr.bf16.mxu0 %v11590_v1  ;;  %v11630_v1 = vld [vmem:[%s14260_s1 + $0x1748] sm:$0xff]  }
 0x2d1   :  { %10777 = vmatpush3.bf16.msra.mxu1 %v11589_v0  ;;  %v11627_v0 = vld [vmem:[%s14260_s1 + $0x1710] sm:$0xff]  }
 0x2d2   :  { %10778 = vmatprep.subr.bf16.mxu1 %v11592_v3  ;;  %v11632_v3 = vld [vmem:[%s14260_s1 + $0x17c8] sm:$0xff]  }
 0x2d3   :  { %10757 = vmatpush3.bf16.msra.mxu0 %v11591_v2  ;;  %v11629_v2 = vld [vmem:[%s14260_s1 + $0x1790] sm:$0xff]  }
 0x2d4   :  { %10758 = vmatprep.subr.bf16.mxu0 %v11594_v5  ;;  %v11634_v5 = vld [vmem:[%s14260_s1 + $0x1740] sm:$0xff]  }
 0x2d5   :  { %10779 = vmatpush3.bf16.msra.mxu1 %v11593_v4  ;;  %v11631_v4 = vld [vmem:[%s14260_s1 + $0x1708] sm:$0xff]  }
 0x2d6   :  { %10780 = vmatprep.subr.bf16.mxu1 %v11596_v7  ;;  %v11636_v7 = vld [vmem:[%s14260_s1 + $0x17c0] sm:$0xff]  }
 0x2d7   :  { %10759 = vmatpush3.bf16.msra.mxu0 %v11595_v6  ;;  %v11633_v6 = vld [vmem:[%s14260_s1 + $0x1788] sm:$0xff]  }
 0x2d8   :  { %10760 = vmatprep.subr.bf16.mxu0 %v11598_v9  ;;  %v2185_v9 = vrot.slane %v14099_v23, %v11763_v34 }
 0x2d9   :  { %10781 = vmatpush3.bf16.msra.mxu1 %v11597_v8  ;;  %v11635_v8 = vld [vmem:[%s14260_s1 + $0x1700] sm:$0xff]  }
 0x2da   :  { %10782 = vmatprep.subr.bf16.mxu1 %v11600_v11  ;;  %v11638_v11 = vld [vmem:[%s14260_s1 + $0x1780] sm:$0xff]  }
 0x2db   :  { %10761 = vmatpush3.bf16.msra.mxu0 %v11599_v10  ;;  %v11639_v10 = vld [vmem:[%s14260_s1 + $0x1878] sm:$0xff]  }
 0x2dc   :  { %10762 = vmatprep.subr.bf16.mxu0 %v11602_v13  ;;  %v2201_v13 = vcombine.high %v2185_v9, %v2185_v9 }
 0x2dd   :  { %10783 = vmatpush3.bf16.msra.mxu1 %v11601_v12  ;;  %v11640_v12 = vld [vmem:[%s14260_s1 + $0x1838] sm:$0xff]  }
 0x2de   :  { %10784 = vmatprep.subr.bf16.mxu1 %v11604_v15 }
 0x2df   :  { %10763 = vmatpush3.bf16.msra.mxu0 %v11603_v14  ;;  %v11641_v14 = vld [vmem:[%s14260_s1 + $0x1870] sm:$0xff]  }
 0x2e0   :  { %10792 = vmatprep.subr.bf16.mxu0 %v11606_v20  ;;  %v11643_v20 = vld [vmem:[%s14260_s1 + $0x1868] sm:$0xff]  }
 0x2e1   :  { %10785 = vmatpush3.bf16.msra.mxu1 %v11605_v18  ;;  %v11642_v18 = vld [vmem:[%s14260_s1 + $0x1830] sm:$0xff]  }
 0x2e2   :  { %v10500_v30 = vpop.f32.mrf.mxu0  ;;  %10814 = vmatprep.subr.bf16.mxu1 %v11608_v24  ;;  %8821 = vmatmul.mubr.bf16.vlgmr.msra.gmra.mxu0 %v2178_v22 }
 0x2e3   :  { %10793 = vmatpush3.bf16.msra.mxu0 %v11607_v26  ;;  %8900 = vmatprep.mubr.bf16.mxu0 %v2199_v33  ;;  %v11644_v26 = vld [vmem:[%s14260_s1 + $0x1828] sm:$0xff]   ;;  %v11647_v33 = vld [vmem:[%s14260_s1 + $0x1858] sm:$0xff]  }
 0x2e4   :  { %v10501_v36 = vpop.f32.mrf.mxu0  ;;  %v10522_v37 = vpop.f32.mrf.mxu1  ;;  %8861 = vmatmul.mubr.bf16.vlgmr.msra.gmra.mxu1 %v2200_v28  ;;  %10794 = vmatprep.subr.bf16.mxu0 %v11610_v29  ;;  %v11645_v29 = vld [vmem:[%s14260_s1 + $0x1860] sm:$0xff]  }
 0x2e5   :  { %v10502_v40 = vadd.f32 %v10501_v36, %v10500_v30  ;;  %10815 = vmatpush3.bf16.msra.mxu1 %v11609_v32  ;;  %8940 = vmatprep.mubr.bf16.mxu1 %v2203_v39  ;;  %v8995_v32 = vld.sshfl [vmem:[%s14261_s0 + $0x60] sm:$0x11 pattern:$0x75316420]  ;;  %v11650_v39 = vld [vmem:[%s14260_s1 + $0x1810] sm:$0xff]  }
 0x2e6   :  { %v10503_v42 = vpop.f32.mrf.mxu0  ;;  %v10523_v43 = vpop.f32.mrf.mxu1  ;;  %10816 = vmatprep.subr.bf16.mxu1 %v11612_v35  ;;  %v2211_v35 = vcombine.high %v8995_v32, %v8995_v32 }
 0x2e7   :  { %v8343_v45 = vadd.f32 %v10502_v40, %v14028_v59  ;;  %v10524_v46 = vadd.f32 %v10523_v43, %v10522_v37  ;;  %10795 = vmatpush3.bf16.msra.mxu0 %v11611_v38  ;;  %v11624_v59 = vld [vmem:[%s14260_s1 + $0x17d8] sm:$0xff]   ;;  %v11649_v38 = vld [vmem:[%s14260_s1 + $0x1850] sm:$0xff]   ;;  %v11651_v40 = vld [vmem:[%s14260_s1 + $0x1848] sm:$0xff]  }
 0x2e8   :  { %v10504_v48 = vpop.f32.mrf.mxu0  ;;  %v10525_v50 = vpop.f32.mrf.mxu1  ;;  %10796 = vmatprep.subr.bf16.mxu0 %v11614_v41  ;;  %v2225_v36 = vrot.slane %v2211_v35, %v11763_v34  ;;  %v11648_v37 = vld [vmem:[%s14260_s1 + $0x1818] sm:$0xff]   ;;  %v11652_v41 = vld [vmem:[%s14260_s1 + $0x1808] sm:$0xff]   ;;  %v11653_v42 = vld [vmem:[%s14260_s1 + $0x1840] sm:$0xff]  }
 0x2e9   :  { %v14136_v51 = vadd.f32 %v10524_v46, %v8343_v45  ;;  %10817 = vmatpush3.bf16.msra.mxu1 %v11613_v44  ;;  %v11654_v43 = vld [vmem:[%s14260_s1 + $0x1800] sm:$0xff]   ;;  %v2218_v44 = vrot.slane %v8995_v32, %v11763_v34 }
 0x2ea   :  { %v10526_v54 = vpop.f32.mrf.mxu1  ;;  %10818 = vmatprep.subr.bf16.mxu1 %v11616_v47 }
 0x2eb   :  { %10797 = vmatpush3.bf16.msra.mxu0 %v11615_v49 }
 0x2ec   :  { %10798 = vmatprep.subr.bf16.mxu0 %v11618_v52 }
 0x2ed   :  { %10819 = vmatpush3.bf16.msra.mxu1 %v11617_v53 }
 0x2ee   :  { %10820 = vmatprep.subr.bf16.mxu1 %v11620_v55 }
 0x2ef   :  { %10799 = vmatpush3.bf16.msra.mxu0 %v11619_v56 }
 0x2f0   :  { %10800 = vmatprep.subr.bf16.mxu0 %v11622_v57 }
 0x2f1   :  { %10821 = vmatpush3.bf16.msra.mxu1 %v11621_v58 }
 0x2f2   :  { %10822 = vmatprep.subr.bf16.mxu1 %v11624_v59 }
 0x2f3   :  { %10801 = vmatpush3.bf16.msra.mxu0 %v11623_v60 }
 0x2f4   :  { %10802 = vmatprep.subr.bf16.mxu0 %v11626_v61 }
 0x2f5   :  { %10823 = vmatpush3.bf16.msra.mxu1 %v11625_v62 }
 0x2f6   :  { %10824 = vmatprep.subr.bf16.mxu1 %v11628_v63 }
 0x2f7   :  { %10803 = vmatpush3.bf16.msra.mxu0 %v11627_v0 }
 0x2f8   :  { %10804 = vmatprep.subr.bf16.mxu0 %v11630_v1 }
 0x2f9   :  { %10825 = vmatpush3.bf16.msra.mxu1 %v11629_v2 }
 0x2fa   :  { %10826 = vmatprep.subr.bf16.mxu1 %v11632_v3 }
 0x2fb   :  { %10805 = vmatpush3.bf16.msra.mxu0 %v11631_v4 }
 0x2fc   :  { %10806 = vmatprep.subr.bf16.mxu0 %v11634_v5 }
 0x2fd   :  { %10827 = vmatpush3.bf16.msra.mxu1 %v11633_v6 }
 0x2fe   :  { %10828 = vmatprep.subr.bf16.mxu1 %v11636_v7 }
 0x2ff   :  { %10807 = vmatpush3.bf16.msra.mxu0 %v11635_v8 }
 0x300   :  { %10836 = vmatprep.subr.bf16.mxu0 %v11639_v10 }
 0x301   :  { %10829 = vmatpush3.bf16.msra.mxu1 %v11638_v11 }
 0x302   :  { %v10544_v15 = vpop.f32.mrf.mxu0  ;;  %8901 = vmatmul.mubr.bf16.vlgmr.msra.gmra.mxu0 %v2185_v9 }
 0x303   :  { %10837 = vmatpush3.bf16.msra.mxu0 %v11640_v12  ;;  %8980 = vmatprep.mubr.bf16.mxu0 %v2225_v36 }
 0x304   :  { %v10545_v16 = vpop.f32.mrf.mxu0  ;;  %v10566_v17 = vpop.f32.mrf.mxu1  ;;  %8941 = vmatmul.mubr.bf16.vlgmr.msra.gmra.mxu1 %v2201_v13  ;;  %10838 = vmatprep.subr.bf16.mxu0 %v11641_v14 }
 0x305   :  { %v10546_v19 = vadd.f32 %v10545_v16, %v10544_v15 }
 0x306   :  { %v10547_v21 = vpop.f32.mrf.mxu0  ;;  %v10567_v22 = vpop.f32.mrf.mxu1 }
 0x307   :  { %v8423_v23 = vadd.f32 %v10546_v19, %v14136_v51  ;;  %v10568_v24 = vadd.f32 %v10567_v22, %v10566_v17  ;;  %10839 = vmatpush3.bf16.msra.mxu0 %v11642_v18 }
 0x308   :  { %v10548_v25 = vpop.f32.mrf.mxu0  ;;  %v10569_v27 = vpop.f32.mrf.mxu1  ;;  %10840 = vmatprep.subr.bf16.mxu0 %v11643_v20 }
 0x309   :  { %v8463_v28 = vadd.f32 %v10568_v24, %v8423_v23 }
 0x30a   :  { %v10570_v30 = vpop.f32.mrf.mxu1 }
 0x30b   :  { %10841 = vmatpush3.bf16.msra.mxu0 %v11644_v26 }
 0x30c   :  { %10842 = vmatprep.subr.bf16.mxu0 %v11645_v29 }
 0x30f   :  { %10843 = vmatpush3.bf16.msra.mxu0 %v11646_v31 }
 0x310   :  { %10844 = vmatprep.subr.bf16.mxu0 %v11647_v33 }
 0x313   :  { %10845 = vmatpush3.bf16.msra.mxu0 %v11648_v37 }
 0x314   :  { %10846 = vmatprep.subr.bf16.mxu0 %v11649_v38 }
 0x317   :  { %10847 = vmatpush3.bf16.msra.mxu0 %v11650_v39 }
 0x318   :  { %10848 = vmatprep.subr.bf16.mxu0 %v11651_v40 }
 0x31b   :  { %10849 = vmatpush3.bf16.msra.mxu0 %v11652_v41 }
 0x31c   :  { %10850 = vmatprep.subr.bf16.mxu0 %v11653_v42 }
 0x31f   :  { %10851 = vmatpush3.bf16.msra.mxu0 %v11654_v43 }
 0x322   :  { %v10588_v45 = vpop.f32.mrf.mxu0  ;;  %8981 = vmatmul.mubr.bf16.vlgmr.msra.gmra.mxu0 %v2218_v44 }
 0x324   :  { %v10589_v46 = vpop.f32.mrf.mxu0  ;;  %v10610_v47 = vpop.f32.mrf.mxu1 }
 0x325   :  { %v10590_v48 = vadd.f32 %v10589_v46, %v10588_v45 }
 0x326   :  { %v10591_v49 = vpop.f32.mrf.mxu0  ;;  %v10611_v50 = vpop.f32.mrf.mxu1 }
 0x327   :  { %v8503_v51 = vadd.f32 %v10590_v48, %v8463_v28  ;;  %v10612_v52 = vadd.f32 %v10611_v50, %v10610_v47 }
 0x328   :  { %v10592_v53 = vpop.f32.mrf.mxu0  ;;  %v10613_v54 = vpop.f32.mrf.mxu1 }
 0x329   :  { %v8543_v55 = vadd.f32 %v10612_v52, %v8503_v51 }
 0x32a   :  { %v10614_v56 = vpop.f32.mrf.mxu1 }
 0x342   :  { %v10632_v57 = vpop.f32.mrf.mxu0 }
 0x344   :  { %v10633_v58 = vpop.f32.mrf.mxu0  ;;  %v10654_v59 = vpop.f32.mrf.mxu1 }
 0x345   :  { %v10634_v60 = vadd.f32 %v10633_v58, %v10632_v57 }
 0x346   :  { %v10635_v61 = vpop.f32.mrf.mxu0  ;;  %v10655_v34 = vpop.f32.mrf.mxu1 }
 0x347   :  { %v8583_v62 = vadd.f32 %v10634_v60, %v8543_v55  ;;  %v10656_v63 = vadd.f32 %v10655_v34, %v10654_v59 }
 0x348   :  { %v10636_v0 = vpop.f32.mrf.mxu0  ;;  %v10657_v1 = vpop.f32.mrf.mxu1 }
 0x349   :  { %v8623_v2 = vadd.f32 %v10656_v63, %v8583_v62 }
 0x34a   :  { %v10658_v3 = vpop.f32.mrf.mxu1 }
 0x362   :  { %v10676_v4 = vpop.f32.mrf.mxu0 }
 0x364   :  { %v10677_v5 = vpop.f32.mrf.mxu0  ;;  %v10698_v6 = vpop.f32.mrf.mxu1 }
 0x365   :  { %v10678_v7 = vadd.f32 %v10677_v5, %v10676_v4 }
 0x366   :  { %v10679_v8 = vpop.f32.mrf.mxu0  ;;  %v10699_v9 = vpop.f32.mrf.mxu1 }
 0x367   :  { %v8663_v10 = vadd.f32 %v10678_v7, %v8623_v2  ;;  %v10700_v11 = vadd.f32 %v10699_v9, %v10698_v6 }
 0x368   :  { %v10680_v12 = vpop.f32.mrf.mxu0  ;;  %v10701_v13 = vpop.f32.mrf.mxu1 }
 0x369   :  { %v8703_v14 = vadd.f32 %v10700_v11, %v8663_v10 }
 0x36a   :  { %v10702_v15 = vpop.f32.mrf.mxu1 }
 0x382   :  { %v10720_v16 = vpop.f32.mrf.mxu0 }
 0x384   :  { %v10721_v17 = vpop.f32.mrf.mxu0  ;;  %v10742_v18 = vpop.f32.mrf.mxu1 }
 0x385   :  { %v10722_v19 = vadd.f32 %v10721_v17, %v10720_v16 }
 0x386   :  { %v10723_v20 = vpop.f32.mrf.mxu0  ;;  %v10743_v21 = vpop.f32.mrf.mxu1 }
 0x387   :  { %v8743_v22 = vadd.f32 %v10722_v19, %v8703_v14  ;;  %v10744_v23 = vadd.f32 %v10743_v21, %v10742_v18 }
 0x388   :  { %v10724_v24 = vpop.f32.mrf.mxu0  ;;  %v10745_v25 = vpop.f32.mrf.mxu1 }
 0x389   :  { %v8783_v26 = vadd.f32 %v10744_v23, %v8743_v22 }
 0x38a   :  { %v10746_v27 = vpop.f32.mrf.mxu1 }
 0x3a2   :  { %v10764_v28 = vpop.f32.mrf.mxu0 }
 0x3a4   :  { %v10765_v29 = vpop.f32.mrf.mxu0  ;;  %v10786_v30 = vpop.f32.mrf.mxu1 }
 0x3a5   :  { %v10766_v45 = vadd.f32 %v10765_v29, %v10764_v28 }
 0x3a6   :  { %v10767_v31 = vpop.f32.mrf.mxu0  ;;  %v10787_v32 = vpop.f32.mrf.mxu1 }
 0x3a7   :  { %v8823_v46 = vadd.f32 %v10766_v45, %v8783_v26  ;;  %v10788_v47 = vadd.f32 %v10787_v32, %v10786_v30 }
 0x3a8   :  { %v10768_v33 = vpop.f32.mrf.mxu0  ;;  %v10789_v35 = vpop.f32.mrf.mxu1 }
 0x3a9   :  { %v8863_v49 = vadd.f32 %v10788_v47, %v8823_v46 }
 0x3aa   :  { %v10790_v36 = vpop.f32.mrf.mxu1 }
 0x3c2   :  { %v10808_v37 = vpop.f32.mrf.mxu0 }
 0x3c4   :  { %v10809_v38 = vpop.f32.mrf.mxu0  ;;  %v10830_v39 = vpop.f32.mrf.mxu1 }
 0x3c5   :  { %v10810_v48 = vadd.f32 %v10809_v38, %v10808_v37 }
 0x3c6   :  { %v10811_v40 = vpop.f32.mrf.mxu0  ;;  %v10831_v41 = vpop.f32.mrf.mxu1 }
 0x3c7   :  { %v8903_v50 = vadd.f32 %v10810_v48, %v8863_v49  ;;  %v10832_v51 = vadd.f32 %v10831_v41, %v10830_v39 }
 0x3c8   :  { %v10812_v42 = vpop.f32.mrf.mxu0  ;;  %v10833_v43 = vpop.f32.mrf.mxu1 }
 0x3c9   :  { %v8943_v54 = vadd.f32 %v10832_v51, %v8903_v50 }
 0x3ca   :  { %v10834_v44 = vpop.f32.mrf.mxu1 }
 0x3e2   :  { %v10852_v52 = vpop.f32.mrf.mxu0 }
 0x3e4   :  { %v10853_v53 = vpop.f32.mrf.mxu0 }
 0x3e5   :  { %v10854_v55 = vadd.f32 %v10853_v53, %v10852_v52 }
 0x3e6   :  { %v10855_v56 = vpop.f32.mrf.mxu0 }
 0x3e7   :  { %v8983_v57 = vadd.f32 %v10854_v55, %v8943_v54 }
 0x3e8   :  { %v10856_v58 = vpop.f32.mrf.mxu0 }
 0x3e9   :  { %v8988_v59 = vmax.f32 %v8983_v57, 0.0 }
 0x3eb   :  { %8989 = vst [vmem:[%s14263_s3] sm:$0x3] %v8988_v59 }

</bundles_post_ra>
